<compile_context>
chip_gen: v6e
topology: v6e:2x2x1
jax: 0.10.0
libtpu: 0.0.40
codegen_flags: <defaults>
</compile_context>

<pallas_src>
import math

import jax
import jax.numpy as jnp
from jax.experimental import pallas as pl
from jax.experimental.pallas import tpu as pltpu

# ---------------- scaled-down PaSST config ----------------
B = 4            # batch
B_TILE = 2       # batch elements folded into one grid step (lane-packed front end)
T = 1024         # audio samples
N_FFT = 64
HOP = 64
N_BINS = 32      # kept DFT bins
N_MELS = 16
PATCH = 4        # patch size (freq and time)
D = 32           # embed dim
NH = 2           # heads
HD = D // NH
MLP_H = 4 * D
DEPTH = 2        # transformer blocks
N_FRAMES = 1 + (T - N_FFT) // HOP          # 16
PF = N_MELS // PATCH                        # 4 patches along freq
PT = N_FRAMES // PATCH                      # 4 patches along time
NPATCH = PF * PT                            # 16
NTOK = 2 + NPATCH                           # 18 tokens (cls, dist, patches)
S_TOK = B_TILE * NTOK                       # 36 tokens per grid step

assert B_TILE in (1, 2), "block-mask construction below assumes B_TILE <= 2"


def _const_spec(shape):
    """Full-array block, same block for every grid step (fetched once, VMEM-resident)."""
    n = len(shape)
    return pl.BlockSpec(shape, lambda i, _n=n: (0,) * _n)


# ---------------- the single fused forward kernel (B_TILE batch elements per grid step) -------
def fused_kernel(frames_ref, dftw_ref, melfb_ref, patchm_ref, tok_tab_ref, vecs_ref,
                 wqkv_ref, bqkv_ref, wproj_ref, w1_ref, b1_ref, w2_ref,
                 o_ref, x_scr):
    f32 = jnp.float32

    # ---- front end: windowed DFT power -> mel -> log (B_TILE waveforms packed along lanes) ----
    # frame rows are in (ti, pt) order; Hann window folded into dftw; re|im share one matmul;
    # dftw / melfb are block-diagonal per batch element so one lane-dense matmul serves both.
    frames = frames_ref[...]                                           # (N_FRAMES, B_TILE*N_FFT)
    z = jnp.dot(frames, dftw_ref[...], preferred_element_type=f32)     # (16, 128)
    mel = jnp.dot(z * z, melfb_ref[...], preferred_element_type=f32)   # re^2@fb + im^2@fb (16,32)
    lm = jnp.log(mel + 1e-5)                                           # (N_FRAMES, B_TILE*N_MELS)

    # ---- patch embedding: patchify folded into block-diagonal per-ti weight matrices ----
    tok = jnp.zeros((PT, B_TILE * PF * D), f32)
    for ti in range(PATCH):
        tok = tok + jnp.dot(lm[ti * PT:(ti + 1) * PT, :], patchm_ref[ti],
                            preferred_element_type=f32)                # (PT, B_TILE*PF*D)

    # ---- tokens: [cls, dist, patches] per batch, assembled by direct scratch writes ----
    tok_tab = tok_tab_ref[...]                                          # (NTOK+2, D)
    posb = tok_tab[0:NTOK, :]        # cls/dist/pos/patch-bias pre-folded
    lnf_g = tok_tab[NTOK:NTOK + 1, :]
    lnf_b = tok_tab[NTOK + 1:NTOK + 2, :]
    for b in range(B_TILE):
        x_scr[pl.ds(b * NTOK, 2), :] = posb[0:2, :]                     # cls, dist rows
        for pf in range(PF):
            x_scr[pl.ds(b * NTOK + 2 + pf * PT, PT), :] = (
                tok[:, b * PF * D + pf * D: b * PF * D + (pf + 1) * D]
                + posb[2 + pf * PT: 2 + (pf + 1) * PT, :])
    x = x_scr[...]                                                      # (S_TOK, D)

    # block-diagonal additive mask so folded batches never attend across each other
    if B_TILE == 1:
        attn_mask = jnp.zeros((S_TOK, S_TOK), f32)
    else:  # B_TILE == 2: same-batch test via a single threshold compare (no integer division)
        rb = jax.lax.broadcasted_iota(jnp.int32, (S_TOK, S_TOK), 0)
        cb = jax.lax.broadcasted_iota(jnp.int32, (S_TOK, S_TOK), 1)
        attn_mask = jnp.where((rb >= NTOK) == (cb >= NTOK), 0.0, -1e30).astype(f32)

    scale = 1.0 / math.sqrt(HD)
    # TODO(synk): at real DEPTH (12) switch to lax.fori_loop / a streamed DEPTH grid axis.
    for l in range(DEPTH):                       # static unroll, x stays in VMEM between layers
        vecs = vecs_ref[l]                       # (6, D): ln1g, ln1b, bproj, ln2g, ln2b, b2
        ln1g, ln1b = vecs[0:1, :], vecs[1:2, :]
        bproj = vecs[2:3, :]
        ln2g, ln2b = vecs[3:4, :], vecs[4:5, :]
        b2 = vecs[5:6, :]

        # LayerNorm 1  (eps=1e-6 matches timm ViT)
        mu = jnp.mean(x, axis=-1, keepdims=True)
        var = jnp.mean(jnp.square(x - mu), axis=-1, keepdims=True)
        h = (x - mu) * jax.lax.rsqrt(var + 1e-6) * ln1g + ln1b
        # QKV projection: one flat 2-D matmul onto a single lane-dense slab
        qkv = jnp.dot(h, wqkv_ref[l], preferred_element_type=f32) + bqkv_ref[l]    # (S_TOK, 3D)
        wproj_l = wproj_ref[l]                                                      # (D, D)
        attn = jnp.zeros((S_TOK, D), f32)
        for hh in range(NH):                                            # NH=2, static
            qh = qkv[:, hh * HD:(hh + 1) * HD]
            kh = qkv[:, D + hh * HD:D + (hh + 1) * HD]
            vh = qkv[:, 2 * D + hh * HD:2 * D + (hh + 1) * HD]
            s = jax.lax.dot_general(qh, kh, (((1,), (1,)), ((), ())),
                                    preferred_element_type=f32) * scale + attn_mask
            s = s - jnp.max(s, axis=-1, keepdims=True)
            p = jnp.exp(s)
            # EUP approx reciprocal (free slot); ~1e-3 rel error vs exact divide.
            p = p * pl.reciprocal(jnp.sum(p, axis=-1, keepdims=True), approx=True)
            oh = jnp.dot(p, vh, preferred_element_type=f32)                          # (S_TOK, HD)
            # fold concat-of-heads into row-blocks of the output projection
            attn = attn + jnp.dot(oh, wproj_l[hh * HD:(hh + 1) * HD, :],
                                  preferred_element_type=f32)
        x = x + attn + bproj                                            # residual 1
        # LayerNorm 2 + MLP
        mu2 = jnp.mean(x, axis=-1, keepdims=True)
        var2 = jnp.mean(jnp.square(x - mu2), axis=-1, keepdims=True)
        h2 = (x - mu2) * jax.lax.rsqrt(var2 + 1e-6) * ln2g + ln2b
        m = jnp.dot(h2, w1_ref[l], preferred_element_type=f32) + b1_ref[l]           # (S_TOK, 128)
        m = jax.nn.gelu(m, approximate=True)  # TODO(synk): timm/PaSST GELU is exact erf
        m = jnp.dot(m, w2_ref[l], preferred_element_type=f32) + b2
        x = x + m                                                        # residual 2

    # ---- final LN + (cls + dist) / 2 per folded batch element ----
    mu = jnp.mean(x, axis=-1, keepdims=True)
    var = jnp.mean(jnp.square(x - mu), axis=-1, keepdims=True)
    xn = (x - mu) * jax.lax.rsqrt(var + 1e-6) * lnf_g + lnf_b
    for b in range(B_TILE):
        o_ref[pl.ds(b, 1), :] = 0.5 * (xn[b * NTOK:b * NTOK + 1, :]
                                       + xn[b * NTOK + 1:b * NTOK + 2, :])


# ---------------- parameter init (deterministic, synthetic; 2-D biases / LN params) ----------
def init_params(key):
    def nrm(k, shape, scale=0.02):
        return scale * jax.random.normal(k, shape, jnp.float32)

    keys = jax.random.split(key, 4 + 4 * DEPTH)
    p = {
        'patch_w': nrm(keys[0], (PATCH * PATCH, D)),    # conv weight, row = mi*PATCH + ti
        'patch_b': jnp.zeros((1, D), jnp.float32),
        'cls': nrm(keys[1], (1, D)),
        'dist': nrm(keys[2], (1, D)),
        'pos': nrm(keys[3], (NTOK, D)),
        'lnf_g': jnp.ones((1, D), jnp.float32),
        'lnf_b': jnp.zeros((1, D), jnp.float32),
        'blocks': [],
    }
    for i in range(DEPTH):
        kq, kp, k1, k2 = keys[4 + 4 * i: 8 + 4 * i]
        p['blocks'].append({
            'ln1g': jnp.ones((1, D), jnp.float32),
            'ln1b': jnp.zeros((1, D), jnp.float32),
            'wqkv': nrm(kq, (D, 3 * D)),
            'bqkv': jnp.zeros((1, 3 * D), jnp.float32),
            'wproj': nrm(kp, (D, D)),
            'bproj': jnp.zeros((1, D), jnp.float32),
            'ln2g': jnp.ones((1, D), jnp.float32),
            'ln2b': jnp.zeros((1, D), jnp.float32),
            'w1': nrm(k1, (D, MLP_H)),
            'b1': jnp.zeros((1, MLP_H), jnp.float32),
            'w2': nrm(k2, (MLP_H, D)),
            'b2': jnp.zeros((1, D), jnp.float32),
        })
    return p


def make_dft_and_mel():
    n = jnp.arange(N_FFT, dtype=jnp.float32)[:, None]
    k = jnp.arange(N_BINS, dtype=jnp.float32)[None, :]
    ang = 2.0 * jnp.pi * n * k / N_FFT
    cos_m = jnp.cos(ang)
    sin_m = -jnp.sin(ang)
    # simple triangular filterbank (deterministic; linear-spaced centers)
    centers = jnp.linspace(0.0, N_BINS - 1.0, N_MELS + 2)
    bins = jnp.arange(N_BINS, dtype=jnp.float32)[:, None]
    lo, ce, hi = centers[:-2][None, :], centers[1:-1][None, :], centers[2:][None, :]
    fb = jnp.maximum(0.0, jnp.minimum((bins - lo) / (ce - lo), (hi - bins) / (hi - ce)))
    return cos_m, sin_m, fb


# ---------------- one-time weight re-layouts for the fused kernel (math-preserving) ----------
def prepare_consts(params, dft_mel, b_tile=B_TILE):
    cos_m, sin_m, fb = dft_mel
    # Hann window folded into the fused DFT matrix: (f*w) @ [cos|sin] == f @ (diag(w)@[cos|sin])
    window = 0.5 - 0.5 * jnp.cos(2.0 * jnp.pi * jnp.arange(N_FFT, dtype=jnp.float32) / N_FFT)
    dftw = window[:, None] * jnp.concatenate([cos_m, sin_m], axis=1)        # (N_FFT, 2*N_BINS)
    melfb = jnp.concatenate([fb, fb], axis=0)                               # (2*N_BINS, N_MELS)
    eye = jnp.eye(b_tile, dtype=jnp.float32)
    dftw_bd = jnp.kron(eye, dftw)            # block-diag per folded batch element (128, 128)
    melfb_bd = jnp.kron(eye, melfb)          # (128, 32)

    # Patchify folded into block-diagonal per-ti patch-embed matrices:
    #   patchm[ti][pf*PATCH+mi, pf*D+d] = patch_w[mi*PATCH+ti, d]
    w4 = params['patch_w'].reshape(PATCH, PATCH, D)                         # [mi, ti, d]
    patchm = jnp.zeros((PATCH, N_MELS, PF * D), jnp.float32)
    for ti in range(PATCH):
        for pf in range(PF):
            patchm = patchm.at[ti, pf * PATCH:(pf + 1) * PATCH,
                               pf * D:(pf + 1) * D].set(w4[:, ti, :])
    patchm_bd = jnp.stack([jnp.kron(eye, patchm[ti]) for ti in range(PATCH)], axis=0)

    # cls/dist tokens, positional embedding, patch bias folded into (NTOK, D); final-LN params
    # appended as two extra rows so they ride in the same operand.
    posb = params['pos']
    posb = posb.at[0].add(params['cls'][0])
    posb = posb.at[1].add(params['dist'][0])
    posb = posb.at[2:].add(params['patch_b'])
    tok_tab = jnp.concatenate([posb, params['lnf_g'], params['lnf_b']], axis=0)   # (NTOK+2, D)

    # per-layer LN/bias vectors packed into one (DEPTH, 6, D) table; matrices DEPTH-stacked
    vecs = jnp.stack([jnp.concatenate([blk['ln1g'], blk['ln1b'], blk['bproj'],
                                       blk['ln2g'], blk['ln2b'], blk['b2']], axis=0)
                      for blk in params['blocks']], axis=0)                        # (DEPTH, 6, D)

    def stk(name):
        return jnp.stack([blk[name] for blk in params['blocks']], axis=0)

    return {
        'dftw': dftw_bd, 'melfb': melfb_bd, 'patchm': patchm_bd, 'tok_tab': tok_tab,
        'vecs': vecs, 'wqkv': stk('wqkv'), 'bqkv': stk('bqkv'), 'wproj': stk('wproj'),
        'w1': stk('w1'), 'b1': stk('b1'), 'w2': stk('w2'),
    }


# ---------------- full forward (PaSSTFeatureExtractor.forward) ----------------
def passt_features(audio_waveform, consts, sample_rate=32000):
    del sample_rate  # synthetic front-end; rate fixed by config
    if audio_waveform.ndim == 1:
        audio_waveform = audio_waveform[None, :]
    b = audio_waveform.shape[0]
    audio = audio_waveform.astype(jnp.float32)
    b_pad = ((b + B_TILE - 1) // B_TILE) * B_TILE
    if b_pad != b:
        audio = jnp.concatenate([audio, jnp.zeros((b_pad - b, T), jnp.float32)], axis=0)
    n_tile = b_pad // B_TILE

    # HOP == N_FFT -> framing is a free reshape; rows permuted to (ti, pt) order so the in-kernel
    # patchify reduces to contiguous sublane slices; B_TILE waveforms packed along lanes so the
    # front-end matmuls are lane-dense (frames tile = (16, 128)).
    frames = (audio.reshape(b_pad, PT, PATCH, N_FFT)
              .transpose(0, 2, 1, 3)
              .reshape(b_pad, N_FRAMES, N_FFT)
              .reshape(n_tile, B_TILE, N_FRAMES, N_FFT)
              .transpose(0, 2, 1, 3)
              .reshape(n_tile, N_FRAMES, B_TILE * N_FFT))

    args = (frames, consts['dftw'], consts['melfb'], consts['patchm'], consts['tok_tab'],
            consts['vecs'], consts['wqkv'], consts['bqkv'], consts['wproj'],
            consts['w1'], consts['b1'], consts['w2'])

    in_specs = [pl.BlockSpec((None, N_FRAMES, B_TILE * N_FFT), lambda i: (i, 0, 0))]
    in_specs += [_const_spec(a.shape) for a in args[1:]]

    out = pl.pallas_call(
        fused_kernel,
        out_shape=jax.ShapeDtypeStruct((n_tile, B_TILE, D), jnp.float32),
        grid=(n_tile,),
        in_specs=in_specs,
        out_specs=pl.BlockSpec((None, B_TILE, D), lambda i: (i, 0, 0)),
        scratch_shapes=[pltpu.VMEM((S_TOK, D), jnp.float32)],
        compiler_params=pltpu.CompilerParams(dimension_semantics=("parallel",)),
    )(*args)
    return out.reshape(b_pad, D)[:b]


@jax.jit
def forward(audio_waveform, consts):
    return passt_features(audio_waveform, consts)


if __name__ == "__main__":
    key = jax.random.PRNGKey(0)
    k_audio, k_params = jax.random.split(key)
    audio = jax.random.normal(k_audio, (B, T), jnp.float32)          # input shape (4, 1024)
    params = init_params(k_params)
    consts = prepare_consts(params, make_dft_and_mel())

    feats = forward(audio, consts)
    feats = jax.block_until_ready(feats)
    assert feats.shape == (B, D) and feats.dtype == jnp.float32
    assert bool(jnp.all(jnp.isfinite(feats)))
    print("KERNEL_OK")
</pallas_src>

<mosaic_0001>
module attributes {stable_mosaic.version = 11 : i64} {
  func.func @fused_kernel(%arg0: i32, %arg1: memref<1x16x128xf32, #tpu.memory_space<vmem>>, %arg2: memref<128x128xf32, #tpu.memory_space<vmem>>, %arg3: memref<128x32xf32, #tpu.memory_space<vmem>>, %arg4: memref<4x32x256xf32, #tpu.memory_space<vmem>>, %arg5: memref<20x32xf32, #tpu.memory_space<vmem>>, %arg6: memref<2x6x32xf32, #tpu.memory_space<vmem>>, %arg7: memref<2x32x96xf32, #tpu.memory_space<vmem>>, %arg8: memref<2x1x96xf32, #tpu.memory_space<vmem>>, %arg9: memref<2x32x32xf32, #tpu.memory_space<vmem>>, %arg10: memref<2x32x128xf32, #tpu.memory_space<vmem>>, %arg11: memref<2x1x128xf32, #tpu.memory_space<vmem>>, %arg12: memref<2x128x32xf32, #tpu.memory_space<vmem>>, %arg13: memref<1x2x32xf32, #tpu.memory_space<vmem>>, %arg14: memref<36x32xf32, #tpu.memory_space<vmem>>) attributes {dimension_semantics = [#tpu.dimension_semantics<parallel>], iteration_bounds = array<i64: 2>, scalar_prefetch = 0 : i64, scratch_operands = 1 : i64, tpu.core_type = #tpu.core_type<tc>, window_params = [{transform_indices = @transform_0, window_bounds = array<i64: 1, 16, 128>}, {pipeline_mode = #tpu.pipeline_mode<synchronous>, transform_indices = @transform_1, window_bounds = array<i64: 128, 128>}, {pipeline_mode = #tpu.pipeline_mode<synchronous>, transform_indices = @transform_2, window_bounds = array<i64: 128, 32>}, {pipeline_mode = #tpu.pipeline_mode<synchronous>, transform_indices = @transform_3, window_bounds = array<i64: 4, 32, 256>}, {pipeline_mode = #tpu.pipeline_mode<synchronous>, transform_indices = @transform_4, window_bounds = array<i64: 20, 32>}, {pipeline_mode = #tpu.pipeline_mode<synchronous>, transform_indices = @transform_5, window_bounds = array<i64: 2, 6, 32>}, {pipeline_mode = #tpu.pipeline_mode<synchronous>, transform_indices = @transform_6, window_bounds = array<i64: 2, 32, 96>}, {pipeline_mode = #tpu.pipeline_mode<synchronous>, transform_indices = @transform_7, window_bounds = array<i64: 2, 1, 96>}, {pipeline_mode = #tpu.pipeline_mode<synchronous>, transform_indices = @transform_8, window_bounds = array<i64: 2, 32, 32>}, {pipeline_mode = #tpu.pipeline_mode<synchronous>, transform_indices = @transform_9, window_bounds = array<i64: 2, 32, 128>}, {pipeline_mode = #tpu.pipeline_mode<synchronous>, transform_indices = @transform_10, window_bounds = array<i64: 2, 1, 128>}, {pipeline_mode = #tpu.pipeline_mode<synchronous>, transform_indices = @transform_11, window_bounds = array<i64: 2, 128, 32>}, {transform_indices = @transform_12, window_bounds = array<i64: 1, 2, 32>}]} {
    %c0 = arith.constant 0 : index
    %c0_0 = arith.constant 0 : index
    %c0_1 = arith.constant 0 : index
    %0 = vector.load %arg1[%c0, %c0_0, %c0_1] : memref<1x16x128xf32, #tpu.memory_space<vmem>>, vector<1x16x128xf32>
    %1 = vector.shape_cast %0 : vector<1x16x128xf32> to vector<16x128xf32>
    %c0_2 = arith.constant 0 : index
    %c0_3 = arith.constant 0 : index
    %2 = vector.load %arg2[%c0_2, %c0_3] : memref<128x128xf32, #tpu.memory_space<vmem>>, vector<128x128xf32>
    %cst = arith.constant dense<0.000000e+00> : vector<16x128xf32>
    %3 = tpu.matmul %1, %2, %cst {dimension_numbers = #tpu.dot_dimension_numbers<[1], [0], [0], [1], [0, 0, 1, 1], [], []>} : vector<16x128xf32>, vector<128x128xf32>, vector<16x128xf32> -> vector<16x128xf32>
    %4 = arith.mulf %3, %3 : vector<16x128xf32>
    %c0_4 = arith.constant 0 : index
    %c0_5 = arith.constant 0 : index
    %5 = vector.load %arg3[%c0_4, %c0_5] : memref<128x32xf32, #tpu.memory_space<vmem>>, vector<128x32xf32>
    %cst_6 = arith.constant dense<0.000000e+00> : vector<16x32xf32>
    %6 = tpu.matmul %4, %5, %cst_6 {dimension_numbers = #tpu.dot_dimension_numbers<[1], [0], [0], [1], [0, 0, 1, 1], [], []>} : vector<16x128xf32>, vector<128x32xf32>, vector<16x32xf32> -> vector<16x32xf32>
    %cst_7 = arith.constant 9.99999974E-6 : f32
    %7 = vector.broadcast %cst_7 : f32 to vector<16x32xf32>
    %8 = arith.addf %6, %7 : vector<16x32xf32>
    %9 = math.log %8 : vector<16x32xf32>
    %cst_8 = arith.constant 0.000000e+00 : f32
    %10 = vector.broadcast %cst_8 : f32 to vector<4x256xf32>
    %11 = vector.extract_strided_slice %9 {offsets = [0, 0], sizes = [4, 32], strides = [1, 1]} : vector<16x32xf32> to vector<4x32xf32>
    %c0_9 = arith.constant 0 : index
    %c0_10 = arith.constant 0 : index
    %c0_11 = arith.constant 0 : index
    %12 = vector.load %arg4[%c0_9, %c0_10, %c0_11] : memref<4x32x256xf32, #tpu.memory_space<vmem>>, vector<1x32x256xf32>
    %13 = vector.shape_cast %12 : vector<1x32x256xf32> to vector<32x256xf32>
    %cst_12 = arith.constant dense<0.000000e+00> : vector<4x256xf32>
    %14 = tpu.matmul %11, %13, %cst_12 {dimension_numbers = #tpu.dot_dimension_numbers<[1], [0], [0], [1], [0, 0, 1, 1], [], []>} : vector<4x32xf32>, vector<32x256xf32>, vector<4x256xf32> -> vector<4x256xf32>
    %15 = arith.addf %10, %14 : vector<4x256xf32>
    %16 = vector.extract_strided_slice %9 {offsets = [4, 0], sizes = [4, 32], strides = [1, 1]} : vector<16x32xf32> to vector<4x32xf32>
    %c1 = arith.constant 1 : index
    %c0_13 = arith.constant 0 : index
    %c0_14 = arith.constant 0 : index
    %17 = vector.load %arg4[%c1, %c0_13, %c0_14] : memref<4x32x256xf32, #tpu.memory_space<vmem>>, vector<1x32x256xf32>
    %18 = vector.shape_cast %17 : vector<1x32x256xf32> to vector<32x256xf32>
    %cst_15 = arith.constant dense<0.000000e+00> : vector<4x256xf32>
    %19 = tpu.matmul %16, %18, %cst_15 {dimension_numbers = #tpu.dot_dimension_numbers<[1], [0], [0], [1], [0, 0, 1, 1], [], []>} : vector<4x32xf32>, vector<32x256xf32>, vector<4x256xf32> -> vector<4x256xf32>
    %20 = arith.addf %15, %19 : vector<4x256xf32>
    %21 = vector.extract_strided_slice %9 {offsets = [8, 0], sizes = [4, 32], strides = [1, 1]} : vector<16x32xf32> to vector<4x32xf32>
    %c2 = arith.constant 2 : index
    %c0_16 = arith.constant 0 : index
    %c0_17 = arith.constant 0 : index
    %22 = vector.load %arg4[%c2, %c0_16, %c0_17] : memref<4x32x256xf32, #tpu.memory_space<vmem>>, vector<1x32x256xf32>
    %23 = vector.shape_cast %22 : vector<1x32x256xf32> to vector<32x256xf32>
    %cst_18 = arith.constant dense<0.000000e+00> : vector<4x256xf32>
    %24 = tpu.matmul %21, %23, %cst_18 {dimension_numbers = #tpu.dot_dimension_numbers<[1], [0], [0], [1], [0, 0, 1, 1], [], []>} : vector<4x32xf32>, vector<32x256xf32>, vector<4x256xf32> -> vector<4x256xf32>
    %25 = arith.addf %20, %24 : vector<4x256xf32>
    %26 = vector.extract_strided_slice %9 {offsets = [12, 0], sizes = [4, 32], strides = [1, 1]} : vector<16x32xf32> to vector<4x32xf32>
    %c3 = arith.constant 3 : index
    %c0_19 = arith.constant 0 : index
    %c0_20 = arith.constant 0 : index
    %27 = vector.load %arg4[%c3, %c0_19, %c0_20] : memref<4x32x256xf32, #tpu.memory_space<vmem>>, vector<1x32x256xf32>
    %28 = vector.shape_cast %27 : vector<1x32x256xf32> to vector<32x256xf32>
    %cst_21 = arith.constant dense<0.000000e+00> : vector<4x256xf32>
    %29 = tpu.matmul %26, %28, %cst_21 {dimension_numbers = #tpu.dot_dimension_numbers<[1], [0], [0], [1], [0, 0, 1, 1], [], []>} : vector<4x32xf32>, vector<32x256xf32>, vector<4x256xf32> -> vector<4x256xf32>
    %30 = arith.addf %25, %29 : vector<4x256xf32>
    %c0_22 = arith.constant 0 : index
    %c0_23 = arith.constant 0 : index
    %31 = vector.load %arg5[%c0_22, %c0_23] : memref<20x32xf32, #tpu.memory_space<vmem>>, vector<20x32xf32>
    %32 = vector.extract_strided_slice %31 {offsets = [0, 0], sizes = [18, 32], strides = [1, 1]} : vector<20x32xf32> to vector<18x32xf32>
    %33 = vector.extract_strided_slice %31 {offsets = [18, 0], sizes = [1, 32], strides = [1, 1]} : vector<20x32xf32> to vector<1x32xf32>
    %34 = vector.extract_strided_slice %31 {offsets = [19, 0], sizes = [1, 32], strides = [1, 1]} : vector<20x32xf32> to vector<1x32xf32>
    %35 = vector.extract_strided_slice %32 {offsets = [0, 0], sizes = [2, 32], strides = [1, 1]} : vector<18x32xf32> to vector<2x32xf32>
    %c0_24 = arith.constant 0 : index
    %c0_25 = arith.constant 0 : index
    %36 = vector.load %arg14[%c0_24, %c0_25] : memref<36x32xf32, #tpu.memory_space<vmem>>, vector<2x32xf32>
    tpu.vector_store %arg14[%c0_24, %c0_25], %35 {strides = array<i32>} : memref<36x32xf32, #tpu.memory_space<vmem>>, vector<2x32xf32>,
    %37 = vector.extract_strided_slice %30 {offsets = [0, 0], sizes = [4, 32], strides = [1, 1]} : vector<4x256xf32> to vector<4x32xf32>
    %38 = vector.extract_strided_slice %32 {offsets = [2, 0], sizes = [4, 32], strides = [1, 1]} : vector<18x32xf32> to vector<4x32xf32>
    %39 = arith.addf %37, %38 : vector<4x32xf32>
    %c2_26 = arith.constant 2 : index
    %c0_27 = arith.constant 0 : index
    %40 = vector.load %arg14[%c2_26, %c0_27] : memref<36x32xf32, #tpu.memory_space<vmem>>, vector<4x32xf32>
    tpu.vector_store %arg14[%c2_26, %c0_27], %39 {strides = array<i32>} : memref<36x32xf32, #tpu.memory_space<vmem>>, vector<4x32xf32>,
    %41 = vector.extract_strided_slice %30 {offsets = [0, 32], sizes = [4, 32], strides = [1, 1]} : vector<4x256xf32> to vector<4x32xf32>
    %42 = vector.extract_strided_slice %32 {offsets = [6, 0], sizes = [4, 32], strides = [1, 1]} : vector<18x32xf32> to vector<4x32xf32>
    %43 = arith.addf %41, %42 : vector<4x32xf32>
    %c6 = arith.constant 6 : index
    %c0_28 = arith.constant 0 : index
    %44 = vector.load %arg14[%c6, %c0_28] : memref<36x32xf32, #tpu.memory_space<vmem>>, vector<4x32xf32>
    tpu.vector_store %arg14[%c6, %c0_28], %43 {strides = array<i32>} : memref<36x32xf32, #tpu.memory_space<vmem>>, vector<4x32xf32>,
    %45 = vector.extract_strided_slice %30 {offsets = [0, 64], sizes = [4, 32], strides = [1, 1]} : vector<4x256xf32> to vector<4x32xf32>
    %46 = vector.extract_strided_slice %32 {offsets = [10, 0], sizes = [4, 32], strides = [1, 1]} : vector<18x32xf32> to vector<4x32xf32>
    %47 = arith.addf %45, %46 : vector<4x32xf32>
    %c10 = arith.constant 10 : index
    %c0_29 = arith.constant 0 : index
    %48 = vector.load %arg14[%c10, %c0_29] : memref<36x32xf32, #tpu.memory_space<vmem>>, vector<4x32xf32>
    tpu.vector_store %arg14[%c10, %c0_29], %47 {strides = array<i32>} : memref<36x32xf32, #tpu.memory_space<vmem>>, vector<4x32xf32>,
    %49 = vector.extract_strided_slice %30 {offsets = [0, 96], sizes = [4, 32], strides = [1, 1]} : vector<4x256xf32> to vector<4x32xf32>
    %50 = vector.extract_strided_slice %32 {offsets = [14, 0], sizes = [4, 32], strides = [1, 1]} : vector<18x32xf32> to vector<4x32xf32>
    %51 = arith.addf %49, %50 : vector<4x32xf32>
    %c14 = arith.constant 14 : index
    %c0_30 = arith.constant 0 : index
    %52 = vector.load %arg14[%c14, %c0_30] : memref<36x32xf32, #tpu.memory_space<vmem>>, vector<4x32xf32>
    tpu.vector_store %arg14[%c14, %c0_30], %51 {strides = array<i32>} : memref<36x32xf32, #tpu.memory_space<vmem>>, vector<4x32xf32>,
    %53 = vector.extract_strided_slice %32 {offsets = [0, 0], sizes = [2, 32], strides = [1, 1]} : vector<18x32xf32> to vector<2x32xf32>
    %c18 = arith.constant 18 : index
    %c0_31 = arith.constant 0 : index
    %54 = vector.load %arg14[%c18, %c0_31] : memref<36x32xf32, #tpu.memory_space<vmem>>, vector<2x32xf32>
    tpu.vector_store %arg14[%c18, %c0_31], %53 {strides = array<i32>} : memref<36x32xf32, #tpu.memory_space<vmem>>, vector<2x32xf32>,
    %55 = vector.extract_strided_slice %30 {offsets = [0, 128], sizes = [4, 32], strides = [1, 1]} : vector<4x256xf32> to vector<4x32xf32>
    %56 = vector.extract_strided_slice %32 {offsets = [2, 0], sizes = [4, 32], strides = [1, 1]} : vector<18x32xf32> to vector<4x32xf32>
    %57 = arith.addf %55, %56 : vector<4x32xf32>
    %c20 = arith.constant 20 : index
    %c0_32 = arith.constant 0 : index
    %58 = vector.load %arg14[%c20, %c0_32] : memref<36x32xf32, #tpu.memory_space<vmem>>, vector<4x32xf32>
    tpu.vector_store %arg14[%c20, %c0_32], %57 {strides = array<i32>} : memref<36x32xf32, #tpu.memory_space<vmem>>, vector<4x32xf32>,
    %59 = vector.extract_strided_slice %30 {offsets = [0, 160], sizes = [4, 32], strides = [1, 1]} : vector<4x256xf32> to vector<4x32xf32>
    %60 = vector.extract_strided_slice %32 {offsets = [6, 0], sizes = [4, 32], strides = [1, 1]} : vector<18x32xf32> to vector<4x32xf32>
    %61 = arith.addf %59, %60 : vector<4x32xf32>
    %c24 = arith.constant 24 : index
    %c0_33 = arith.constant 0 : index
    %62 = vector.load %arg14[%c24, %c0_33] : memref<36x32xf32, #tpu.memory_space<vmem>>, vector<4x32xf32>
    tpu.vector_store %arg14[%c24, %c0_33], %61 {strides = array<i32>} : memref<36x32xf32, #tpu.memory_space<vmem>>, vector<4x32xf32>,
    %63 = vector.extract_strided_slice %30 {offsets = [0, 192], sizes = [4, 32], strides = [1, 1]} : vector<4x256xf32> to vector<4x32xf32>
    %64 = vector.extract_strided_slice %32 {offsets = [10, 0], sizes = [4, 32], strides = [1, 1]} : vector<18x32xf32> to vector<4x32xf32>
    %65 = arith.addf %63, %64 : vector<4x32xf32>
    %c28 = arith.constant 28 : index
    %c0_34 = arith.constant 0 : index
    %66 = vector.load %arg14[%c28, %c0_34] : memref<36x32xf32, #tpu.memory_space<vmem>>, vector<4x32xf32>
    tpu.vector_store %arg14[%c28, %c0_34], %65 {strides = array<i32>} : memref<36x32xf32, #tpu.memory_space<vmem>>, vector<4x32xf32>,
    %67 = vector.extract_strided_slice %30 {offsets = [0, 224], sizes = [4, 32], strides = [1, 1]} : vector<4x256xf32> to vector<4x32xf32>
    %68 = vector.extract_strided_slice %32 {offsets = [14, 0], sizes = [4, 32], strides = [1, 1]} : vector<18x32xf32> to vector<4x32xf32>
    %69 = arith.addf %67, %68 : vector<4x32xf32>
    %c32 = arith.constant 32 : index
    %c0_35 = arith.constant 0 : index
    %70 = vector.load %arg14[%c32, %c0_35] : memref<36x32xf32, #tpu.memory_space<vmem>>, vector<4x32xf32>
    tpu.vector_store %arg14[%c32, %c0_35], %69 {strides = array<i32>} : memref<36x32xf32, #tpu.memory_space<vmem>>, vector<4x32xf32>,
    %c0_36 = arith.constant 0 : index
    %c0_37 = arith.constant 0 : index
    %71 = vector.load %arg14[%c0_36, %c0_37] : memref<36x32xf32, #tpu.memory_space<vmem>>, vector<36x32xf32>
    %72 = tpu.iota {dimensions = array<i32: 0>} : vector<36x36xi32>
    %73 = tpu.iota {dimensions = array<i32: 1>} : vector<36x36xi32>
    %c18_i32 = arith.constant 18 : i32
    %74 = vector.broadcast %c18_i32 : i32 to vector<36x36xi32>
    %75 = arith.cmpi sge, %72, %74 : vector<36x36xi32>
    %c18_i32_38 = arith.constant 18 : i32
    %76 = vector.broadcast %c18_i32_38 : i32 to vector<36x36xi32>
    %77 = arith.cmpi sge, %73, %76 : vector<36x36xi32>
    %78 = arith.xori %75, %77 : vector<36x36xi1>
    %cst_39 = arith.constant dense<true> : vector<36x36xi1>
    %79 = arith.xori %78, %cst_39 : vector<36x36xi1>
    %cst_40 = arith.constant 0.000000e+00 : f32
    %cst_41 = arith.constant -1.000000e+30 : f32
    %80 = vector.broadcast %cst_40 : f32 to vector<36x36xf32>
    %81 = vector.broadcast %cst_41 : f32 to vector<36x36xf32>
    %82 = arith.select %79, %80, %81 : vector<36x36xi1>, vector<36x36xf32>
    %c0_42 = arith.constant 0 : index
    %c0_43 = arith.constant 0 : index
    %c0_44 = arith.constant 0 : index
    %83 = vector.load %arg6[%c0_42, %c0_43, %c0_44] : memref<2x6x32xf32, #tpu.memory_space<vmem>>, vector<1x6x32xf32>
    %84 = vector.shape_cast %83 : vector<1x6x32xf32> to vector<6x32xf32>
    %85 = vector.extract_strided_slice %84 {offsets = [0, 0], sizes = [1, 32], strides = [1, 1]} : vector<6x32xf32> to vector<1x32xf32>
    %86 = vector.extract_strided_slice %84 {offsets = [1, 0], sizes = [1, 32], strides = [1, 1]} : vector<6x32xf32> to vector<1x32xf32>
    %87 = vector.extract_strided_slice %84 {offsets = [2, 0], sizes = [1, 32], strides = [1, 1]} : vector<6x32xf32> to vector<1x32xf32>
    %88 = vector.extract_strided_slice %84 {offsets = [3, 0], sizes = [1, 32], strides = [1, 1]} : vector<6x32xf32> to vector<1x32xf32>
    %89 = vector.extract_strided_slice %84 {offsets = [4, 0], sizes = [1, 32], strides = [1, 1]} : vector<6x32xf32> to vector<1x32xf32>
    %90 = vector.extract_strided_slice %84 {offsets = [5, 0], sizes = [1, 32], strides = [1, 1]} : vector<6x32xf32> to vector<1x32xf32>
    %cst_45 = arith.constant dense<0.000000e+00> : vector<36xf32>
    %91 = vector.multi_reduction <add>, %71, %cst_45 [1] : vector<36x32xf32> to vector<36xf32>
    %92 = vector.shape_cast %91 : vector<36xf32> to vector<36x1xf32>
    %cst_46 = arith.constant 3.200000e+01 : f32
    %93 = vector.broadcast %cst_46 : f32 to vector<36x1xf32>
    %94 = arith.divf %92, %93 : vector<36x1xf32>
    %95 = vector.broadcast %94 : vector<36x1xf32> to vector<36x32xf32>
    %96 = arith.subf %71, %95 : vector<36x32xf32>
    %97 = arith.mulf %96, %96 : vector<36x32xf32>
    %cst_47 = arith.constant dense<0.000000e+00> : vector<36xf32>
    %98 = vector.multi_reduction <add>, %97, %cst_47 [1] : vector<36x32xf32> to vector<36xf32>
    %99 = vector.shape_cast %98 : vector<36xf32> to vector<36x1xf32>
    %cst_48 = arith.constant 3.200000e+01 : f32
    %100 = vector.broadcast %cst_48 : f32 to vector<36x1xf32>
    %101 = arith.divf %99, %100 : vector<36x1xf32>
    %102 = vector.broadcast %94 : vector<36x1xf32> to vector<36x32xf32>
    %103 = arith.subf %71, %102 : vector<36x32xf32>
    %cst_49 = arith.constant 9.99999997E-7 : f32
    %104 = vector.broadcast %cst_49 : f32 to vector<36x1xf32>
    %105 = arith.addf %101, %104 : vector<36x1xf32>
    %106 = math.rsqrt %105 : vector<36x1xf32>
    %107 = vector.broadcast %106 : vector<36x1xf32> to vector<36x32xf32>
    %108 = arith.mulf %103, %107 : vector<36x32xf32>
    %109 = vector.broadcast %85 : vector<1x32xf32> to vector<36x32xf32>
    %110 = arith.mulf %108, %109 : vector<36x32xf32>
    %111 = vector.broadcast %86 : vector<1x32xf32> to vector<36x32xf32>
    %112 = arith.addf %110, %111 : vector<36x32xf32>
    %c0_50 = arith.constant 0 : index
    %c0_51 = arith.constant 0 : index
    %c0_52 = arith.constant 0 : index
    %113 = vector.load %arg7[%c0_50, %c0_51, %c0_52] : memref<2x32x96xf32, #tpu.memory_space<vmem>>, vector<1x32x96xf32>
    %114 = vector.shape_cast %113 : vector<1x32x96xf32> to vector<32x96xf32>
    %cst_53 = arith.constant dense<0.000000e+00> : vector<36x96xf32>
    %115 = tpu.matmul %112, %114, %cst_53 {dimension_numbers = #tpu.dot_dimension_numbers<[1], [0], [0], [1], [0, 0, 1, 1], [], []>} : vector<36x32xf32>, vector<32x96xf32>, vector<36x96xf32> -> vector<36x96xf32>
    %c0_54 = arith.constant 0 : index
    %c0_55 = arith.constant 0 : index
    %c0_56 = arith.constant 0 : index
    %116 = vector.load %arg8[%c0_54, %c0_55, %c0_56] : memref<2x1x96xf32, #tpu.memory_space<vmem>>, vector<1x1x96xf32>
    %117 = vector.shape_cast %116 : vector<1x1x96xf32> to vector<1x96xf32>
    %118 = vector.broadcast %117 : vector<1x96xf32> to vector<36x96xf32>
    %119 = arith.addf %115, %118 : vector<36x96xf32>
    %c0_57 = arith.constant 0 : index
    %c0_58 = arith.constant 0 : index
    %c0_59 = arith.constant 0 : index
    %120 = vector.load %arg9[%c0_57, %c0_58, %c0_59] : memref<2x32x32xf32, #tpu.memory_space<vmem>>, vector<1x32x32xf32>
    %121 = vector.shape_cast %120 : vector<1x32x32xf32> to vector<32x32xf32>
    %cst_60 = arith.constant 0.000000e+00 : f32
    %122 = vector.broadcast %cst_60 : f32 to vector<36x32xf32>
    %123 = vector.extract_strided_slice %119 {offsets = [0, 0], sizes = [36, 16], strides = [1, 1]} : vector<36x96xf32> to vector<36x16xf32>
    %124 = vector.extract_strided_slice %119 {offsets = [0, 32], sizes = [36, 16], strides = [1, 1]} : vector<36x96xf32> to vector<36x16xf32>
    %125 = vector.extract_strided_slice %119 {offsets = [0, 64], sizes = [36, 16], strides = [1, 1]} : vector<36x96xf32> to vector<36x16xf32>
    %cst_61 = arith.constant dense<0.000000e+00> : vector<36x36xf32>
    %126 = tpu.matmul %123, %124, %cst_61 {dimension_numbers = #tpu.dot_dimension_numbers<[1], [1], [0], [0], [0, 0, 1, 0], [], []>} : vector<36x16xf32>, vector<36x16xf32>, vector<36x36xf32> -> vector<36x36xf32>
    %cst_62 = arith.constant 2.500000e-01 : f32
    %127 = vector.broadcast %cst_62 : f32 to vector<36x36xf32>
    %128 = arith.mulf %126, %127 : vector<36x36xf32>
    %129 = arith.addf %128, %82 : vector<36x36xf32>
    %cst_63 = arith.constant dense<0xFF800000> : vector<36xf32>
    %130 = vector.multi_reduction <maximumf>, %129, %cst_63 [1] : vector<36x36xf32> to vector<36xf32>
    %131 = vector.shape_cast %130 : vector<36xf32> to vector<36x1xf32>
    %132 = vector.broadcast %131 : vector<36x1xf32> to vector<36x36xf32>
    %133 = arith.subf %129, %132 : vector<36x36xf32>
    %134 = math.exp %133 : vector<36x36xf32>
    %cst_64 = arith.constant dense<0.000000e+00> : vector<36xf32>
    %135 = vector.multi_reduction <add>, %134, %cst_64 [1] : vector<36x36xf32> to vector<36xf32>
    %136 = vector.shape_cast %135 : vector<36xf32> to vector<36x1xf32>
    %137 = tpu.reciprocal %136 {approx = true} : vector<36x1xf32> -> vector<36x1xf32>
    %138 = vector.broadcast %137 : vector<36x1xf32> to vector<36x36xf32>
    %139 = arith.mulf %134, %138 : vector<36x36xf32>
    %cst_65 = arith.constant dense<0.000000e+00> : vector<36x16xf32>
    %140 = tpu.matmul %139, %125, %cst_65 {dimension_numbers = #tpu.dot_dimension_numbers<[1], [0], [0], [1], [0, 0, 1, 1], [], []>} : vector<36x36xf32>, vector<36x16xf32>, vector<36x16xf32> -> vector<36x16xf32>
    %141 = vector.extract_strided_slice %121 {offsets = [0, 0], sizes = [16, 32], strides = [1, 1]} : vector<32x32xf32> to vector<16x32xf32>
    %cst_66 = arith.constant dense<0.000000e+00> : vector<36x32xf32>
    %142 = tpu.matmul %140, %141, %cst_66 {dimension_numbers = #tpu.dot_dimension_numbers<[1], [0], [0], [1], [0, 0, 1, 1], [], []>} : vector<36x16xf32>, vector<16x32xf32>, vector<36x32xf32> -> vector<36x32xf32>
    %143 = arith.addf %122, %142 : vector<36x32xf32>
    %144 = vector.extract_strided_slice %119 {offsets = [0, 16], sizes = [36, 16], strides = [1, 1]} : vector<36x96xf32> to vector<36x16xf32>
    %145 = vector.extract_strided_slice %119 {offsets = [0, 48], sizes = [36, 16], strides = [1, 1]} : vector<36x96xf32> to vector<36x16xf32>
    %146 = vector.extract_strided_slice %119 {offsets = [0, 80], sizes = [36, 16], strides = [1, 1]} : vector<36x96xf32> to vector<36x16xf32>
    %cst_67 = arith.constant dense<0.000000e+00> : vector<36x36xf32>
    %147 = tpu.matmul %144, %145, %cst_67 {dimension_numbers = #tpu.dot_dimension_numbers<[1], [1], [0], [0], [0, 0, 1, 0], [], []>} : vector<36x16xf32>, vector<36x16xf32>, vector<36x36xf32> -> vector<36x36xf32>
    %cst_68 = arith.constant 2.500000e-01 : f32
    %148 = vector.broadcast %cst_68 : f32 to vector<36x36xf32>
    %149 = arith.mulf %147, %148 : vector<36x36xf32>
    %150 = arith.addf %149, %82 : vector<36x36xf32>
    %cst_69 = arith.constant dense<0xFF800000> : vector<36xf32>
    %151 = vector.multi_reduction <maximumf>, %150, %cst_69 [1] : vector<36x36xf32> to vector<36xf32>
    %152 = vector.shape_cast %151 : vector<36xf32> to vector<36x1xf32>
    %153 = vector.broadcast %152 : vector<36x1xf32> to vector<36x36xf32>
    %154 = arith.subf %150, %153 : vector<36x36xf32>
    %155 = math.exp %154 : vector<36x36xf32>
    %cst_70 = arith.constant dense<0.000000e+00> : vector<36xf32>
    %156 = vector.multi_reduction <add>, %155, %cst_70 [1] : vector<36x36xf32> to vector<36xf32>
    %157 = vector.shape_cast %156 : vector<36xf32> to vector<36x1xf32>
    %158 = tpu.reciprocal %157 {approx = true} : vector<36x1xf32> -> vector<36x1xf32>
    %159 = vector.broadcast %158 : vector<36x1xf32> to vector<36x36xf32>
    %160 = arith.mulf %155, %159 : vector<36x36xf32>
    %cst_71 = arith.constant dense<0.000000e+00> : vector<36x16xf32>
    %161 = tpu.matmul %160, %146, %cst_71 {dimension_numbers = #tpu.dot_dimension_numbers<[1], [0], [0], [1], [0, 0, 1, 1], [], []>} : vector<36x36xf32>, vector<36x16xf32>, vector<36x16xf32> -> vector<36x16xf32>
    %162 = vector.extract_strided_slice %121 {offsets = [16, 0], sizes = [16, 32], strides = [1, 1]} : vector<32x32xf32> to vector<16x32xf32>
    %cst_72 = arith.constant dense<0.000000e+00> : vector<36x32xf32>
    %163 = tpu.matmul %161, %162, %cst_72 {dimension_numbers = #tpu.dot_dimension_numbers<[1], [0], [0], [1], [0, 0, 1, 1], [], []>} : vector<36x16xf32>, vector<16x32xf32>, vector<36x32xf32> -> vector<36x32xf32>
    %164 = arith.addf %143, %163 : vector<36x32xf32>
    %165 = arith.addf %71, %164 : vector<36x32xf32>
    %166 = vector.broadcast %87 : vector<1x32xf32> to vector<36x32xf32>
    %167 = arith.addf %165, %166 : vector<36x32xf32>
    %cst_73 = arith.constant dense<0.000000e+00> : vector<36xf32>
    %168 = vector.multi_reduction <add>, %167, %cst_73 [1] : vector<36x32xf32> to vector<36xf32>
    %169 = vector.shape_cast %168 : vector<36xf32> to vector<36x1xf32>
    %cst_74 = arith.constant 3.200000e+01 : f32
    %170 = vector.broadcast %cst_74 : f32 to vector<36x1xf32>
    %171 = arith.divf %169, %170 : vector<36x1xf32>
    %172 = vector.broadcast %171 : vector<36x1xf32> to vector<36x32xf32>
    %173 = arith.subf %167, %172 : vector<36x32xf32>
    %174 = arith.mulf %173, %173 : vector<36x32xf32>
    %cst_75 = arith.constant dense<0.000000e+00> : vector<36xf32>
    %175 = vector.multi_reduction <add>, %174, %cst_75 [1] : vector<36x32xf32> to vector<36xf32>
    %176 = vector.shape_cast %175 : vector<36xf32> to vector<36x1xf32>
    %cst_76 = arith.constant 3.200000e+01 : f32
    %177 = vector.broadcast %cst_76 : f32 to vector<36x1xf32>
    %178 = arith.divf %176, %177 : vector<36x1xf32>
    %179 = vector.broadcast %171 : vector<36x1xf32> to vector<36x32xf32>
    %180 = arith.subf %167, %179 : vector<36x32xf32>
    %cst_77 = arith.constant 9.99999997E-7 : f32
    %181 = vector.broadcast %cst_77 : f32 to vector<36x1xf32>
    %182 = arith.addf %178, %181 : vector<36x1xf32>
    %183 = math.rsqrt %182 : vector<36x1xf32>
    %184 = vector.broadcast %183 : vector<36x1xf32> to vector<36x32xf32>
    %185 = arith.mulf %180, %184 : vector<36x32xf32>
    %186 = vector.broadcast %88 : vector<1x32xf32> to vector<36x32xf32>
    %187 = arith.mulf %185, %186 : vector<36x32xf32>
    %188 = vector.broadcast %89 : vector<1x32xf32> to vector<36x32xf32>
    %189 = arith.addf %187, %188 : vector<36x32xf32>
    %c0_78 = arith.constant 0 : index
    %c0_79 = arith.constant 0 : index
    %c0_80 = arith.constant 0 : index
    %190 = vector.load %arg10[%c0_78, %c0_79, %c0_80] : memref<2x32x128xf32, #tpu.memory_space<vmem>>, vector<1x32x128xf32>
    %191 = vector.shape_cast %190 : vector<1x32x128xf32> to vector<32x128xf32>
    %cst_81 = arith.constant dense<0.000000e+00> : vector<36x128xf32>
    %192 = tpu.matmul %189, %191, %cst_81 {dimension_numbers = #tpu.dot_dimension_numbers<[1], [0], [0], [1], [0, 0, 1, 1], [], []>} : vector<36x32xf32>, vector<32x128xf32>, vector<36x128xf32> -> vector<36x128xf32>
    %c0_82 = arith.constant 0 : index
    %c0_83 = arith.constant 0 : index
    %c0_84 = arith.constant 0 : index
    %193 = vector.load %arg11[%c0_82, %c0_83, %c0_84] : memref<2x1x128xf32, #tpu.memory_space<vmem>>, vector<1x1x128xf32>
    %194 = vector.shape_cast %193 : vector<1x1x128xf32> to vector<1x128xf32>
    %195 = vector.broadcast %194 : vector<1x128xf32> to vector<36x128xf32>
    %196 = arith.addf %192, %195 : vector<36x128xf32>
    %197 = arith.mulf %196, %196 : vector<36x128xf32>
    %198 = arith.mulf %196, %197 : vector<36x128xf32>
    %cst_85 = arith.constant 4.471500e-02 : f32
    %199 = vector.broadcast %cst_85 : f32 to vector<36x128xf32>
    %200 = arith.mulf %199, %198 : vector<36x128xf32>
    %201 = arith.addf %196, %200 : vector<36x128xf32>
    %cst_86 = arith.constant 0.797884583 : f32
    %202 = vector.broadcast %cst_86 : f32 to vector<36x128xf32>
    %203 = arith.mulf %202, %201 : vector<36x128xf32>
    %204 = math.tanh %203 : vector<36x128xf32>
    %cst_87 = arith.constant 1.000000e+00 : f32
    %205 = vector.broadcast %cst_87 : f32 to vector<36x128xf32>
    %206 = arith.addf %205, %204 : vector<36x128xf32>
    %cst_88 = arith.constant 5.000000e-01 : f32
    %207 = vector.broadcast %cst_88 : f32 to vector<36x128xf32>
    %208 = arith.mulf %207, %206 : vector<36x128xf32>
    %209 = arith.mulf %196, %208 : vector<36x128xf32>
    %c0_89 = arith.constant 0 : index
    %c0_90 = arith.constant 0 : index
    %c0_91 = arith.constant 0 : index
    %210 = vector.load %arg12[%c0_89, %c0_90, %c0_91] : memref<2x128x32xf32, #tpu.memory_space<vmem>>, vector<1x128x32xf32>
    %211 = vector.shape_cast %210 : vector<1x128x32xf32> to vector<128x32xf32>
    %cst_92 = arith.constant dense<0.000000e+00> : vector<36x32xf32>
    %212 = tpu.matmul %209, %211, %cst_92 {dimension_numbers = #tpu.dot_dimension_numbers<[1], [0], [0], [1], [0, 0, 1, 1], [], []>} : vector<36x128xf32>, vector<128x32xf32>, vector<36x32xf32> -> vector<36x32xf32>
    %213 = vector.broadcast %90 : vector<1x32xf32> to vector<36x32xf32>
    %214 = arith.addf %212, %213 : vector<36x32xf32>
    %215 = arith.addf %167, %214 : vector<36x32xf32>
    %c1_93 = arith.constant 1 : index
    %c0_94 = arith.constant 0 : index
    %c0_95 = arith.constant 0 : index
    %216 = vector.load %arg6[%c1_93, %c0_94, %c0_95] : memref<2x6x32xf32, #tpu.memory_space<vmem>>, vector<1x6x32xf32>
    %217 = vector.shape_cast %216 : vector<1x6x32xf32> to vector<6x32xf32>
    %218 = vector.extract_strided_slice %217 {offsets = [0, 0], sizes = [1, 32], strides = [1, 1]} : vector<6x32xf32> to vector<1x32xf32>
    %219 = vector.extract_strided_slice %217 {offsets = [1, 0], sizes = [1, 32], strides = [1, 1]} : vector<6x32xf32> to vector<1x32xf32>
    %220 = vector.extract_strided_slice %217 {offsets = [2, 0], sizes = [1, 32], strides = [1, 1]} : vector<6x32xf32> to vector<1x32xf32>
    %221 = vector.extract_strided_slice %217 {offsets = [3, 0], sizes = [1, 32], strides = [1, 1]} : vector<6x32xf32> to vector<1x32xf32>
    %222 = vector.extract_strided_slice %217 {offsets = [4, 0], sizes = [1, 32], strides = [1, 1]} : vector<6x32xf32> to vector<1x32xf32>
    %223 = vector.extract_strided_slice %217 {offsets = [5, 0], sizes = [1, 32], strides = [1, 1]} : vector<6x32xf32> to vector<1x32xf32>
    %cst_96 = arith.constant dense<0.000000e+00> : vector<36xf32>
    %224 = vector.multi_reduction <add>, %215, %cst_96 [1] : vector<36x32xf32> to vector<36xf32>
    %225 = vector.shape_cast %224 : vector<36xf32> to vector<36x1xf32>
    %cst_97 = arith.constant 3.200000e+01 : f32
    %226 = vector.broadcast %cst_97 : f32 to vector<36x1xf32>
    %227 = arith.divf %225, %226 : vector<36x1xf32>
    %228 = vector.broadcast %227 : vector<36x1xf32> to vector<36x32xf32>
    %229 = arith.subf %215, %228 : vector<36x32xf32>
    %230 = arith.mulf %229, %229 : vector<36x32xf32>
    %cst_98 = arith.constant dense<0.000000e+00> : vector<36xf32>
    %231 = vector.multi_reduction <add>, %230, %cst_98 [1] : vector<36x32xf32> to vector<36xf32>
    %232 = vector.shape_cast %231 : vector<36xf32> to vector<36x1xf32>
    %cst_99 = arith.constant 3.200000e+01 : f32
    %233 = vector.broadcast %cst_99 : f32 to vector<36x1xf32>
    %234 = arith.divf %232, %233 : vector<36x1xf32>
    %235 = vector.broadcast %227 : vector<36x1xf32> to vector<36x32xf32>
    %236 = arith.subf %215, %235 : vector<36x32xf32>
    %cst_100 = arith.constant 9.99999997E-7 : f32
    %237 = vector.broadcast %cst_100 : f32 to vector<36x1xf32>
    %238 = arith.addf %234, %237 : vector<36x1xf32>
    %239 = math.rsqrt %238 : vector<36x1xf32>
    %240 = vector.broadcast %239 : vector<36x1xf32> to vector<36x32xf32>
    %241 = arith.mulf %236, %240 : vector<36x32xf32>
    %242 = vector.broadcast %218 : vector<1x32xf32> to vector<36x32xf32>
    %243 = arith.mulf %241, %242 : vector<36x32xf32>
    %244 = vector.broadcast %219 : vector<1x32xf32> to vector<36x32xf32>
    %245 = arith.addf %243, %244 : vector<36x32xf32>
    %c1_101 = arith.constant 1 : index
    %c0_102 = arith.constant 0 : index
    %c0_103 = arith.constant 0 : index
    %246 = vector.load %arg7[%c1_101, %c0_102, %c0_103] : memref<2x32x96xf32, #tpu.memory_space<vmem>>, vector<1x32x96xf32>
    %247 = vector.shape_cast %246 : vector<1x32x96xf32> to vector<32x96xf32>
    %cst_104 = arith.constant dense<0.000000e+00> : vector<36x96xf32>
    %248 = tpu.matmul %245, %247, %cst_104 {dimension_numbers = #tpu.dot_dimension_numbers<[1], [0], [0], [1], [0, 0, 1, 1], [], []>} : vector<36x32xf32>, vector<32x96xf32>, vector<36x96xf32> -> vector<36x96xf32>
    %c1_105 = arith.constant 1 : index
    %c0_106 = arith.constant 0 : index
    %c0_107 = arith.constant 0 : index
    %249 = vector.load %arg8[%c1_105, %c0_106, %c0_107] : memref<2x1x96xf32, #tpu.memory_space<vmem>>, vector<1x1x96xf32>
    %250 = vector.shape_cast %249 : vector<1x1x96xf32> to vector<1x96xf32>
    %251 = vector.broadcast %250 : vector<1x96xf32> to vector<36x96xf32>
    %252 = arith.addf %248, %251 : vector<36x96xf32>
    %c1_108 = arith.constant 1 : index
    %c0_109 = arith.constant 0 : index
    %c0_110 = arith.constant 0 : index
    %253 = vector.load %arg9[%c1_108, %c0_109, %c0_110] : memref<2x32x32xf32, #tpu.memory_space<vmem>>, vector<1x32x32xf32>
    %254 = vector.shape_cast %253 : vector<1x32x32xf32> to vector<32x32xf32>
    %cst_111 = arith.constant 0.000000e+00 : f32
    %255 = vector.broadcast %cst_111 : f32 to vector<36x32xf32>
    %256 = vector.extract_strided_slice %252 {offsets = [0, 0], sizes = [36, 16], strides = [1, 1]} : vector<36x96xf32> to vector<36x16xf32>
    %257 = vector.extract_strided_slice %252 {offsets = [0, 32], sizes = [36, 16], strides = [1, 1]} : vector<36x96xf32> to vector<36x16xf32>
    %258 = vector.extract_strided_slice %252 {offsets = [0, 64], sizes = [36, 16], strides = [1, 1]} : vector<36x96xf32> to vector<36x16xf32>
    %cst_112 = arith.constant dense<0.000000e+00> : vector<36x36xf32>
    %259 = tpu.matmul %256, %257, %cst_112 {dimension_numbers = #tpu.dot_dimension_numbers<[1], [1], [0], [0], [0, 0, 1, 0], [], []>} : vector<36x16xf32>, vector<36x16xf32>, vector<36x36xf32> -> vector<36x36xf32>
    %cst_113 = arith.constant 2.500000e-01 : f32
    %260 = vector.broadcast %cst_113 : f32 to vector<36x36xf32>
    %261 = arith.mulf %259, %260 : vector<36x36xf32>
    %262 = arith.addf %261, %82 : vector<36x36xf32>
    %cst_114 = arith.constant dense<0xFF800000> : vector<36xf32>
    %263 = vector.multi_reduction <maximumf>, %262, %cst_114 [1] : vector<36x36xf32> to vector<36xf32>
    %264 = vector.shape_cast %263 : vector<36xf32> to vector<36x1xf32>
    %265 = vector.broadcast %264 : vector<36x1xf32> to vector<36x36xf32>
    %266 = arith.subf %262, %265 : vector<36x36xf32>
    %267 = math.exp %266 : vector<36x36xf32>
    %cst_115 = arith.constant dense<0.000000e+00> : vector<36xf32>
    %268 = vector.multi_reduction <add>, %267, %cst_115 [1] : vector<36x36xf32> to vector<36xf32>
    %269 = vector.shape_cast %268 : vector<36xf32> to vector<36x1xf32>
    %270 = tpu.reciprocal %269 {approx = true} : vector<36x1xf32> -> vector<36x1xf32>
    %271 = vector.broadcast %270 : vector<36x1xf32> to vector<36x36xf32>
    %272 = arith.mulf %267, %271 : vector<36x36xf32>
    %cst_116 = arith.constant dense<0.000000e+00> : vector<36x16xf32>
    %273 = tpu.matmul %272, %258, %cst_116 {dimension_numbers = #tpu.dot_dimension_numbers<[1], [0], [0], [1], [0, 0, 1, 1], [], []>} : vector<36x36xf32>, vector<36x16xf32>, vector<36x16xf32> -> vector<36x16xf32>
    %274 = vector.extract_strided_slice %254 {offsets = [0, 0], sizes = [16, 32], strides = [1, 1]} : vector<32x32xf32> to vector<16x32xf32>
    %cst_117 = arith.constant dense<0.000000e+00> : vector<36x32xf32>
    %275 = tpu.matmul %273, %274, %cst_117 {dimension_numbers = #tpu.dot_dimension_numbers<[1], [0], [0], [1], [0, 0, 1, 1], [], []>} : vector<36x16xf32>, vector<16x32xf32>, vector<36x32xf32> -> vector<36x32xf32>
    %276 = arith.addf %255, %275 : vector<36x32xf32>
    %277 = vector.extract_strided_slice %252 {offsets = [0, 16], sizes = [36, 16], strides = [1, 1]} : vector<36x96xf32> to vector<36x16xf32>
    %278 = vector.extract_strided_slice %252 {offsets = [0, 48], sizes = [36, 16], strides = [1, 1]} : vector<36x96xf32> to vector<36x16xf32>
    %279 = vector.extract_strided_slice %252 {offsets = [0, 80], sizes = [36, 16], strides = [1, 1]} : vector<36x96xf32> to vector<36x16xf32>
    %cst_118 = arith.constant dense<0.000000e+00> : vector<36x36xf32>
    %280 = tpu.matmul %277, %278, %cst_118 {dimension_numbers = #tpu.dot_dimension_numbers<[1], [1], [0], [0], [0, 0, 1, 0], [], []>} : vector<36x16xf32>, vector<36x16xf32>, vector<36x36xf32> -> vector<36x36xf32>
    %cst_119 = arith.constant 2.500000e-01 : f32
    %281 = vector.broadcast %cst_119 : f32 to vector<36x36xf32>
    %282 = arith.mulf %280, %281 : vector<36x36xf32>
    %283 = arith.addf %282, %82 : vector<36x36xf32>
    %cst_120 = arith.constant dense<0xFF800000> : vector<36xf32>
    %284 = vector.multi_reduction <maximumf>, %283, %cst_120 [1] : vector<36x36xf32> to vector<36xf32>
    %285 = vector.shape_cast %284 : vector<36xf32> to vector<36x1xf32>
    %286 = vector.broadcast %285 : vector<36x1xf32> to vector<36x36xf32>
    %287 = arith.subf %283, %286 : vector<36x36xf32>
    %288 = math.exp %287 : vector<36x36xf32>
    %cst_121 = arith.constant dense<0.000000e+00> : vector<36xf32>
    %289 = vector.multi_reduction <add>, %288, %cst_121 [1] : vector<36x36xf32> to vector<36xf32>
    %290 = vector.shape_cast %289 : vector<36xf32> to vector<36x1xf32>
    %291 = tpu.reciprocal %290 {approx = true} : vector<36x1xf32> -> vector<36x1xf32>
    %292 = vector.broadcast %291 : vector<36x1xf32> to vector<36x36xf32>
    %293 = arith.mulf %288, %292 : vector<36x36xf32>
    %cst_122 = arith.constant dense<0.000000e+00> : vector<36x16xf32>
    %294 = tpu.matmul %293, %279, %cst_122 {dimension_numbers = #tpu.dot_dimension_numbers<[1], [0], [0], [1], [0, 0, 1, 1], [], []>} : vector<36x36xf32>, vector<36x16xf32>, vector<36x16xf32> -> vector<36x16xf32>
    %295 = vector.extract_strided_slice %254 {offsets = [16, 0], sizes = [16, 32], strides = [1, 1]} : vector<32x32xf32> to vector<16x32xf32>
    %cst_123 = arith.constant dense<0.000000e+00> : vector<36x32xf32>
    %296 = tpu.matmul %294, %295, %cst_123 {dimension_numbers = #tpu.dot_dimension_numbers<[1], [0], [0], [1], [0, 0, 1, 1], [], []>} : vector<36x16xf32>, vector<16x32xf32>, vector<36x32xf32> -> vector<36x32xf32>
    %297 = arith.addf %276, %296 : vector<36x32xf32>
    %298 = arith.addf %215, %297 : vector<36x32xf32>
    %299 = vector.broadcast %220 : vector<1x32xf32> to vector<36x32xf32>
    %300 = arith.addf %298, %299 : vector<36x32xf32>
    %cst_124 = arith.constant dense<0.000000e+00> : vector<36xf32>
    %301 = vector.multi_reduction <add>, %300, %cst_124 [1] : vector<36x32xf32> to vector<36xf32>
    %302 = vector.shape_cast %301 : vector<36xf32> to vector<36x1xf32>
    %cst_125 = arith.constant 3.200000e+01 : f32
    %303 = vector.broadcast %cst_125 : f32 to vector<36x1xf32>
    %304 = arith.divf %302, %303 : vector<36x1xf32>
    %305 = vector.broadcast %304 : vector<36x1xf32> to vector<36x32xf32>
    %306 = arith.subf %300, %305 : vector<36x32xf32>
    %307 = arith.mulf %306, %306 : vector<36x32xf32>
    %cst_126 = arith.constant dense<0.000000e+00> : vector<36xf32>
    %308 = vector.multi_reduction <add>, %307, %cst_126 [1] : vector<36x32xf32> to vector<36xf32>
    %309 = vector.shape_cast %308 : vector<36xf32> to vector<36x1xf32>
    %cst_127 = arith.constant 3.200000e+01 : f32
    %310 = vector.broadcast %cst_127 : f32 to vector<36x1xf32>
    %311 = arith.divf %309, %310 : vector<36x1xf32>
    %312 = vector.broadcast %304 : vector<36x1xf32> to vector<36x32xf32>
    %313 = arith.subf %300, %312 : vector<36x32xf32>
    %cst_128 = arith.constant 9.99999997E-7 : f32
    %314 = vector.broadcast %cst_128 : f32 to vector<36x1xf32>
    %315 = arith.addf %311, %314 : vector<36x1xf32>
    %316 = math.rsqrt %315 : vector<36x1xf32>
    %317 = vector.broadcast %316 : vector<36x1xf32> to vector<36x32xf32>
    %318 = arith.mulf %313, %317 : vector<36x32xf32>
    %319 = vector.broadcast %221 : vector<1x32xf32> to vector<36x32xf32>
    %320 = arith.mulf %318, %319 : vector<36x32xf32>
    %321 = vector.broadcast %222 : vector<1x32xf32> to vector<36x32xf32>
    %322 = arith.addf %320, %321 : vector<36x32xf32>
    %c1_129 = arith.constant 1 : index
    %c0_130 = arith.constant 0 : index
    %c0_131 = arith.constant 0 : index
    %323 = vector.load %arg10[%c1_129, %c0_130, %c0_131] : memref<2x32x128xf32, #tpu.memory_space<vmem>>, vector<1x32x128xf32>
    %324 = vector.shape_cast %323 : vector<1x32x128xf32> to vector<32x128xf32>
    %cst_132 = arith.constant dense<0.000000e+00> : vector<36x128xf32>
    %325 = tpu.matmul %322, %324, %cst_132 {dimension_numbers = #tpu.dot_dimension_numbers<[1], [0], [0], [1], [0, 0, 1, 1], [], []>} : vector<36x32xf32>, vector<32x128xf32>, vector<36x128xf32> -> vector<36x128xf32>
    %c1_133 = arith.constant 1 : index
    %c0_134 = arith.constant 0 : index
    %c0_135 = arith.constant 0 : index
    %326 = vector.load %arg11[%c1_133, %c0_134, %c0_135] : memref<2x1x128xf32, #tpu.memory_space<vmem>>, vector<1x1x128xf32>
    %327 = vector.shape_cast %326 : vector<1x1x128xf32> to vector<1x128xf32>
    %328 = vector.broadcast %327 : vector<1x128xf32> to vector<36x128xf32>
    %329 = arith.addf %325, %328 : vector<36x128xf32>
    %330 = arith.mulf %329, %329 : vector<36x128xf32>
    %331 = arith.mulf %329, %330 : vector<36x128xf32>
    %cst_136 = arith.constant 4.471500e-02 : f32
    %332 = vector.broadcast %cst_136 : f32 to vector<36x128xf32>
    %333 = arith.mulf %332, %331 : vector<36x128xf32>
    %334 = arith.addf %329, %333 : vector<36x128xf32>
    %cst_137 = arith.constant 0.797884583 : f32
    %335 = vector.broadcast %cst_137 : f32 to vector<36x128xf32>
    %336 = arith.mulf %335, %334 : vector<36x128xf32>
    %337 = math.tanh %336 : vector<36x128xf32>
    %cst_138 = arith.constant 1.000000e+00 : f32
    %338 = vector.broadcast %cst_138 : f32 to vector<36x128xf32>
    %339 = arith.addf %338, %337 : vector<36x128xf32>
    %cst_139 = arith.constant 5.000000e-01 : f32
    %340 = vector.broadcast %cst_139 : f32 to vector<36x128xf32>
    %341 = arith.mulf %340, %339 : vector<36x128xf32>
    %342 = arith.mulf %329, %341 : vector<36x128xf32>
    %c1_140 = arith.constant 1 : index
    %c0_141 = arith.constant 0 : index
    %c0_142 = arith.constant 0 : index
    %343 = vector.load %arg12[%c1_140, %c0_141, %c0_142] : memref<2x128x32xf32, #tpu.memory_space<vmem>>, vector<1x128x32xf32>
    %344 = vector.shape_cast %343 : vector<1x128x32xf32> to vector<128x32xf32>
    %cst_143 = arith.constant dense<0.000000e+00> : vector<36x32xf32>
    %345 = tpu.matmul %342, %344, %cst_143 {dimension_numbers = #tpu.dot_dimension_numbers<[1], [0], [0], [1], [0, 0, 1, 1], [], []>} : vector<36x128xf32>, vector<128x32xf32>, vector<36x32xf32> -> vector<36x32xf32>
    %346 = vector.broadcast %223 : vector<1x32xf32> to vector<36x32xf32>
    %347 = arith.addf %345, %346 : vector<36x32xf32>
    %348 = arith.addf %300, %347 : vector<36x32xf32>
    %cst_144 = arith.constant dense<0.000000e+00> : vector<36xf32>
    %349 = vector.multi_reduction <add>, %348, %cst_144 [1] : vector<36x32xf32> to vector<36xf32>
    %350 = vector.shape_cast %349 : vector<36xf32> to vector<36x1xf32>
    %cst_145 = arith.constant 3.200000e+01 : f32
    %351 = vector.broadcast %cst_145 : f32 to vector<36x1xf32>
    %352 = arith.divf %350, %351 : vector<36x1xf32>
    %353 = vector.broadcast %352 : vector<36x1xf32> to vector<36x32xf32>
    %354 = arith.subf %348, %353 : vector<36x32xf32>
    %355 = arith.mulf %354, %354 : vector<36x32xf32>
    %cst_146 = arith.constant dense<0.000000e+00> : vector<36xf32>
    %356 = vector.multi_reduction <add>, %355, %cst_146 [1] : vector<36x32xf32> to vector<36xf32>
    %357 = vector.shape_cast %356 : vector<36xf32> to vector<36x1xf32>
    %cst_147 = arith.constant 3.200000e+01 : f32
    %358 = vector.broadcast %cst_147 : f32 to vector<36x1xf32>
    %359 = arith.divf %357, %358 : vector<36x1xf32>
    %360 = vector.broadcast %352 : vector<36x1xf32> to vector<36x32xf32>
    %361 = arith.subf %348, %360 : vector<36x32xf32>
    %cst_148 = arith.constant 9.99999997E-7 : f32
    %362 = vector.broadcast %cst_148 : f32 to vector<36x1xf32>
    %363 = arith.addf %359, %362 : vector<36x1xf32>
    %364 = math.rsqrt %363 : vector<36x1xf32>
    %365 = vector.broadcast %364 : vector<36x1xf32> to vector<36x32xf32>
    %366 = arith.mulf %361, %365 : vector<36x32xf32>
    %367 = vector.broadcast %33 : vector<1x32xf32> to vector<36x32xf32>
    %368 = arith.mulf %366, %367 : vector<36x32xf32>
    %369 = vector.broadcast %34 : vector<1x32xf32> to vector<36x32xf32>
    %370 = arith.addf %368, %369 : vector<36x32xf32>
    %371 = vector.extract_strided_slice %370 {offsets = [0, 0], sizes = [1, 32], strides = [1, 1]} : vector<36x32xf32> to vector<1x32xf32>
    %372 = vector.extract_strided_slice %370 {offsets = [1, 0], sizes = [1, 32], strides = [1, 1]} : vector<36x32xf32> to vector<1x32xf32>
    %373 = arith.addf %371, %372 : vector<1x32xf32>
    %cst_149 = arith.constant 5.000000e-01 : f32
    %374 = vector.broadcast %cst_149 : f32 to vector<1x32xf32>
    %375 = arith.mulf %374, %373 : vector<1x32xf32>
    %c0_150 = arith.constant 0 : index
    %c0_151 = arith.constant 0 : index
    %c0_152 = arith.constant 0 : index
    %376 = vector.load %arg13[%c0_150, %c0_151, %c0_152] : memref<1x2x32xf32, #tpu.memory_space<vmem>>, vector<1x1x32xf32>
    %377 = vector.shape_cast %376 : vector<1x1x32xf32> to vector<1x32xf32>
    %378 = vector.shape_cast %375 : vector<1x32xf32> to vector<1x1x32xf32>
    tpu.vector_store %arg13[%c0_150, %c0_151, %c0_152], %378 {strides = array<i32>} : memref<1x2x32xf32, #tpu.memory_space<vmem>>, vector<1x1x32xf32>,
    %379 = vector.extract_strided_slice %370 {offsets = [18, 0], sizes = [1, 32], strides = [1, 1]} : vector<36x32xf32> to vector<1x32xf32>
    %380 = vector.extract_strided_slice %370 {offsets = [19, 0], sizes = [1, 32], strides = [1, 1]} : vector<36x32xf32> to vector<1x32xf32>
    %381 = arith.addf %379, %380 : vector<1x32xf32>
    %cst_153 = arith.constant 5.000000e-01 : f32
    %382 = vector.broadcast %cst_153 : f32 to vector<1x32xf32>
    %383 = arith.mulf %382, %381 : vector<1x32xf32>
    %c0_154 = arith.constant 0 : index
    %c1_155 = arith.constant 1 : index
    %c0_156 = arith.constant 0 : index
    %384 = vector.load %arg13[%c0_154, %c1_155, %c0_156] : memref<1x2x32xf32, #tpu.memory_space<vmem>>, vector<1x1x32xf32>
    %385 = vector.shape_cast %384 : vector<1x1x32xf32> to vector<1x32xf32>
    %386 = vector.shape_cast %383 : vector<1x32xf32> to vector<1x1x32xf32>
    tpu.vector_store %arg13[%c0_154, %c1_155, %c0_156], %386 {strides = array<i32>} : memref<1x2x32xf32, #tpu.memory_space<vmem>>, vector<1x1x32xf32>,
    return
  }
  func.func @transform_0(%arg0: i32) -> (i32, i32, i32) {
    %c0_i32 = arith.constant 0 : i32
    %c0_i32_0 = arith.constant 0 : i32
    %c0_i32_1 = arith.constant 0 : i32
    return %arg0, %c0_i32, %c0_i32_0 : i32, i32, i32
  }
  func.func @transform_1(%arg0: i32) -> (i32, i32) {
    %c0_i32 = arith.constant 0 : i32
    %c0_i32_0 = arith.constant 0 : i32
    %c0_i32_1 = arith.constant 0 : i32
    return %c0_i32, %c0_i32_0 : i32, i32
  }
  func.func @transform_2(%arg0: i32) -> (i32, i32) {
    %c0_i32 = arith.constant 0 : i32
    %c0_i32_0 = arith.constant 0 : i32
    %c0_i32_1 = arith.constant 0 : i32
    return %c0_i32, %c0_i32_0 : i32, i32
  }
  func.func @transform_3(%arg0: i32) -> (i32, i32, i32) {
    %c0_i32 = arith.constant 0 : i32
    %c0_i32_0 = arith.constant 0 : i32
    %c0_i32_1 = arith.constant 0 : i32
    %c0_i32_2 = arith.constant 0 : i32
    return %c0_i32, %c0_i32_0, %c0_i32_1 : i32, i32, i32
  }
  func.func @transform_4(%arg0: i32) -> (i32, i32) {
    %c0_i32 = arith.constant 0 : i32
    %c0_i32_0 = arith.constant 0 : i32
    %c0_i32_1 = arith.constant 0 : i32
    return %c0_i32, %c0_i32_0 : i32, i32
  }
  func.func @transform_5(%arg0: i32) -> (i32, i32, i32) {
    %c0_i32 = arith.constant 0 : i32
    %c0_i32_0 = arith.constant 0 : i32
    %c0_i32_1 = arith.constant 0 : i32
    %c0_i32_2 = arith.constant 0 : i32
    return %c0_i32, %c0_i32_0, %c0_i32_1 : i32, i32, i32
  }
  func.func @transform_6(%arg0: i32) -> (i32, i32, i32) {
    %c0_i32 = arith.constant 0 : i32
    %c0_i32_0 = arith.constant 0 : i32
    %c0_i32_1 = arith.constant 0 : i32
    %c0_i32_2 = arith.constant 0 : i32
    return %c0_i32, %c0_i32_0, %c0_i32_1 : i32, i32, i32
  }
  func.func @transform_7(%arg0: i32) -> (i32, i32, i32) {
    %c0_i32 = arith.constant 0 : i32
    %c0_i32_0 = arith.constant 0 : i32
    %c0_i32_1 = arith.constant 0 : i32
    %c0_i32_2 = arith.constant 0 : i32
    return %c0_i32, %c0_i32_0, %c0_i32_1 : i32, i32, i32
  }
  func.func @transform_8(%arg0: i32) -> (i32, i32, i32) {
    %c0_i32 = arith.constant 0 : i32
    %c0_i32_0 = arith.constant 0 : i32
    %c0_i32_1 = arith.constant 0 : i32
    %c0_i32_2 = arith.constant 0 : i32
    return %c0_i32, %c0_i32_0, %c0_i32_1 : i32, i32, i32
  }
  func.func @transform_9(%arg0: i32) -> (i32, i32, i32) {
    %c0_i32 = arith.constant 0 : i32
    %c0_i32_0 = arith.constant 0 : i32
    %c0_i32_1 = arith.constant 0 : i32
    %c0_i32_2 = arith.constant 0 : i32
    return %c0_i32, %c0_i32_0, %c0_i32_1 : i32, i32, i32
  }
  func.func @transform_10(%arg0: i32) -> (i32, i32, i32) {
    %c0_i32 = arith.constant 0 : i32
    %c0_i32_0 = arith.constant 0 : i32
    %c0_i32_1 = arith.constant 0 : i32
    %c0_i32_2 = arith.constant 0 : i32
    return %c0_i32, %c0_i32_0, %c0_i32_1 : i32, i32, i32
  }
  func.func @transform_11(%arg0: i32) -> (i32, i32, i32) {
    %c0_i32 = arith.constant 0 : i32
    %c0_i32_0 = arith.constant 0 : i32
    %c0_i32_1 = arith.constant 0 : i32
    %c0_i32_2 = arith.constant 0 : i32
    return %c0_i32, %c0_i32_0, %c0_i32_1 : i32, i32, i32
  }
  func.func @transform_12(%arg0: i32) -> (i32, i32, i32) {
    %c0_i32 = arith.constant 0 : i32
    %c0_i32_0 = arith.constant 0 : i32
    %c0_i32_1 = arith.constant 0 : i32
    return %arg0, %c0_i32, %c0_i32_0 : i32, i32, i32
  }
}

</mosaic_0001>

<bundles_post_ra>
// kernel: forward.1
= control target key start
LH: loop header
LB: loop body
LE: loop exit
PB: predicated region body
PF: predicated region fallthrough
CT: control target
= control target key end

     0   :  { %s6752_s0 = inlined_call_operand.vmem [shape: f32[2,16,128], index: 0, kind: input, shape index: {}]   ;;  %s6753_s1 = inlined_call_operand.vmem [shape: f32[128,128], index: 1, kind: input, shape index: {}]   ;;  %s6754_s2 = inlined_call_operand.vmem [shape: f32[128,32], index: 2, kind: input, shape index: {}]   ;;  %s6755_s3 = inlined_call_operand.vmem [shape: f32[4,32,256], index: 3, kind: input, shape index: {}]   ;;  %s6756_s4 = inlined_call_operand.vmem [shape: f32[20,32], index: 4, kind: input, shape index: {}]   ;;  %s6757_s5 = inlined_call_operand.vmem [shape: f32[2,6,32], index: 5, kind: input, shape index: {}]   ;;  %s6758_s6 = inlined_call_operand.vmem [shape: f32[2,32,96], index: 6, kind: input, shape index: {}]   ;;  %s6759_s7 = inlined_call_operand.vmem [shape: f32[2,1,96], index: 7, kind: input, shape index: {}]   ;;  %s6760_s8 = inlined_call_operand.vmem [shape: f32[2,32,32], index: 8, kind: input, shape index: {}]   ;;  %s6761_s9 = inlined_call_operand.vmem [shape: f32[2,32,128], index: 9, kind: input, shape index: {}]   ;;  %s6762_s10 = inlined_call_operand.vmem [shape: f32[2,1,128], index: 10, kind: input, shape index: {}]   ;;  %s6763_s11 = inlined_call_operand.vmem [shape: f32[2,128,32], index: 11, kind: input, shape index: {}]   ;;  %s6764_s12 = inlined_call_operand.hbm [shape: f32[2,2,32], index: 12, kind: output, shape index: {}]  }
   0x1   :  { %6774 = sst [smem:[#allocation8_spill]] %s6752_s0 }
   0x2   :  { %17 = vsyncpa [#allocation4], 0 }
   0x3   :  { %19 = vsyncpa [#allocation4 + $0x1], 0  ;;  %s5275_s21 = smov 0   ;;  %s5277_s22 = smov 0  }
   0x4   :  { %s5279_s23 = smov 0   ;;  %s5281_s24 = smov 0  }
   0x5 LB: > { %6775 = sst [smem:[#allocation6_spill]] %s5193_s23  ;;  %s5296_s25 = sadd.s32 4294967295, %s5197_s24   ;;  %s5197_s24 = sphi %s5281_s24, %s6788_s24   ;;  %s5193_s23 = sphi %s5279_s23, %s6785_s23   ;;  %s5189_s22 = sphi %s5277_s22, %s6787_s22   ;;  %s5185_s21 = sphi %s5275_s21, %s6786_s21  }
   0x6   : > { %s3999_s26 = sadd.s32 4294967294, %s5197_s24   ;;  %s5300_s27 = sadd.s32 1, %s5197_s24  }
   0x7   : > { %s289_s28 = sadd.s32 1, %s5193_s23  ;;  %s286_s29 = ssub.s32 %s5197_s24, %s5300_s27 }
   0x8   : > { %p299_p0 = scmp.ne.s32.totalorder %s5193_s23, %s5189_s22  ;;  %p287_p1 = scmp.eq.s32.totalorder %s286_s29, 0 }
   0x9   : > { %p300_p2 = scmp.eq.s32.totalorder %s5296_s25, 1  ;;  %p305_p3 = scmp.ne.s32.totalorder %s5189_s22, %s5185_s21 }
   0xa   : > { %p306_p4 = scmp.eq.s32.totalorder %s3999_s26, 1  ;;  %p4002_p7 = scmp.ge.s32.totalorder %s5197_s24, 1 }
   0xb   : > { %s5311_s30 = scalar_select %p287_p1, %s5193_s23, %s289_s28  }
   0xc   : > { %p5313_p5 = por %p300_p2, %p299_p0  ;;  %p5317_p6 = por %p306_p4, %p305_p3 }
   0xd   : > { %6776 = sst [smem:[#allocation7_spill]] %s5311_s30  ;;  %p365_p8 = scmp.lt.s32.totalorder %s5197_s24, 3 }
   0xf   : > { %p366_p9 = pnand %p4002_p7, %p365_p8 }
  0x10   : > { %p407_p10 = scmp.lt.s32.totalorder (!%p366_p9), %s5296_s25, 1  ;;  %s6779_s0 = sld [smem:[#allocation8_spill]] (!%p366_p9) }
  0x11   : > { %369 = sbr.rel (%p366_p9) target bundleno = 5873 (0x16f1), region = 68  ;;  %s6766_s19 = smov (!%p366_p9), 32  }
  0x12   : > { %s6768_s20 = smov (!%p366_p9), 96   ;;  %s6772_s28 = smov (!%p366_p9), 64  }
  0x13   : > { %s6780_s30 = smov (!%p366_p9), 96   ;;  %s6781_s29 = smov (!%p366_p9), 32  }
  0x14   : > { %s5205_s16 = smov (!%p366_p9), 112   ;;  %s6770_s18 = smov (!%p366_p9), 48  }
  0x16   : > { %v429_v0 = vld [vmem:[%s6753_s1 + $0x78] sm:$0xff]  ;;  %v428_v1 = vld [vmem:[%s6753_s1 + $0x70] sm:$0xff]  ;;  %v427_v2 = vld [vmem:[%s6753_s1 + $0x68] sm:$0xff]  ;;  %s408_s26 = scalar_select %p407_p10, %s5296_s25, 1  ;;  %v5199_v54 = vmov 0.0   ;;  %vm941_vm0 = vcmask 254976   ;;  %v1011_v58 = vlaneseq }
  0x17   : > { %4400 = vmatprep.subr.mxu0 %v429_v0  ;;  %v426_v3 = vld [vmem:[%s6753_s1 + $0x60] sm:$0xff]  ;;  %v522_v4 = vld [vmem:[%s6754_s2 + $0x78] sm:$0xff]  ;;  %v521_v7 = vld [vmem:[%s6754_s2 + $0x70] sm:$0xff]  ;;  %vm950_vm1 = vcmask 1041408   ;;  %vm621_vm2 = vcmask 261120   ;;  %vm947_vm3 = vcmask 257024  }
  0x18   : > { %4401 = vmatpush3.msra.mxu0 %v429_v0  ;;  %s4177_s15 = sshll.u32 %s408_s26, 4  ;;  %v425_v5 = vld [vmem:[%s6753_s1 + $0x58] sm:$0xff]  ;;  %4435 = vmatprep.subr.mxu1 %v522_v4  ;;  %v424_v8 = vld [vmem:[%s6753_s1 + $0x50] sm:$0xff]  ;;  %v520_v9 = vld [vmem:[%s6754_s2 + $0x68] sm:$0xff]  ;;  %v5497_v63 = vshrl.u32 %v1011_v58, 7  ;;  %vm5203_vm4 = vmmov 0  }
  0x19   : > { %4402 = vmatprep.subr.mxu0 %v428_v1  ;;  %s5340_s17 = scalar_lea.vmem %s6779_s0, %s4177_s15  ;;  %4436 = vmatpush3.msra.mxu1 %v522_v4  ;;  %v423_v10 = vld [vmem:[%s6753_s1 + $0x48] sm:$0xff]  ;;  %v519_v11 = vld [vmem:[%s6754_s2 + $0x60] sm:$0xff]  ;;  %v518_v13 = vld [vmem:[%s6754_s2 + $0x58] sm:$0xff]  ;;  %vm1260_vm5 = vcmask 130048   ;;  %vm1467_vm6 = vcmask 1043456   ;;  %vm5206_vm8 = vmmov 1  }
  0x1a   : > { %4403 = vmatpush3.msra.mxu0 %v428_v1  ;;  %v412_v6 = vld [vmem:[%s5340_s17] sm:$0xff]  ;;  %4437 = vmatprep.subr.mxu1 %v521_v7  ;;  %v421_v14 = vld [vmem:[%s6753_s1 + $0x38] sm:$0xff]  ;;  %v517_v15 = vld [vmem:[%s6754_s2 + $0x50] sm:$0xff]  ;;  %vm1381_vm10 = vcmask 293888  }
  0x1b   : > { %4404 = vmatprep.subr.mxu0 %v427_v2  ;;  %4432 = vmatprep.mubr.f32.mxu0 %v412_v6  ;;  %v422_v12 = vld [vmem:[%s6753_s1 + $0x40] sm:$0xff]  ;;  %v420_v16 = vld [vmem:[%s6753_s1 + $0x30] sm:$0xff]  ;;  %v516_v17 = vld [vmem:[%s6754_s2 + $0x48] sm:$0xff] }
  0x1c   : > { %4405 = vmatpush3.msra.mxu0 %v427_v2  ;;  %4438 = vmatpush3.msra.mxu1 %v521_v7  ;;  %v419_v18 = vld [vmem:[%s6753_s1 + $0x28] sm:$0xff]  ;;  %v515_v19 = vld [vmem:[%s6754_s2 + $0x40] sm:$0xff]  ;;  %v514_v21 = vld [vmem:[%s6754_s2 + $0x38] sm:$0xff]  ;;  %v5501_v2 = vsub.s32 3, %v5497_v63 }
  0x1d   : > { %4406 = vmatprep.subr.mxu0 %v426_v3  ;;  %4439 = vmatprep.subr.mxu1 %v520_v9  ;;  %v418_v20 = vld [vmem:[%s6753_s1 + $0x20] sm:$0xff]  ;;  %v417_v22 = vld [vmem:[%s6753_s1 + $0x18] sm:$0xff]  ;;  %v513_v23 = vld [vmem:[%s6754_s2 + $0x30] sm:$0xff] }
  0x1e   : > { %4407 = vmatpush3.msra.mxu0 %v426_v3  ;;  %4440 = vmatpush3.msra.mxu1 %v520_v9  ;;  %v416_v24 = vld [vmem:[%s6753_s1 + $0x10] sm:$0xff]  ;;  %v512_v25 = vld [vmem:[%s6754_s2 + $0x28] sm:$0xff]  ;;  %v511_v27 = vld [vmem:[%s6754_s2 + $0x20] sm:$0xff] }
  0x1f   : > { %4408 = vmatprep.subr.mxu0 %v425_v5  ;;  %4441 = vmatprep.subr.mxu1 %v519_v11  ;;  %v415_v26 = vld [vmem:[%s6753_s1 + $0x8] sm:$0xff]  ;;  %v414_v28 = vld [vmem:[%s6753_s1] sm:$0xff]  ;;  %v510_v29 = vld [vmem:[%s6754_s2 + $0x18] sm:$0xff] }
  0x20   : > { %4409 = vmatpush3.msra.mxu0 %v425_v5  ;;  %4442 = vmatpush3.msra.mxu1 %v519_v11  ;;  %v413_v30 = vld [vmem:[%s5340_s17 + $0x8] sm:$0xff]  ;;  %v509_v31 = vld [vmem:[%s6754_s2 + $0x10] sm:$0xff]  ;;  %v507_v33 = vld [vmem:[%s6754_s2] sm:$0xff] }
  0x21   : > { %4410 = vmatprep.subr.mxu0 %v424_v8  ;;  %4443 = vmatprep.subr.mxu1 %v518_v13  ;;  %v508_v32 = vld [vmem:[%s6754_s2 + $0x8] sm:$0xff]  ;;  %v4032_v38 = vld [vmem:[%s6755_s3 + $0xf8] sm:$0xff]  ;;  %v4031_v40 = vld [vmem:[%s6755_s3 + $0xf0] sm:$0xff] }
  0x22   : > { %4411 = vmatpush3.msra.mxu0 %v424_v8  ;;  %4444 = vmatpush3.msra.mxu1 %v518_v13  ;;  %v4013_v39 = vld [vmem:[%s6755_s3 + $0x78] sm:$0xff]  ;;  %v4012_v41 = vld [vmem:[%s6755_s3 + $0x70] sm:$0xff]  ;;  %v4030_v42 = vld [vmem:[%s6755_s3 + $0xe8] sm:$0xff] }
  0x23   : > { %4412 = vmatprep.subr.mxu0 %v423_v10  ;;  %4445 = vmatprep.subr.mxu1 %v517_v15  ;;  %v4011_v43 = vld [vmem:[%s6755_s3 + $0x68] sm:$0xff]  ;;  %v4029_v44 = vld [vmem:[%s6755_s3 + $0xe0] sm:$0xff]  ;;  %v4028_v46 = vld [vmem:[%s6755_s3 + $0xd8] sm:$0xff] }
  0x24   : > { %4413 = vmatpush3.msra.mxu0 %v423_v10  ;;  %4446 = vmatpush3.msra.mxu1 %v517_v15  ;;  %v4010_v45 = vld [vmem:[%s6755_s3 + $0x60] sm:$0xff]  ;;  %v4009_v47 = vld [vmem:[%s6755_s3 + $0x58] sm:$0xff]  ;;  %v4027_v48 = vld [vmem:[%s6755_s3 + $0xd0] sm:$0xff] }
  0x25   : > { %4414 = vmatprep.subr.mxu0 %v422_v12  ;;  %4447 = vmatprep.subr.mxu1 %v516_v17  ;;  %v4008_v49 = vld [vmem:[%s6755_s3 + $0x50] sm:$0xff]  ;;  %v4026_v50 = vld [vmem:[%s6755_s3 + $0xc8] sm:$0xff]  ;;  %v4025_v52 = vld [vmem:[%s6755_s3 + $0xc0] sm:$0xff] }
  0x26   : > { %4415 = vmatpush3.msra.mxu0 %v422_v12  ;;  %4448 = vmatpush3.msra.mxu1 %v516_v17  ;;  %v4007_v51 = vld [vmem:[%s6755_s3 + $0x48] sm:$0xff]  ;;  %v4006_v53 = vld [vmem:[%s6755_s3 + $0x40] sm:$0xff]  ;;  %v609_v55 = vld [vmem:[%s6755_s3 + $0x38] sm:$0xff] }
  0x27   : > { %4416 = vmatprep.subr.mxu0 %v421_v14  ;;  %4449 = vmatprep.subr.mxu1 %v515_v19  ;;  %v5485_v56 = vld [vmem:[%s6756_s4] sm:$0xff]  ;;  %v939_v57 = vld [vmem:[%s6756_s4 + $0x8] sm:$0xff]  ;;  %v940_v61 = vld [vmem:[%s6756_s4 + $0x10] sm:$0xf] }
  0x28   : > { %4417 = vmatpush3.msra.mxu0 %v421_v14  ;;  %4450 = vmatpush3.msra.mxu1 %v515_v19  ;;  %v951_v59 = vrot.slane %v5485_v56, 6  ;;  %v952_v60 = vrot.slane %v939_v57, 6  ;;  %985 = vst.msk [vmem:[#allocation2 + $0x12] sm:$0x3] %vm941_vm0, %v5485_v56  ;;  %942 = vst.msk [vmem:[#allocation2] sm:$0x3] %vm941_vm0, %v5485_v56  ;;  %v5505_v4 = vrot.slane %v940_v61, %v5501_v2 }
  0x29   : > { %4418 = vmatprep.subr.mxu0 %v420_v16  ;;  %4451 = vmatprep.subr.mxu1 %v514_v21  ;;  %v974_v62 = vrot.slane %v940_v61, 6  ;;  %v963_v3 = vrot.slane %v939_v57, 2  ;;  %v608_v15 = vld [vmem:[%s6755_s3 + $0x30] sm:$0xff]  ;;  %v606_v17 = vld [vmem:[%s6755_s3 + $0x20] sm:$0xff]  ;;  %vm1394_vm0 = vcmask 289792  }
  0x2a   : > { %4419 = vmatpush3.msra.mxu0 %v420_v16  ;;  %4452 = vmatpush3.msra.mxu1 %v514_v21  ;;  %v953_v0 = vsel %vm950_vm1, %v951_v59, %v952_v60  ;;  %v607_v16 = vld [vmem:[%s6755_s3 + $0x28] sm:$0xff]  ;;  %v604_v19 = vld [vmem:[%s6755_s3 + $0x10] sm:$0xff]  ;;  %v602_v21 = vld [vmem:[%s6755_s3] sm:$0xff] }
  0x2b   : > { %4420 = vmatprep.subr.mxu0 %v419_v18  ;;  %4453 = vmatprep.subr.mxu1 %v513_v23  ;;  %v975_v1 = vsel %vm950_vm1, %v952_v60, %v974_v62  ;;  %vm3917_vm1 = vcmask 253952  }
  0x2c   : > { %4421 = vmatpush3.msra.mxu0 %v419_v18  ;;  %4454 = vmatpush3.msra.mxu1 %v513_v23  ;;  %v605_v18 = vld [vmem:[%s6755_s3 + $0x18] sm:$0xff]  ;;  %v4022_v23 = vld [vmem:[%s6755_s3 + $0xb0] sm:$0xff] }
  0x2d   : > { %4422 = vmatprep.subr.mxu0 %v418_v20  ;;  %4455 = vmatprep.subr.mxu1 %v512_v25 }
  0x2e   : > { %4423 = vmatpush3.msra.mxu0 %v418_v20  ;;  %4456 = vmatpush3.msra.mxu1 %v512_v25  ;;  %v603_v20 = vld [vmem:[%s6755_s3 + $0x8] sm:$0xff]  ;;  %v4020_v25 = vld [vmem:[%s6755_s3 + $0xa0] sm:$0xff] }
  0x2f   : > { %4424 = vmatprep.subr.mxu0 %v417_v22  ;;  %4457 = vmatprep.subr.mxu1 %v511_v27 }
  0x30   : > { %4425 = vmatpush3.msra.mxu0 %v417_v22  ;;  %4458 = vmatpush3.msra.mxu1 %v511_v27  ;;  %v4023_v22 = vld [vmem:[%s6755_s3 + $0xb8] sm:$0xff]  ;;  %v4018_v27 = vld [vmem:[%s6755_s3 + $0x90] sm:$0xff] }
  0x31   : > { %4426 = vmatprep.subr.mxu0 %v416_v24  ;;  %4459 = vmatprep.subr.mxu1 %v510_v29 }
  0x32   : > { %4427 = vmatpush3.msra.mxu0 %v416_v24  ;;  %4460 = vmatpush3.msra.mxu1 %v510_v29  ;;  %v4021_v24 = vld [vmem:[%s6755_s3 + $0xa8] sm:$0xff]  ;;  %v4016_v29 = vld [vmem:[%s6755_s3 + $0x80] sm:$0xff] }
  0x33   : > { %4428 = vmatprep.subr.mxu0 %v415_v26  ;;  %4461 = vmatprep.subr.mxu1 %v509_v31 }
  0x34   : > { %4429 = vmatpush3.msra.mxu0 %v415_v26  ;;  %4462 = vmatpush3.msra.mxu1 %v509_v31  ;;  %v4019_v26 = vld [vmem:[%s6755_s3 + $0x98] sm:$0xff] }
  0x35   : > { %4430 = vmatprep.subr.mxu0 %v414_v28  ;;  %4463 = vmatprep.subr.mxu1 %v508_v32 }
  0x36   : > { %4431 = vmatpush3.msra.mxu0 %v414_v28  ;;  %4464 = vmatpush3.msra.mxu1 %v508_v32  ;;  %v4017_v28 = vld [vmem:[%s6755_s3 + $0x88] sm:$0xff] }
  0x37   : > { %4433 = vmatmul.mubr.f32.vlgmr.msra.gmra.mxu0 %v413_v30  ;;  %4465 = vmatprep.subr.mxu1 %v507_v33 }
  0x38   : > { %4466 = vmatpush3.msra.mxu1 %v507_v33  ;;  %648 = vmatprep.subr.mxu0 %v4013_v39 }
  0x39   : > { %889 = vmatprep.subr.mxu1 %v4032_v38  ;;  %649 = vmatpush1.msra.mxu0 %v4012_v41 }
  0x3a   : > { %650 = vmatprep.subr.mxu0 %v4011_v43  ;;  %688 = vmatprep.mubr.f32.mxu0 %v5199_v54 }
  0x3b   : > { %651 = vmatpush1.msra.mxu0 %v4010_v45  ;;  %954 = vrot.lane.b32.xlu0 %v953_v0, %s6766_s19 }
  0x3c   : > { %652 = vmatprep.subr.mxu0 %v4009_v47  ;;  %976 = vrot.lane.b32.xlu1 %v975_v1, %s6768_s20  ;;  %s5204_s20 = smov 80  }
  0x3d   : > { %653 = vmatpush1.msra.mxu0 %v4008_v49 }
  0x3e   : > { %654 = vmatprep.subr.mxu0 %v4007_v51 }
  0x3f   : > { %655 = vmatpush1.msra.mxu0 %v4006_v53  ;;  %964 = vrot.lane.b32.xlu0 %v963_v3, %s6772_s28 }
  0x40   : > { %721 = vmatprep.subr.mxu0 %v609_v55 }
  0xad   : > { %v955_v33 = vpop.permute.xlu0 %954 }
  0xae   : > { %v977_v51 = vpop.permute.xlu1 %976 }
  0xf7   : > { %v4434_v34 = vpop.f32.mrf.mxu0 }
  0xf8   : > { %v506_v37 = vmul.f32 %v4434_v34, %v4434_v34 }
  0xf9   : > { %v496_v35 = vpop.f32.mrf.mxu0 }
  0xfa   : > { %v505_v36 = vmul.f32 %v496_v35, %v496_v35 }
  0xfc   : > { %4467 = vmatprep.mubr.f32.mxu1 %v505_v36 }
  0xfd   : > { %4468 = vmatmul.mubr.f32.vlgmr.msra.gmra.mxu1 %v506_v37 }
  0xfe   : > { %890 = vmatpush1.msra.mxu1 %v4031_v40  ;;  %929 = vmatprep.mubr.f32.mxu1 %v5199_v54  ;;  %v944_v40 = vrot.slane %v5485_v56, 2 }
  0xff   : > { %891 = vmatprep.subr.mxu1 %v4030_v42  ;;  %v965_v42 = vpop.permute.xlu0 %964 }
 0x100   : > { %892 = vmatpush1.msra.mxu1 %v4029_v44 }
 0x101   : > { %893 = vmatprep.subr.mxu1 %v4028_v46 }
 0x102   : > { %894 = vmatpush1.msra.mxu1 %v4027_v48 }
 0x103   : > { %895 = vmatprep.subr.mxu1 %v4026_v50 }
 0x104   : > { %896 = vmatpush1.msra.mxu1 %v4025_v52 }
 0x105   : > { %4493 = vmatprep.subr.mxu1 %v5199_v54 }
 0x1bd   : > { %v4469_v5 = vpop.f32.mrf.mxu1 }
 0x1be   : > { %v595_v6 = vadd.f32 1e-05, %v4469_v5 }
 0x1bf   : > { %v589_v7 = vpop.f32.mrf.mxu1 }
 0x1c0   : > { %4981 = vlog2.f32 %v595_v6  ;;  %v590_v8 = vadd.f32 1e-05, %v589_v7 }
 0x1c2   : > { %4983 = vlog2.f32 %v590_v8 }
 0x1cd   : > { %v4982_v9 = vpop.eup %4981 }
 0x1ce   : > { %v601_v10 = vmul.f32 0.6931472, %v4982_v9 }
 0x1cf   : > { %v4984_v11 = vpop.eup %4983 }
 0x1d0   : > { %v862_v12 = vrot.slane %v601_v10, 4  ;;  %v599_v13 = vmul.f32 0.6931472, %v4984_v11 }
 0x1d2   : > { %v620_v14 = vrot.slane %v599_v13, 4  ;;  %4033 = vmatmul.mubr.msk.f32.vlgmr.msra.gmra.mxu1 %vm621_vm2, %v862_v12 }
 0x1d3   : > { %4503 = vmatprep.mubr.msk.f32.mxu1 %vm5203_vm4, %v5199_v54 }
 0x1d4   : > { %4014 = vmatmul.mubr.msk.f32.vlgmr.msra.gmra.mxu0 %vm621_vm2, %v620_v14 }
 0x1d5   : > { %722 = vmatpush1.msra.mxu0 %v608_v15  ;;  %761 = vmatprep.mubr.f32.mxu0 %v5199_v54 }
 0x1d6   : > { %723 = vmatprep.subr.mxu0 %v607_v16 }
 0x1d7   : > { %724 = vmatpush1.msra.mxu0 %v606_v17 }
 0x1d8   : > { %725 = vmatprep.subr.mxu0 %v605_v18 }
 0x1d9   : > { %726 = vmatpush1.msra.mxu0 %v604_v19 }
 0x1da   : > { %727 = vmatprep.subr.mxu0 %v603_v20 }
 0x1db   : > { %728 = vmatpush1.msra.mxu0 %v602_v21 }
 0x1dc   : > { %4015 = vmatmul.mubr.msk.f32.vlgmr.msra.gmra.mxu0 %vm621_vm2, %v599_v13  ;;  %804 = vmatprep.subr.mxu0 %v4023_v22 }
 0x1dd   : > { %805 = vmatpush1.msra.mxu0 %v4022_v23  ;;  %844 = vmatprep.mubr.f32.mxu0 %v5199_v54 }
 0x1de   : > { %806 = vmatprep.subr.mxu0 %v4021_v24 }
 0x1df   : > { %807 = vmatpush1.msra.mxu0 %v4020_v25 }
 0x1e0   : > { %808 = vmatprep.subr.mxu0 %v4019_v26 }
 0x1e1   : > { %809 = vmatpush1.msra.mxu0 %v4018_v27 }
 0x1e2   : > { %810 = vmatprep.subr.mxu0 %v4017_v28 }
 0x1e3   : > { %811 = vmatpush1.msra.mxu0 %v4016_v29 }
 0x1e4   : > { %4024 = vmatmul.mubr.msk.f32.vlgmr.msra.gmra.mxu0 %vm621_vm2, %v601_v10  ;;  %4470 = vmatprep.subr.mxu0 %v5199_v54 }
 0x1e5   : > { %4478 = vmatprep.mubr.msk.f32.mxu0 %vm5203_vm4, %v5199_v54 }
 0x292   : > { %v931_v36 = vpop.f32.mrf.mxu1 }
 0x294   : > { %v690_v30 = vpop.f32.mrf.mxu0  ;;  %v933_v45 = vpop.f32.mrf.mxu1 }
 0x296   : > { %v692_v31 = vpop.f32.mrf.mxu0 }
 0x29c   : > { %v763_v32 = vpop.f32.mrf.mxu0 }
 0x29d   : > { %v764_v35 = vadd.f32 %v763_v32, %v690_v30 }
 0x29e   : > { %v765_v34 = vpop.f32.mrf.mxu0 }
 0x29f   : > { %v766_v38 = vadd.f32 %v765_v34, %v692_v31 }
 0x2a4   : > { %v846_v37 = vpop.f32.mrf.mxu0 }
 0x2a5   : > { %v851_v39 = vadd.f32 %v846_v37, %v764_v35 }
 0x2a6   : > { %v848_v41 = vpop.f32.mrf.mxu0 }
 0x2a7   : > { %v936_v43 = vadd.f32 %v931_v36, %v851_v39  ;;  %v852_v44 = vadd.f32 %v848_v41, %v766_v38  ;;  %v1128_v38 = vld [vmem:[%s6758_s6 + $0x18] sm:$0xff]  ;;  %v1127_v39 = vld [vmem:[%s6758_s6 + $0x10] sm:$0xff]  ;;  %v1125_v41 = vld [vmem:[%s6758_s6] sm:$0xff] }
 0x2a8   : > { %4471 = vmatpush3.msra.mxu0 %v1128_v38 }
 0x2a9   : > { %v946_v46 = vadd.f32 %v944_v40, %v936_v43  ;;  %v937_v47 = vadd.f32 %v933_v45, %v852_v44  ;;  %v967_v48 = vadd.f32 %v965_v42, %v936_v43  ;;  %v957_v49 = vadd.f32 %v955_v33, %v936_v43  ;;  %4472 = vmatprep.subr.mxu0 %v5199_v54 }
 0x2aa   : > { %v979_v53 = vadd.f32 %v977_v51, %v936_v43  ;;  %4473 = vmatpush3.msra.mxu0 %v1127_v39 }
 0x2ab   : > { %948 = vst.msk [vmem:[#allocation2 + $0x2] sm:$0xf] %vm947_vm3, %v946_v46  ;;  %v986_v50 = vadd.f32 %v944_v40, %v937_v47  ;;  %969 = vrot.lane.b32.xlu0 %v967_v48, %s6772_s28  ;;  %959 = vrot.lane.b32.xlu1 %v957_v49, %s6780_s30  ;;  %v988_v52 = vadd.f32 %v955_v33, %v937_v47  ;;  %v1126_v40 = vld [vmem:[%s6758_s6 + $0x8] sm:$0xff] }
 0x2ac   : > { %v1000_v55 = vadd.f32 %v977_v51, %v937_v47  ;;  %v994_v56 = vadd.f32 %v965_v42, %v937_v47  ;;  %4474 = vmatprep.subr.mxu0 %v5199_v54 }
 0x2ad   : > { %987 = vst.msk [vmem:[#allocation2 + $0x14] sm:$0xf] %vm947_vm3, %v986_v50  ;;  %4475 = vmatpush3.msra.mxu0 %v1126_v40 }
 0x2ae   : > { %4476 = vmatprep.subr.mxu0 %v5199_v54 }
 0x2af   : > { %990 = vrot.lane.b32.xlu0 %v988_v52, %s6780_s30  ;;  %981 = vrot.lane.b32.xlu1 %v979_v53, %s6781_s29 }
 0x2b0   : > { %4477 = vmatpush3.msra.mxu0 %v1125_v41 }
 0x2b1   : > { %4518 = vmatprep.subr.mxu0 %v5199_v54 }
 0x2b3   : > { %1002 = vrot.lane.b32.xlu0 %v1000_v55, %s6781_s29  ;;  %996 = vrot.lane.b32.xlu1 %v994_v56, %s6772_s28 }
 0x31d   : > { %v970_v57 = vpop.permute.xlu0 %969  ;;  %v960_v59 = vpop.permute.xlu1 %959 }
 0x31e   : > { %972 = vst.msk [vmem:[#allocation2 + $0xa] sm:$0xf] %vm947_vm3, %v970_v57  ;;  %962 = vst.msk [vmem:[#allocation2 + $0x6] sm:$0xf] %vm947_vm3, %v960_v59  ;;  %v1109_v57 = vsub.s32 0, %v5497_v63 }
 0x31f   : > { %v5629_v59 = vld [vmem:[%s6757_s5] sm:$0x3f] }
 0x321   : > { %v991_v60 = vpop.permute.xlu0 %990  ;;  %v982_v61 = vpop.permute.xlu1 %981 }
 0x322   : > { %993 = vst.msk [vmem:[#allocation2 + $0x18] sm:$0xf] %vm947_vm3, %v991_v60  ;;  %984 = vst.msk [vmem:[#allocation2 + $0xe] sm:$0xf] %vm947_vm3, %v982_v61  ;;  %v1118_v61 = vsub.s32 1, %v5497_v63 }
 0x325   : > { %v1003_v62 = vpop.permute.xlu0 %1002  ;;  %v997_v0 = vpop.permute.xlu1 %996  ;;  %v1006_v1 = vld [vmem:[#allocation2] sm:$0xff] }
 0x326   : > { %1005 = vst.msk [vmem:[#allocation2 + $0x20] sm:$0xf] %vm947_vm3, %v1003_v62  ;;  %999 = vst.msk [vmem:[#allocation2 + $0x1c] sm:$0xf] %vm947_vm3, %v997_v0  ;;  %v1041_v3 = vsel %vm621_vm2, %v1006_v1, 0.0  ;;  %v1110_v62 = vrot.slane %v5629_v59, %v1109_v57 }
 0x327   : > { %1042 = vadd.xlane.f32.xlu1 %v1041_v3  ;;  %v1119_v3 = vrot.slane %v5629_v59, %v1118_v61 }
 0x329   : > { %v1007_v5 = vld [vmem:[#allocation2 + $0x8] sm:$0xff]  ;;  %v1008_v7 = vld [vmem:[#allocation2 + $0x10] sm:$0xff] }
 0x32a   : > { %v1044_v6 = vsel %vm621_vm2, %v1007_v5, 0.0  ;;  %v1047_v9 = vsel %vm621_vm2, %v1008_v7, 0.0 }
 0x32b   : > { %1045 = vadd.xlane.f32.xlu0 %v1044_v6 }
 0x32d   : > { %v1009_v8 = vld [vmem:[#allocation2 + $0x18] sm:$0xff]  ;;  %v1010_v11 = vld [vmem:[#allocation2 + $0x20] sm:$0xf] }
 0x32e   : > { %v1050_v10 = vsel %vm621_vm2, %v1009_v8, 0.0  ;;  %v1053_v12 = vsel %vm947_vm3, %v1010_v11, 0.0 }
 0x32f   : > { %1048 = vadd.xlane.f32.xlu0 %v1047_v9  ;;  %1051 = vadd.xlane.f32.xlu1 %v1050_v10 }
 0x333   : > { %1054 = vadd.xlane.f32.xlu0 %v1053_v12 }
 0x3b0   : > { %v1043_v13 = vpop.xlane.xlu1 %1042 }
 0x3b1   : > { %v1057_v14 = vmul.f32 0.03125, %v1043_v13 }
 0x3b3   : > { %v5580_v15 = vsub.f32 %v1006_v1, %v1057_v14 }
 0x3b4   : > { %v1046_v16 = vpop.xlane.xlu0 %1045 }
 0x3b5   : > { %v1058_v17 = vmul.f32 0.03125, %v1046_v16  ;;  %v1067_v18 = vmul.f32 %v5580_v15, %v5580_v15 }
 0x3b7   : > { %v5584_v19 = vsub.f32 %v1007_v5, %v1058_v17  ;;  %v1072_v20 = vsel %vm621_vm2, %v1067_v18, 0.0 }
 0x3b8   : > { %v1049_v21 = vpop.xlane.xlu0 %1048  ;;  %1073 = vadd.xlane.f32.xlu1 %v1072_v20  ;;  %v1052_v22 = vpop.xlane.xlu1 %1051 }
 0x3b9   : > { %v1059_v23 = vmul.f32 0.03125, %v1049_v21  ;;  %v1060_v24 = vmul.f32 0.03125, %v1052_v22  ;;  %v1068_v25 = vmul.f32 %v5584_v19, %v5584_v19 }
 0x3bb   : > { %v5589_v26 = vsub.f32 %v1008_v7, %v1059_v23  ;;  %v5591_v27 = vsub.f32 %v1009_v8, %v1060_v24  ;;  %v1075_v28 = vsel %vm621_vm2, %v1068_v25, 0.0 }
 0x3bc   : > { %1076 = vadd.xlane.f32.xlu0 %v1075_v28  ;;  %v1055_v29 = vpop.xlane.xlu0 %1054 }
 0x3bd   : > { %v1061_v30 = vmul.f32 0.03125, %v1055_v29  ;;  %v1069_v31 = vmul.f32 %v5589_v26, %v5589_v26  ;;  %v1070_v32 = vmul.f32 %v5591_v27, %v5591_v27  ;;  %v4034_v29 = vld [vmem:[%s6759_s7] ss:$0 sm:$0xff] }
 0x3bf   : > { %v5598_v33 = vsub.f32 %v1010_v11, %v1061_v30  ;;  %v1078_v34 = vsel %vm621_vm2, %v1069_v31, 0.0  ;;  %v1081_v35 = vsel %vm621_vm2, %v1070_v32, 0.0 }
 0x3c0   : > { %1079 = vadd.xlane.f32.xlu1 %v1078_v34  ;;  %1082 = vadd.xlane.f32.xlu0 %v1081_v35 }
 0x3c1   : > { %v1071_v36 = vmul.f32 %v5598_v33, %v5598_v33 }
 0x3c3   : > { %v1084_v37 = vsel %vm947_vm3, %v1071_v36, 0.0 }
 0x3c4   : > { %1085 = vadd.xlane.f32.xlu1 %v1084_v37 }
 0x441   : > { %v1074_v42 = vpop.xlane.xlu1 %1073 }
 0x442   : > { %v1087_v43 = vmul.f32 0.03125, %v1074_v42 }
 0x444   : > { %v1092_v44 = vadd.f32 1e-06, %v1087_v43 }
 0x445   : > { %v1077_v45 = vpop.xlane.xlu0 %1076 }
 0x446   : > { %4985 = vrsqrt.f32 %v1092_v44  ;;  %v1088_v46 = vmul.f32 0.03125, %v1077_v45 }
 0x448   : > { %v1093_v47 = vadd.f32 1e-06, %v1088_v46 }
 0x449   : > { %v1083_v48 = vpop.xlane.xlu0 %1082  ;;  %v1080_v49 = vpop.xlane.xlu1 %1079 }
 0x44a   : > { %4987 = vrsqrt.f32 %v1093_v47  ;;  %v1090_v50 = vmul.f32 0.03125, %v1083_v48  ;;  %v1089_v51 = vmul.f32 0.03125, %v1080_v49 }
 0x44c   : > { %v1095_v52 = vadd.f32 1e-06, %v1090_v50  ;;  %v1094_v53 = vadd.f32 1e-06, %v1089_v51 }
 0x44d   : > { %v1086_v55 = vpop.xlane.xlu1 %1085 }
 0x44e   : > { %4989 = vrsqrt.f32 %v1095_v52  ;;  %v1091_v56 = vmul.f32 0.03125, %v1086_v55 }
 0x44f   : > { %4991 = vrsqrt.f32 %v1094_v53 }
 0x450   : > { %v1096_v60 = vadd.f32 1e-06, %v1091_v56  ;;  %v1018_v56 = vand.u32 127, %v1011_v58 }
 0x452   : > { %4993 = vrsqrt.f32 %v1096_v60  ;;  %vm1024_vm7 = vcmp.ge.s32.totalorder %v1018_v56, 18 }
 0x453   : > { %v4986_v0 = vpop.eup %4985  ;;  %vm1030_vm9 = vmxor %vm1024_vm7, %vm5206_vm8 }
 0x454   : > { %v1102_v1 = vmul.f32 %v4986_v0, %v5580_v15  ;;  %vm1028_vm14 = vmxor %vm5206_vm8, %vm1024_vm7 }
 0x455   : > { %vm1033_vm15 = vmxor %vm1028_vm14, %vm5206_vm8 }
 0x456   : > { %v1111_v5 = vmul.f32 %v1110_v62, %v1102_v1 }
 0x457   : > { %v4988_v6 = vpop.eup %4987 }
 0x458   : > { %v1120_v7 = vadd.f32 %v1119_v3, %v1111_v5  ;;  %v1103_v8 = vmul.f32 %v4988_v6, %v5584_v19 }
 0x45a   : > { %4479 = vmatmul.mubr.msk.f32.vlgmr.msra.gmra.mxu0 %vm621_vm2, %v1120_v7  ;;  %v1112_v9 = vmul.f32 %v1110_v62, %v1103_v8 }
 0x45b   : > { %v4990_v10 = vpop.eup %4989  ;;  %4481 = vmatprep.mubr.msk.f32.mxu0 %vm5203_vm4, %v5199_v54 }
 0x45c   : > { %v4992_v11 = vpop.eup %4991  ;;  %v1121_v12 = vadd.f32 %v1119_v3, %v1112_v9  ;;  %v1105_v14 = vmul.f32 %v4990_v10, %v5591_v27 }
 0x45d   : > { %v1104_v13 = vmul.f32 %v4992_v11, %v5589_v26 }
 0x45e   : > { %4482 = vmatmul.mubr.msk.f32.gmra.mxu0 %vm621_vm2, %v1121_v12  ;;  %v1114_v18 = vmul.f32 %v1110_v62, %v1105_v14 }
 0x45f   : > { %v4994_v15 = vpop.eup %4993  ;;  %4484 = vmatprep.mubr.msk.f32.mxu0 %vm5203_vm4, %v5199_v54  ;;  %v1113_v16 = vmul.f32 %v1110_v62, %v1104_v13 }
 0x460   : > { %v1106_v19 = vmul.f32 %v4994_v15, %v5598_v33  ;;  %v1123_v20 = vadd.f32 %v1119_v3, %v1114_v18 }
 0x461   : > { %v1122_v17 = vadd.f32 %v1119_v3, %v1113_v16 }
 0x462   : > { %v1115_v21 = vmul.f32 %v1110_v62, %v1106_v19  ;;  %v5207_v62 = vmov -1e+30  }
 0x463   : > { %4485 = vmatmul.mubr.msk.f32.gmra.mxu0 %vm621_vm2, %v1122_v17  ;;  %v5763_v0 = vsel %vm1030_vm9, 0.0, %v5207_v62 }
 0x464   : > { %4487 = vmatprep.mubr.msk.f32.mxu0 %vm5203_vm4, %v5199_v54  ;;  %v1124_v22 = vadd.f32 %v1119_v3, %v1115_v21 }
 0x467   : > { %4488 = vmatmul.mubr.msk.f32.gmra.mxu0 %vm621_vm2, %v1123_v20 }
 0x468   : > { %4490 = vmatprep.mubr.msk.f32.mxu0 %vm5203_vm4, %v5199_v54 }
 0x46b   : > { %4491 = vmatmul.mubr.msk.f32.gmra.mxu0 %vm621_vm2, %v1124_v22 }
 0x46c   : > { %4528 = vmatprep.mubr.msk.f32.mxu0 %vm5203_vm4, %v5199_v54 }
 0x51a   : > { %v1217_v23 = vpop.f32.mrf.mxu0 }
 0x51b   : > { %v5673_v37 = vadd.f32 %v4034_v29, %v1217_v23 }
 0x51c   : > { %v4480_v24 = vpop.f32.mrf.mxu0 }
 0x51e   : > { %v1222_v25 = vpop.f32.mrf.mxu0 }
 0x51f   : > { %v5675_v38 = vadd.f32 %v4034_v29, %v1222_v25 }
 0x520   : > { %v4483_v26 = vpop.f32.mrf.mxu0 }
 0x523   : > { %v1227_v27 = vpop.f32.mrf.mxu0 }
 0x524   : > { %v5665_v34 = vadd.f32 %v4034_v29, %v1227_v27  ;;  %v1014_v27 = vadd.s32 16, %v5497_v63 }
 0x525   : > { %v4486_v28 = vpop.f32.mrf.mxu0 }
 0x526   : > { %vm1021_vm11 = vcmp.ge.s32.totalorder %v1014_v27, 18 }
 0x527   : > { %v1232_v30 = vpop.f32.mrf.mxu0  ;;  %vm1027_vm12 = vmxor %vm1021_vm11, %vm1024_vm7 }
 0x528   : > { %v5661_v31 = vadd.f32 %v4034_v29, %v1232_v30  ;;  %vm1032_vm13 = vmxor %vm1027_vm12, %vm5206_vm8 }
 0x529   : > { %v4489_v32 = vpop.f32.mrf.mxu0  ;;  %v5786_v30 = vsel %vm1032_vm13, 0.0, %v5207_v62 }
 0x52a   : > { %1256 = vrot.lane.b32.xlu1 %v5661_v31, %s6780_s30 }
 0x52b   : > { %v1237_v33 = vpop.f32.mrf.mxu0 }
 0x52c   : > { %v5667_v35 = vadd.f32 %v4034_v29, %v1237_v33 }
 0x52d   : > { %v4492_v36 = vpop.f32.mrf.mxu0 }
 0x52e   : > { %1254 = vrot.lane.b32.xlu1 %v5665_v34, %s6780_s30  ;;  %1258 = vrot.lane.b32.xlu0 %v5667_v35, %s6780_s30  ;;  %v5792_v36 = vsel %vm1033_vm15, 0.0, %v5207_v62 }
 0x532   : > { %1250 = vrot.lane.b32.xlu1 %v5673_v37, %s6780_s30  ;;  %1252 = vrot.lane.b32.xlu0 %v5675_v38, %s6780_s30 }
 0x536   : > { %1576 = vrot.lane.b32.xlu1 %v5661_v31, %s5204_s20  ;;  %1578 = vrot.lane.b32.xlu0 %v5667_v35, %s5204_s20 }
 0x53a   : > { %1572 = vrot.lane.b32.xlu1 %v5675_v38, %s5204_s20  ;;  %1574 = vrot.lane.b32.xlu0 %v5665_v34, %s5204_s20 }
 0x53e   : > { %1560 = vrot.lane.b32.xlu1 %v5673_v37, %s5205_s16  ;;  %1570 = vrot.lane.b32.xlu0 %v5673_v37, %s5204_s20 }
 0x542   : > { %1564 = vrot.lane.b32.xlu1 %v5665_v34, %s5205_s16  ;;  %1562 = vrot.lane.b32.xlu0 %v5675_v38, %s5205_s16 }
 0x546   : > { %1568 = vrot.lane.b32.xlu1 %v5667_v35, %s5205_s16  ;;  %1566 = vrot.lane.b32.xlu0 %v5661_v31, %s5205_s16 }
 0x54a   : > { %1446 = vrot.lane.b32.xlu0 %v5667_v35, %s6772_s28 }
 0x59c   : > { %v1257_v40 = vpop.permute.xlu1 %1256 }
 0x5a0   : > { %v1259_v39 = vpop.permute.xlu0 %1258  ;;  %v1255_v42 = vpop.permute.xlu1 %1254 }
 0x5a1   : > { %4494 = vmatpush3.xpose.msk.msra.mxu1 %vm1260_vm5, %v1259_v39 }
 0x5a2   : > { %4495 = vmatprep.subr.mxu1 %v5199_v54 }
 0x5a4   : > { %v1253_v41 = vpop.permute.xlu0 %1252  ;;  %v1251_v45 = vpop.permute.xlu1 %1250 }
 0x5a5   : > { %4496 = vmatpush3.xpose.msk.msra.mxu1 %vm1260_vm5, %v1257_v40 }
 0x5a6   : > { %4497 = vmatprep.subr.mxu1 %v5199_v54 }
 0x5a8   : > { %v1579_v43 = vpop.permute.xlu0 %1578  ;;  %v1577_v48 = vpop.permute.xlu1 %1576 }
 0x5a9   : > { %4498 = vmatpush3.xpose.msk.msra.mxu1 %vm1260_vm5, %v1255_v42 }
 0x5aa   : > { %4499 = vmatprep.subr.mxu1 %v5199_v54 }
 0x5ac   : > { %v1575_v44 = vpop.permute.xlu0 %1574  ;;  %v1573_v51 = vpop.permute.xlu1 %1572 }
 0x5ad   : > { %4500 = vmatpush3.xpose.msk.msra.mxu1 %vm1260_vm5, %v1253_v41 }
 0x5ae   : > { %4501 = vmatprep.subr.mxu1 %v5199_v54 }
 0x5b0   : > { %v1571_v46 = vpop.permute.xlu0 %1570  ;;  %v1561_v52 = vpop.permute.xlu1 %1560 }
 0x5b1   : > { %4502 = vmatpush3.xpose.msk.msra.mxu1 %vm1260_vm5, %v1251_v45 }
 0x5b2   : > { %4543 = vmatprep.subr.mxu1 %v5199_v54 }
 0x5b4   : > { %v1563_v47 = vpop.permute.xlu0 %1562  ;;  %4504 = vmatmul.mubr.msk.f32.vlgmr.msra.gmra.mxu1 %vm1260_vm5, %v5673_v37  ;;  %v1565_v53 = vpop.permute.xlu1 %1564 }
 0x5b5   : > { %4544 = vmatpush3.xpose.msk.msra.mxu1 %vm1260_vm5, %v1579_v43  ;;  %4506 = vmatprep.mubr.msk.f32.mxu1 %vm5203_vm4, %v5199_v54 }
 0x5b6   : > { %4545 = vmatprep.subr.mxu1 %v5199_v54 }
 0x5b8   : > { %v1567_v49 = vpop.permute.xlu0 %1566  ;;  %4507 = vmatmul.mubr.msk.f32.gmra.mxu1 %vm1260_vm5, %v5675_v38  ;;  %v1569_v55 = vpop.permute.xlu1 %1568 }
 0x5b9   : > { %4546 = vmatpush3.xpose.msk.msra.mxu1 %vm1260_vm5, %v1577_v48  ;;  %4509 = vmatprep.mubr.msk.f32.mxu1 %vm5203_vm4, %v5199_v54 }
 0x5ba   : > { %4547 = vmatprep.subr.mxu1 %v5199_v54 }
 0x5bc   : > { %v1447_v50 = vpop.permute.xlu0 %1446  ;;  %4510 = vmatmul.mubr.msk.f32.gmra.mxu1 %vm1260_vm5, %v5665_v34 }
 0x5bd   : > { %4519 = vmatpush3.msk.msra.mxu0 %vm1467_vm6, %v1447_v50  ;;  %4548 = vmatpush3.xpose.msk.msra.mxu1 %vm1260_vm5, %v1575_v44 }
 0x5be   : > { %4512 = vmatprep.mubr.msk.f32.mxu1 %vm5203_vm4, %v5199_v54  ;;  %4549 = vmatprep.subr.mxu1 %v5199_v54 }
 0x5bf   : > { %4520 = vmatprep.subr.mxu0 %v5199_v54 }
 0x5c0   : > { %4513 = vmatmul.mubr.msk.f32.gmra.mxu1 %vm1260_vm5, %v5661_v31 }
 0x5c1   : > { %4550 = vmatpush3.xpose.msk.msra.mxu1 %vm1260_vm5, %v1573_v51  ;;  %4515 = vmatprep.mubr.msk.f32.mxu1 %vm5203_vm4, %v5199_v54 }
 0x5c2   : > { %4551 = vmatprep.subr.mxu1 %v5199_v54 }
 0x5c4   : > { %4516 = vmatmul.mubr.msk.f32.gmra.mxu1 %vm1260_vm5, %v5667_v35 }
 0x5c5   : > { %4552 = vmatpush3.xpose.msk.msra.mxu1 %vm1260_vm5, %v1571_v46  ;;  %4553 = vmatprep.mubr.msk.f32.mxu1 %vm5203_vm4, %v5199_v54 }
 0x5c6   : > { %4593 = vmatprep.subr.mxu1 %v5199_v54 }
 0x5c8   : > { %4554 = vmatmul.mubr.msk.f32.vlgmr.msra.gmra.mxu1 %vm1260_vm5, %v1561_v52 }
 0x5c9   : > { %4556 = vmatprep.mubr.msk.f32.mxu1 %vm5203_vm4, %v5199_v54 }
 0x5cc   : > { %4557 = vmatmul.mubr.msk.f32.gmra.mxu1 %vm1260_vm5, %v1563_v47 }
 0x5cd   : > { %4559 = vmatprep.mubr.msk.f32.mxu1 %vm5203_vm4, %v5199_v54 }
 0x5d0   : > { %4560 = vmatmul.mubr.msk.f32.gmra.mxu1 %vm1260_vm5, %v1565_v53 }
 0x5d1   : > { %4562 = vmatprep.mubr.msk.f32.mxu1 %vm5203_vm4, %v5199_v54 }
 0x5d4   : > { %4563 = vmatmul.mubr.msk.f32.gmra.mxu1 %vm1260_vm5, %v1567_v49 }
 0x5d5   : > { %4565 = vmatprep.mubr.msk.f32.mxu1 %vm5203_vm4, %v5199_v54 }
 0x5d8   : > { %4566 = vmatmul.mubr.msk.f32.gmra.mxu1 %vm1260_vm5, %v1569_v55 }
 0x5d9   : > { %4597 = vmatprep.mubr.msk.f32.mxu1 %vm5203_vm4, %v5199_v54 }
 0x674   : > { %v1347_v60 = vpop.f32.mrf.mxu1 }
 0x675   : > { %v1371_v1 = vmul.f32 0.25, %v1347_v60 }
 0x676   : > { %v4505_v3 = vpop.f32.mrf.mxu1 }
 0x677   : > { %v5766_v5 = vadd.f32 %v1371_v1, %v5763_v0 }
 0x678   : > { %v1352_v6 = vpop.f32.mrf.mxu1 }
 0x679   : > { %v1372_v7 = vmul.f32 0.25, %v1352_v6  ;;  %v1382_v58 = vsel %vm1381_vm10, %v5766_v5, -inf }
 0x67a   : > { %1383 = vmax.xlane.f32.xlu0 %v1382_v58  ;;  %v4508_v8 = vpop.f32.mrf.mxu1 }
 0x67b   : > { %v5771_v9 = vadd.f32 %v1372_v7, %v5763_v0 }
 0x67c   : > { %v1357_v10 = vpop.f32.mrf.mxu1 }
 0x67d   : > { %v1385_v11 = vsel %vm1381_vm10, %v5771_v9, -inf  ;;  %v1373_v28 = vmul.f32 0.25, %v1357_v10 }
 0x67e   : > { %1386 = vmax.xlane.f32.xlu1 %v1385_v11  ;;  %v4511_v12 = vpop.f32.mrf.mxu1 }
 0x67f   : > { %v5790_v33 = vadd.f32 %v1373_v28, %v5786_v30 }
 0x680   : > { %v1362_v13 = vpop.f32.mrf.mxu1 }
 0x681   : > { %v1374_v32 = vmul.f32 0.25, %v1362_v13  ;;  %v1388_v41 = vsel %vm1381_vm10, %v5790_v33, -inf }
 0x682   : > { %v4514_v14 = vpop.f32.mrf.mxu1 }
 0x683   : > { %v5798_v42 = vadd.f32 %v1374_v32, %v5792_v36 }
 0x684   : > { %v1367_v15 = vpop.f32.mrf.mxu1 }
 0x685   : > { %v1375_v29 = vmul.f32 0.25, %v1367_v15  ;;  %v1391_v47 = vsel %vm1381_vm10, %v5798_v42, -inf }
 0x686   : > { %v4517_v16 = vpop.f32.mrf.mxu1 }
 0x687   : > { %v1380_v40 = vadd.f32 %v1375_v29, %v5792_v36 }
 0x688   : > { %v1666_v17 = vpop.f32.mrf.mxu1 }
 0x689   : > { %v1690_v43 = vmul.f32 0.25, %v1666_v17  ;;  %v1395_v45 = vsel %vm1394_vm0, %v1380_v40, -inf }
 0x68a   : > { %v4555_v18 = vpop.f32.mrf.mxu1 }
 0x68b   : > { %v1695_v50 = vadd.f32 %v1690_v43, %v5763_v0 }
 0x68c   : > { %v1671_v19 = vpop.f32.mrf.mxu1 }
 0x68d   : > { %v1691_v39 = vmul.f32 0.25, %v1671_v19  ;;  %v1700_v53 = vsel %vm1381_vm10, %v1695_v50, -inf }
 0x68e   : > { %v4558_v20 = vpop.f32.mrf.mxu1 }
 0x68f   : > { %1444 = vrot.lane.b32.xlu1 %v5661_v31, %s6772_s28  ;;  %v5802_v46 = vadd.f32 %v1691_v39, %v5763_v0 }
 0x690   : > { %1442 = vrot.lane.b32.xlu0 %v5665_v34, %s6772_s28  ;;  %v1676_v21 = vpop.f32.mrf.mxu1 }
 0x691   : > { %v1692_v48 = vmul.f32 0.25, %v1676_v21  ;;  %v1703_v49 = vsel %vm1381_vm10, %v5802_v46, -inf }
 0x692   : > { %v4561_v22 = vpop.f32.mrf.mxu1 }
 0x693   : > { %v1697_v56 = vadd.f32 %v1692_v48, %v5786_v30 }
 0x694   : > { %1440 = vrot.lane.b32.xlu0 %v5675_v38, %s6772_s28  ;;  %v1681_v23 = vpop.f32.mrf.mxu1 }
 0x695   : > { %v1693_v44 = vmul.f32 0.25, %v1681_v23  ;;  %v1706_v60 = vsel %vm1381_vm10, %v1697_v56, -inf }
 0x696   : > { %v4564_v24 = vpop.f32.mrf.mxu1 }
 0x697   : > { %v5810_v51 = vadd.f32 %v1693_v44, %v5792_v36 }
 0x698   : > { %v1686_v25 = vpop.f32.mrf.mxu1 }
 0x699   : > { %v1694_v52 = vmul.f32 0.25, %v1686_v25  ;;  %v1709_v55 = vsel %vm1381_vm10, %v5810_v51, -inf }
 0x69a   : > { %v4567_v26 = vpop.f32.mrf.mxu1 }
 0x69b   : > { %v5818_v62 = vadd.f32 %v1694_v52, %v5792_v36 }
 0x69d   : > { %v1712_v1 = vsel %vm1394_vm0, %v5818_v62, -inf }
 0x6b3   : > { %1389 = vmax.xlane.f32.xlu0 %v1388_v41  ;;  %1396 = vmax.xlane.f32.xlu1 %v1395_v45 }
 0x6b7   : > { %1392 = vmax.xlane.f32.xlu0 %v1391_v47  ;;  %1704 = vmax.xlane.f32.xlu1 %v1703_v49 }
 0x6bb   : > { %1701 = vmax.xlane.f32.xlu0 %v1700_v53  ;;  %1710 = vmax.xlane.f32.xlu1 %v1709_v55 }
 0x6bf   : > { %1707 = vmax.xlane.f32.xlu0 %v1706_v60 }
 0x6c3   : > { %1713 = vmax.xlane.f32.xlu0 %v1712_v1 }
 0x6d9   : > { %1438 = vrot.lane.b32.xlu0 %v5673_v37, %s6772_s28 }
 0x703   : > { %v1384_v3 = vpop.xlane.xlu0 %1383 }
 0x704   : > { %v1398_v6 = vsub.f32 %v5766_v5, %v1384_v3 }
 0x706   : > { %v1403_v7 = vmul.f32 1.442695, %v1398_v6 }
 0x707   : > { %v1387_v58 = vpop.xlane.xlu1 %1386  ;;  %v1443_v10 = vpop.permute.xlu0 %1442 }
 0x708   : > { %4995 = vpow2.f32 %v1403_v7  ;;  %v1399_v8 = vsub.f32 %v5771_v9, %v1387_v58 }
 0x70a   : > { %v1405_v11 = vmul.f32 1.442695, %v1399_v8 }
 0x70b   : > { %v1445_v12 = vpop.permute.xlu1 %1444  ;;  %v1441_v13 = vpop.permute.xlu0 %1440 }
 0x70c   : > { %4997 = vpow2.f32 %v1405_v11  ;;  %4521 = vmatpush3.msra.mxu0 %v1445_v12 }
 0x70d   : > { %4522 = vmatprep.subr.mxu0 %v5199_v54 }
 0x70e   : > { %4523 = vmatpush3.msra.mxu0 %v1443_v10 }
 0x70f   : > { %4524 = vmatprep.subr.mxu0 %v5199_v54 }
 0x710   : > { %4525 = vmatpush3.msra.mxu0 %v1441_v13 }
 0x711   : > { %4526 = vmatprep.subr.mxu0 %v5199_v54 }
 0x715   : > { %v5829_v5 = vpop.eup %4995 }
 0x716   : > { %v1413_v14 = vsel %vm1381_vm10, %v5829_v5, 0.0 }
 0x717   : > { %1414 = vadd.xlane.f32.xlu1 %v1413_v14 }
 0x719   : > { %v5833_v9 = vpop.eup %4997 }
 0x71a   : > { %v1416_v15 = vsel %vm1381_vm10, %v5833_v9, 0.0 }
 0x71b   : > { %1417 = vadd.xlane.f32.xlu0 %v1416_v15 }
 0x728   : > { %1761 = vrot.lane.b32.xlu1 %v5661_v31, %s6770_s18 }
 0x72c   : > { %1759 = vrot.lane.b32.xlu1 %v5665_v34, %s6770_s18 }
 0x731   : > { %1763 = vrot.lane.b32.xlu0 %v5667_v35, %s6770_s18 }
 0x73c   : > { %v1390_v16 = vpop.xlane.xlu0 %1389  ;;  %v1397_v17 = vpop.xlane.xlu1 %1396 }
 0x73d   : > { %v1400_v18 = vsub.f32 %v5790_v33, %v1390_v16  ;;  %v1402_v19 = vsub.f32 %v1380_v40, %v1397_v17 }
 0x73f   : > { %v1407_v20 = vmul.f32 1.442695, %v1400_v18  ;;  %v1411_v21 = vmul.f32 1.442695, %v1402_v19 }
 0x740   : > { %v1393_v22 = vpop.xlane.xlu0 %1392  ;;  %v1705_v23 = vpop.xlane.xlu1 %1704 }
 0x741   : > { %4999 = vpow2.f32 %v1407_v20  ;;  %v1401_v24 = vsub.f32 %v5798_v42, %v1393_v22  ;;  %v1716_v25 = vsub.f32 %v5802_v46, %v1705_v23 }
 0x742   : > { %5001 = vpow2.f32 %v1411_v21 }
 0x743   : > { %v1409_v31 = vmul.f32 1.442695, %v1401_v24  ;;  %v1722_v27 = vmul.f32 1.442695, %v1716_v25 }
 0x744   : > { %v1702_v34 = vpop.xlane.xlu0 %1701  ;;  %v1711_v26 = vpop.xlane.xlu1 %1710 }
 0x745   : > { %5003 = vpow2.f32 %v1409_v31  ;;  %v1715_v35 = vsub.f32 %v1695_v50, %v1702_v34  ;;  %v1718_v29 = vsub.f32 %v5810_v51, %v1711_v26 }
 0x747   : > { %v1720_v28 = vmul.f32 1.442695, %v1715_v35  ;;  %v1726_v39 = vmul.f32 1.442695, %v1718_v29  ;;  %v1241_v29 = vld [vmem:[%s6760_s8] sm:$0xff] }
 0x748   : > { %v1708_v32 = vpop.xlane.xlu0 %1707 }
 0x749   : > { %5005 = vpow2.f32 %v1720_v28  ;;  %v1717_v33 = vsub.f32 %v1697_v56, %v1708_v32  ;;  %v1244_v32 = vld [vmem:[%s6760_s8 + $0x18] sm:$0xff] }
 0x74a   : > { %5007 = vpow2.f32 %v1722_v27  ;;  %v1242_v27 = vld [vmem:[%s6760_s8 + $0x8] sm:$0xff]  ;;  %4594 = vmatpush3.msra.mxu1 %v1244_v32 }
 0x74b   : > { %v1724_v40 = vmul.f32 1.442695, %v1717_v33  ;;  %4595 = vmatprep.subr.mxu1 %v5199_v54 }
 0x74c   : > { %v1714_v41 = vpop.xlane.xlu0 %1713 }
 0x74d   : > { %5009 = vpow2.f32 %v1724_v40  ;;  %v1719_v42 = vsub.f32 %v5818_v62, %v1714_v41 }
 0x74e   : > { %v5848_v43 = vpop.eup %4999  ;;  %5011 = vpow2.f32 %v1726_v39 }
 0x74f   : > { %v1728_v44 = vmul.f32 1.442695, %v1719_v42  ;;  %v1419_v45 = vsel %vm1381_vm10, %v5848_v43, 0.0  ;;  %v5852_v46 = vpop.eup %5001 }
 0x750   : > { %1420 = vadd.xlane.f32.xlu1 %v1419_v45  ;;  %v1439_v47 = vpop.permute.xlu0 %1438  ;;  %v1425_v50 = vsel %vm1394_vm0, %v5852_v46, 0.0  ;;  %v1243_v45 = vld [vmem:[%s6760_s8 + $0x10] sm:$0xff] }
 0x751   : > { %4527 = vmatpush3.msra.mxu0 %v1439_v47  ;;  %5013 = vpow2.f32 %v1728_v44  ;;  %4596 = vmatpush3.msra.mxu1 %v1243_v45 }
 0x752   : > { %v5854_v48 = vpop.eup %5003  ;;  %4568 = vmatprep.subr.mxu0 %v5199_v54  ;;  %4631 = vmatprep.subr.mxu1 %v5199_v54 }
 0x753   : > { %v1422_v49 = vsel %vm1381_vm10, %v5854_v48, 0.0 }
 0x754   : > { %1423 = vadd.xlane.f32.xlu0 %v1422_v49  ;;  %1426 = vadd.xlane.f32.xlu1 %v1425_v50 }
 0x756   : > { %v5861_v51 = vpop.eup %5005 }
 0x757   : > { %v1730_v52 = vsel %vm1381_vm10, %v5861_v51, 0.0  ;;  %v5865_v53 = vpop.eup %5007 }
 0x758   : > { %1731 = vadd.xlane.f32.xlu1 %v1730_v52  ;;  %v1733_v60 = vsel %vm1381_vm10, %v5865_v53, 0.0 }
 0x75a   : > { %v5867_v55 = vpop.eup %5009 }
 0x75b   : > { %v1736_v56 = vsel %vm1381_vm10, %v5867_v55, 0.0  ;;  %v5873_v62 = vpop.eup %5011 }
 0x75c   : > { %1737 = vadd.xlane.f32.xlu0 %v1736_v56  ;;  %1734 = vadd.xlane.f32.xlu1 %v1733_v60  ;;  %v1739_v1 = vsel %vm1381_vm10, %v5873_v62, 0.0 }
 0x75e   : > { %v5877_v3 = vpop.eup %5013 }
 0x75f   : > { %v1742_v6 = vsel %vm1394_vm0, %v5877_v3, 0.0 }
 0x760   : > { %1740 = vadd.xlane.f32.xlu1 %v1739_v1 }
 0x764   : > { %1743 = vadd.xlane.f32.xlu1 %v1742_v6 }
 0x772   : > { %1757 = vrot.lane.b32.xlu0 %v5675_v38, %s6770_s18 }
 0x775   : > { %1755 = vrot.lane.b32.xlu1 %v5673_v37, %s6770_s18  ;;  %s4174_s18 = sshll.u32 %s5296_s25, 5 }
 0x776   : > { %s3938_s19 = scalar_lea.hbm %s6764_s12, %s4174_s18 }
 0x7a0   : > { %v1415_v7 = vpop.xlane.xlu1 %1414 }
 0x7a1   : > { %5015 = vrcp.f32 %v1415_v7 }
 0x7a4   : > { %v1418_v58 = vpop.xlane.xlu0 %1417  ;;  %v1762_v11 = vpop.permute.xlu1 %1761 }
 0x7a5   : > { %5017 = vrcp.f32 %v1418_v58 }
 0x7a8   : > { %v1764_v12 = vpop.permute.xlu0 %1763  ;;  %v1760_v38 = vpop.permute.xlu1 %1759 }
 0x7ae   : > { %v5016_v8 = vpop.eup %5015 }
 0x7af   : > { %v1433_v10 = vmul.f32 %v5016_v8, %v5829_v5 }
 0x7b1   : > { %4529 = vmatmul.mubr.msk.f32.vlgmr.msra.gmra.mxu0 %vm1381_vm10, %v1433_v10 }
 0x7b2   : > { %v5018_v13 = vpop.eup %5017  ;;  %4569 = vmatpush3.msk.msra.mxu0 %vm1467_vm6, %v1764_v12  ;;  %4531 = vmatprep.mubr.msk.f32.mxu0 %vm5203_vm4, %v5199_v54 }
 0x7b3   : > { %4570 = vmatprep.subr.mxu0 %v5199_v54  ;;  %v1434_v37 = vmul.f32 %v5018_v13, %v5833_v9 }
 0x7b4   : > { %4571 = vmatpush3.msra.mxu0 %v1762_v11 }
 0x7b5   : > { %4572 = vmatprep.subr.mxu0 %v5199_v54  ;;  %4532 = vmatmul.mubr.msk.f32.gmra.mxu0 %vm1381_vm10, %v1434_v37 }
 0x7b6   : > { %4573 = vmatpush3.msra.mxu0 %v1760_v38  ;;  %4534 = vmatprep.mubr.msk.f32.mxu0 %vm5203_vm4, %v5199_v54 }
 0x7b7   : > { %4574 = vmatprep.subr.mxu0 %v5199_v54 }
 0x7d9   : > { %v1421_v5 = vpop.xlane.xlu1 %1420 }
 0x7da   : > { %5019 = vrcp.f32 %v1421_v5 }
 0x7dd   : > { %v1424_v14 = vpop.xlane.xlu0 %1423  ;;  %v1427_v15 = vpop.xlane.xlu1 %1426 }
 0x7de   : > { %5021 = vrcp.f32 %v1424_v14 }
 0x7df   : > { %5023 = vrcp.f32 %v1427_v15 }
 0x7e1   : > { %v1732_v16 = vpop.xlane.xlu1 %1731 }
 0x7e2   : > { %5025 = vrcp.f32 %v1732_v16 }
 0x7e5   : > { %v1738_v9 = vpop.xlane.xlu0 %1737  ;;  %v1735_v17 = vpop.xlane.xlu1 %1734 }
 0x7e6   : > { %5027 = vrcp.f32 %v1735_v17  ;;  %v5978_v17 = vsub.s32 2, %v5497_v63 }
 0x7e7   : > { %v5020_v18 = vpop.eup %5019  ;;  %5029 = vrcp.f32 %v1738_v9 }
 0x7e8   : > { %v1435_v19 = vmul.f32 %v5020_v18, %v5848_v43 }
 0x7e9   : > { %v1758_v20 = vpop.permute.xlu0 %1757  ;;  %v1741_v21 = vpop.xlane.xlu1 %1740 }
 0x7ea   : > { %4535 = vmatmul.mubr.msk.f32.gmra.mxu0 %vm1381_vm10, %v1435_v19  ;;  %5031 = vrcp.f32 %v1741_v21  ;;  %v2094_v21 = vrot.slane %v5629_v59, %v5978_v17  ;;  %v5131_v59 = vld [vmem:[#allocation2 + $0x10] sm:$0xff] }
 0x7eb   : > { %v5022_v22 = vpop.eup %5021  ;;  %4575 = vmatpush3.msra.mxu0 %v1758_v20  ;;  %4537 = vmatprep.mubr.msk.f32.mxu0 %vm5203_vm4, %v5199_v54 }
 0x7ec   : > { %v1436_v23 = vmul.f32 %v5022_v22, %v5854_v48  ;;  %4576 = vmatprep.subr.mxu0 %v5199_v54  ;;  %v5024_v24 = vpop.eup %5023 }
 0x7ed   : > { %v1744_v31 = vpop.xlane.xlu1 %1743  ;;  %v1437_v25 = vmul.f32 %v5024_v24, %v5852_v46 }
 0x7ee   : > { %4538 = vmatmul.mubr.msk.f32.gmra.mxu0 %vm1381_vm10, %v1436_v23  ;;  %5033 = vrcp.f32 %v1744_v31  ;;  %v5129_v23 = vld [vmem:[#allocation2] sm:$0xff] }
 0x7ef   : > { %4540 = vmatprep.mubr.msk.f32.mxu0 %vm5203_vm4, %v5199_v54  ;;  %v5026_v34 = vpop.eup %5025 }
 0x7f0   : > { %v1750_v35 = vmul.f32 %v5026_v34, %v5861_v51 }
 0x7f1   : > { %v1756_v26 = vpop.permute.xlu1 %1755 }
 0x7f2   : > { %4541 = vmatmul.mubr.msk.f32.gmra.mxu0 %vm1381_vm10, %v1437_v25 }
 0x7f3   : > { %4577 = vmatpush3.msra.mxu0 %v1756_v26  ;;  %4578 = vmatprep.mubr.msk.f32.mxu0 %vm5203_vm4, %v5199_v54  ;;  %v5028_v28 = vpop.eup %5027 }
 0x7f4   : > { %4612 = vmatprep.subr.mxu0 %v5199_v54  ;;  %v1751_v33 = vmul.f32 %v5028_v28, %v5865_v53  ;;  %v5030_v39 = vpop.eup %5029 }
 0x7f5   : > { %v1752_v40 = vmul.f32 %v5030_v39, %v5867_v55 }
 0x7f6   : > { %4579 = vmatmul.mubr.msk.f32.vlgmr.msra.gmra.mxu0 %vm1381_vm10, %v1750_v35  ;;  %v5130_v35 = vld [vmem:[#allocation2 + $0x8] sm:$0xff] }
 0x7f7   : > { %4581 = vmatprep.mubr.msk.f32.mxu0 %vm5203_vm4, %v5199_v54  ;;  %4613 = vmatpush3.msra.mxu0 %v1242_v27  ;;  %v5032_v41 = vpop.eup %5031 }
 0x7f8   : > { %4614 = vmatprep.subr.mxu0 %v5199_v54  ;;  %v1753_v42 = vmul.f32 %v5032_v41, %v5873_v62 }
 0x7f9   : > { %4615 = vmatpush3.msra.mxu0 %v1241_v29 }
 0x7fa   : > { %4582 = vmatmul.mubr.msk.f32.gmra.mxu0 %vm1381_vm10, %v1751_v33  ;;  %4654 = vmatprep.subr.mxu0 %v5199_v54 }
 0x7fb   : > { %4584 = vmatprep.mubr.msk.f32.mxu0 %vm5203_vm4, %v5199_v54  ;;  %v5034_v43 = vpop.eup %5033 }
 0x7fc   : > { %v1754_v44 = vmul.f32 %v5034_v43, %v5877_v3 }
 0x7fe   : > { %4585 = vmatmul.mubr.msk.f32.gmra.mxu0 %vm1381_vm10, %v1752_v40 }
 0x7ff   : > { %4587 = vmatprep.mubr.msk.f32.mxu0 %vm5203_vm4, %v5199_v54 }
 0x802   : > { %4588 = vmatmul.mubr.msk.f32.gmra.mxu0 %vm1381_vm10, %v1753_v42 }
 0x803   : > { %4590 = vmatprep.mubr.msk.f32.mxu0 %vm5203_vm4, %v5199_v54 }
 0x806   : > { %4591 = vmatmul.mubr.msk.f32.gmra.mxu0 %vm1381_vm10, %v1754_v44 }
 0x807   : > { %4616 = vmatprep.mubr.msk.f32.mxu0 %vm5203_vm4, %v5199_v54 }
 0x871   : > { %v1536_v46 = vpop.f32.mrf.mxu0 }
 0x872   : > { %4617 = vmatmul.mubr.msk.f32.vlgmr.msra.gmra.mxu0 %vm1260_vm5, %v1536_v46  ;;  %v5132_v46 = vld [vmem:[#allocation2 + $0x18] sm:$0xff] }
 0x873   : > { %v4530_v47 = vpop.f32.mrf.mxu0  ;;  %4619 = vmatprep.mubr.msk.f32.mxu0 %vm5203_vm4, %v5199_v54 }
 0x875   : > { %v1541_v48 = vpop.f32.mrf.mxu0 }
 0x876   : > { %4620 = vmatmul.mubr.msk.f32.gmra.mxu0 %vm1260_vm5, %v1541_v48 }
 0x877   : > { %v4533_v49 = vpop.f32.mrf.mxu0  ;;  %4622 = vmatprep.mubr.msk.f32.mxu0 %vm5203_vm4, %v5199_v54 }
 0x8aa   : > { %v1546_v50 = vpop.f32.mrf.mxu0 }
 0x8ab   : > { %4623 = vmatmul.mubr.msk.f32.gmra.mxu0 %vm1260_vm5, %v1546_v50 }
 0x8ac   : > { %v4536_v51 = vpop.f32.mrf.mxu0  ;;  %4625 = vmatprep.mubr.msk.f32.mxu0 %vm5203_vm4, %v5199_v54 }
 0x8ae   : > { %v1551_v52 = vpop.f32.mrf.mxu0 }
 0x8af   : > { %4626 = vmatmul.mubr.msk.f32.gmra.mxu0 %vm1260_vm5, %v1551_v52 }
 0x8b0   : > { %v4539_v53 = vpop.f32.mrf.mxu0  ;;  %4628 = vmatprep.mubr.msk.f32.mxu0 %vm5203_vm4, %v5199_v54 }
 0x8b1   : > { %v5133_v53 = vld [vmem:[#allocation2 + $0x20] sm:$0xf] }
 0x8b2   : > { %v1556_v55 = vpop.f32.mrf.mxu0 }
 0x8b3   : > { %4629 = vmatmul.mubr.msk.f32.gmra.mxu0 %vm1260_vm5, %v1556_v55 }
 0x8b4   : > { %v4542_v56 = vpop.f32.mrf.mxu0  ;;  %4686 = vmatprep.mubr.msk.f32.mxu0 %vm5203_vm4, %v5199_v54 }
 0x8b6   : > { %v1852_v60 = vpop.f32.mrf.mxu0 }
 0x8b7   : > { %4598 = vmatmul.mubr.msk.f32.vlgmr.msra.gmra.mxu1 %vm1260_vm5, %v1852_v60 }
 0x8b8   : > { %v4580_v62 = vpop.f32.mrf.mxu0  ;;  %4600 = vmatprep.mubr.msk.f32.mxu1 %vm5203_vm4, %v5199_v54 }
 0x8ba   : > { %v1857_v1 = vpop.f32.mrf.mxu0 }
 0x8bb   : > { %4601 = vmatmul.mubr.msk.f32.gmra.mxu1 %vm1260_vm5, %v1857_v1 }
 0x8bc   : > { %v4583_v3 = vpop.f32.mrf.mxu0  ;;  %4603 = vmatprep.mubr.msk.f32.mxu1 %vm5203_vm4, %v5199_v54 }
 0x8be   : > { %v1862_v6 = vpop.f32.mrf.mxu0 }
 0x8bf   : > { %4604 = vmatmul.mubr.msk.f32.gmra.mxu1 %vm1260_vm5, %v1862_v6 }
 0x8c0   : > { %v4586_v7 = vpop.f32.mrf.mxu0  ;;  %4606 = vmatprep.mubr.msk.f32.mxu1 %vm5203_vm4, %v5199_v54 }
 0x8c2   : > { %v1867_v58 = vpop.f32.mrf.mxu0 }
 0x8c3   : > { %4607 = vmatmul.mubr.msk.f32.gmra.mxu1 %vm1260_vm5, %v1867_v58 }
 0x8c4   : > { %v4589_v8 = vpop.f32.mrf.mxu0  ;;  %4609 = vmatprep.mubr.msk.f32.mxu1 %vm5203_vm4, %v5199_v54 }
 0x8c6   : > { %v1872_v10 = vpop.f32.mrf.mxu0 }
 0x8c7   : > { %4610 = vmatmul.mubr.msk.f32.gmra.mxu1 %vm1260_vm5, %v1872_v10 }
 0x8c8   : > { %v4592_v11 = vpop.f32.mrf.mxu0  ;;  %4639 = vmatprep.mubr.msk.f32.mxu1 %vm5203_vm4, %v5199_v54 }
 0x932   : > { %v2062_v12 = vpop.f32.mrf.mxu0 }
 0x934   : > { %v4618_v13 = vpop.f32.mrf.mxu0 }
 0x936   : > { %v2067_v37 = vpop.f32.mrf.mxu0 }
 0x938   : > { %v4621_v38 = vpop.f32.mrf.mxu0 }
 0x96b   : > { %v2072_v5 = vpop.f32.mrf.mxu0 }
 0x96d   : > { %v4624_v14 = vpop.f32.mrf.mxu0 }
 0x96f   : > { %v2077_v15 = vpop.f32.mrf.mxu0 }
 0x971   : > { %v4627_v16 = vpop.f32.mrf.mxu0 }
 0x973   : > { %v2082_v9 = vpop.f32.mrf.mxu0 }
 0x975   : > { %v4630_v18 = vpop.f32.mrf.mxu0 }
 0x977   : > { %v1957_v19 = vpop.f32.mrf.mxu1 }
 0x978   : > { %v2063_v20 = vadd.f32 %v2062_v12, %v1957_v19 }
 0x979   : > { %v4599_v22 = vpop.f32.mrf.mxu1 }
 0x97a   : > { %v2086_v24 = vadd.f32 %v5129_v23, %v2063_v20 }
 0x97b   : > { %v1962_v31 = vpop.f32.mrf.mxu1 }
 0x97c   : > { %v5982_v25 = vadd.f32 %v2094_v21, %v2086_v24  ;;  %v2068_v34 = vadd.f32 %v2067_v37, %v1962_v31 }
 0x97d   : > { %v4602_v26 = vpop.f32.mrf.mxu1 }
 0x97e   : > { %v2087_v27 = vadd.f32 %v5130_v35, %v2068_v34  ;;  %v2100_v28 = vsel %vm621_vm2, %v5982_v25, 0.0  ;;  %v2186_v34 = vld [vmem:[%s6761_s9 + $0x18] sm:$0xff]  ;;  %v2185_v26 = vld [vmem:[%s6761_s9 + $0x10] sm:$0xff]  ;;  %v2184_v35 = vld [vmem:[%s6761_s9 + $0x8] sm:$0xff] }
 0x97f   : > { %v1967_v29 = vpop.f32.mrf.mxu1  ;;  %2101 = vadd.xlane.f32.xlu0 %v2100_v28  ;;  %4632 = vmatpush3.msra.mxu1 %v2186_v34  ;;  %v2353_v34 = vld [vmem:[%s6763_s11 + $0x48] sm:$0xff] }
 0x980   : > { %v5986_v32 = vadd.f32 %v2094_v21, %v2087_v27  ;;  %v2073_v33 = vadd.f32 %v2072_v5, %v1967_v29  ;;  %4633 = vmatprep.subr.mxu1 %v5199_v54  ;;  %v2183_v27 = vld [vmem:[%s6761_s9] sm:$0xff] }
 0x981   : > { %v4605_v39 = vpop.f32.mrf.mxu1  ;;  %4634 = vmatpush3.msra.mxu1 %v2185_v26  ;;  %v2352_v26 = vld [vmem:[%s6763_s11 + $0x40] sm:$0xff] }
 0x982   : > { %v2088_v40 = vadd.f32 %v5131_v59, %v2073_v33  ;;  %v2103_v41 = vsel %vm621_vm2, %v5986_v32, 0.0  ;;  %4635 = vmatprep.subr.mxu1 %v5199_v54 }
 0x983   : > { %v1972_v42 = vpop.f32.mrf.mxu1  ;;  %2104 = vadd.xlane.f32.xlu1 %v2103_v41  ;;  %4636 = vmatpush3.msra.mxu1 %v2184_v35  ;;  %v2351_v35 = vld [vmem:[%s6763_s11 + $0x38] sm:$0xff] }
 0x984   : > { %v5990_v43 = vadd.f32 %v2094_v21, %v2088_v40  ;;  %v2078_v44 = vadd.f32 %v2077_v15, %v1972_v42  ;;  %4637 = vmatprep.subr.mxu1 %v5199_v54 }
 0x985   : > { %v4608_v45 = vpop.f32.mrf.mxu1  ;;  %4638 = vmatpush3.msra.mxu1 %v2183_v27  ;;  %v2350_v27 = vld [vmem:[%s6763_s11 + $0x30] sm:$0xff] }
 0x986   : > { %v2089_v47 = vadd.f32 %v5132_v46, %v2078_v44  ;;  %v2106_v48 = vsel %vm621_vm2, %v5990_v43, 0.0  ;;  %4701 = vmatprep.subr.mxu1 %v5199_v54 }
 0x987   : > { %v1977_v49 = vpop.f32.mrf.mxu1  ;;  %2107 = vadd.xlane.f32.xlu0 %v2106_v48  ;;  %v2176_v48 = vsub.s32 4, %v5497_v63 }
 0x988   : > { %v5994_v50 = vadd.f32 %v2094_v21, %v2089_v47  ;;  %v2083_v51 = vadd.f32 %v2082_v9, %v1977_v49 }
 0x989   : > { %v4611_v52 = vpop.f32.mrf.mxu1 }
 0x98a   : > { %v2090_v55 = vadd.f32 %v5133_v53, %v2083_v51  ;;  %v2109_v56 = vsel %vm621_vm2, %v5994_v50, 0.0  ;;  %v6048_v51 = vld [vmem:[%s6757_s5] sm:$0x3f] }
 0x98b   : > { %2110 = vadd.xlane.f32.xlu0 %v2109_v56  ;;  %v2168_v52 = vrot.slane %v6048_v51, %v5501_v2 }
 0x98c   : > { %v5998_v60 = vadd.f32 %v2094_v21, %v2090_v55 }
 0x98e   : > { %v2112_v62 = vsel %vm947_vm3, %v5998_v60, 0.0 }
 0x98f   : > { %2113 = vadd.xlane.f32.xlu1 %v2112_v62 }
 0xa08   : > { %v2102_v1 = vpop.xlane.xlu0 %2101 }
 0xa09   : > { %v2115_v3 = vmul.f32 0.03125, %v2102_v1  ;;  %v2177_v1 = vrot.slane %v6048_v51, %v2176_v48 }
 0xa0b   : > { %v2120_v6 = vsub.f32 %v5982_v25, %v2115_v3 }
 0xa0c   : > { %v2105_v7 = vpop.xlane.xlu1 %2104 }
 0xa0d   : > { %v2116_v58 = vmul.f32 0.03125, %v2105_v7  ;;  %v2125_v8 = vmul.f32 %v2120_v6, %v2120_v6 }
 0xa0f   : > { %v6004_v10 = vsub.f32 %v5986_v32, %v2116_v58  ;;  %v2130_v11 = vsel %vm621_vm2, %v2125_v8, 0.0 }
 0xa10   : > { %v2108_v12 = vpop.xlane.xlu0 %2107  ;;  %2131 = vadd.xlane.f32.xlu0 %v2130_v11 }
 0xa11   : > { %v2117_v13 = vmul.f32 0.03125, %v2108_v12  ;;  %v2126_v37 = vmul.f32 %v6004_v10, %v6004_v10 }
 0xa13   : > { %v6010_v38 = vsub.f32 %v5990_v43, %v2117_v13  ;;  %v2133_v5 = vsel %vm621_vm2, %v2126_v37, 0.0 }
 0xa14   : > { %v2111_v14 = vpop.xlane.xlu0 %2110  ;;  %2134 = vadd.xlane.f32.xlu1 %v2133_v5 }
 0xa15   : > { %v2118_v15 = vmul.f32 0.03125, %v2111_v14  ;;  %v2127_v16 = vmul.f32 %v6010_v38, %v6010_v38 }
 0xa17   : > { %v6016_v9 = vsub.f32 %v5994_v50, %v2118_v15  ;;  %v2136_v18 = vsel %vm621_vm2, %v2127_v16, 0.0 }
 0xa18   : > { %2137 = vadd.xlane.f32.xlu0 %v2136_v18  ;;  %v2114_v19 = vpop.xlane.xlu1 %2113 }
 0xa19   : > { %v2119_v20 = vmul.f32 0.03125, %v2114_v19  ;;  %v2128_v21 = vmul.f32 %v6016_v9, %v6016_v9 }
 0xa1b   : > { %v6022_v22 = vsub.f32 %v5998_v60, %v2119_v20  ;;  %v2139_v23 = vsel %vm621_vm2, %v2128_v21, 0.0  ;;  %v2358_v21 = vld [vmem:[%s6763_s11 + $0x70] sm:$0xff] }
 0xa1c   : > { %2140 = vadd.xlane.f32.xlu1 %v2139_v23  ;;  %v2356_v23 = vld [vmem:[%s6763_s11 + $0x60] sm:$0xff] }
 0xa1d   : > { %v2129_v24 = vmul.f32 %v6022_v22, %v6022_v22 }
 0xa1f   : > { %v2142_v31 = vsel %vm947_vm3, %v2129_v24, 0.0  ;;  %v2355_v24 = vld [vmem:[%s6763_s11 + $0x58] sm:$0xff] }
 0xa20   : > { %2143 = vadd.xlane.f32.xlu0 %v2142_v31  ;;  %v2354_v31 = vld [vmem:[%s6763_s11 + $0x50] sm:$0xff] }
 0xa99   : > { %v2132_v28 = vpop.xlane.xlu0 %2131 }
 0xa9a   : > { %v2145_v29 = vmul.f32 0.03125, %v2132_v28  ;;  %v2349_v28 = vld [vmem:[%s6763_s11 + $0x28] sm:$0xff] }
 0xa9c   : > { %v2150_v33 = vadd.f32 1e-06, %v2145_v29  ;;  %v2348_v29 = vld [vmem:[%s6763_s11 + $0x20] sm:$0xff] }
 0xa9d   : > { %v2135_v39 = vpop.xlane.xlu1 %2134 }
 0xa9e   : > { %5035 = vrsqrt.f32 %v2150_v33  ;;  %v2146_v59 = vmul.f32 0.03125, %v2135_v39  ;;  %v2347_v33 = vld [vmem:[%s6763_s11 + $0x18] sm:$0xff]  ;;  %v2346_v39 = vld [vmem:[%s6763_s11 + $0x10] sm:$0xff] }
 0xaa0   : > { %v2151_v40 = vadd.f32 1e-06, %v2146_v59  ;;  %v2345_v59 = vld [vmem:[%s6763_s11 + $0x8] sm:$0xff] }
 0xaa1   : > { %v2138_v41 = vpop.xlane.xlu0 %2137 }
 0xaa2   : > { %5037 = vrsqrt.f32 %v2151_v40  ;;  %v2147_v42 = vmul.f32 0.03125, %v2138_v41  ;;  %v2344_v40 = vld [vmem:[%s6763_s11] sm:$0xff] }
 0xaa3   : > { %v4082_v41 = vld [vmem:[%s6762_s10] ss:$0 sm:$0xff] }
 0xaa4   : > { %v2152_v44 = vadd.f32 1e-06, %v2147_v42 }
 0xaa5   : > { %v2141_v45 = vpop.xlane.xlu1 %2140 }
 0xaa6   : > { %5039 = vrsqrt.f32 %v2152_v44  ;;  %v2148_v46 = vmul.f32 0.03125, %v2141_v45 }
 0xaa8   : > { %v2153_v47 = vadd.f32 1e-06, %v2148_v46 }
 0xaa9   : > { %v2144_v49 = vpop.xlane.xlu0 %2143 }
 0xaaa   : > { %5041 = vrsqrt.f32 %v2153_v47  ;;  %v2149_v53 = vmul.f32 0.03125, %v2144_v49 }
 0xaab   : > { %v5036_v55 = vpop.eup %5035 }
 0xaac   : > { %v2160_v56 = vmul.f32 %v5036_v55, %v2120_v6  ;;  %v2154_v62 = vadd.f32 1e-06, %v2149_v53 }
 0xaae   : > { %v2169_v3 = vmul.f32 %v2168_v52, %v2160_v56  ;;  %5043 = vrsqrt.f32 %v2154_v62 }
 0xaaf   : > { %v5038_v7 = vpop.eup %5037 }
 0xab0   : > { %v2178_v58 = vadd.f32 %v2177_v1, %v2169_v3  ;;  %v2161_v8 = vmul.f32 %v5038_v7, %v6004_v10 }
 0xab2   : > { %4640 = vmatmul.mubr.msk.f32.vlgmr.msra.gmra.mxu1 %vm621_vm2, %v2178_v58  ;;  %v2170_v11 = vmul.f32 %v2168_v52, %v2161_v8 }
 0xab3   : > { %v5040_v12 = vpop.eup %5039  ;;  %4642 = vmatprep.mubr.msk.f32.mxu1 %vm5203_vm4, %v5199_v54 }
 0xab4   : > { %v2179_v13 = vadd.f32 %v2177_v1, %v2170_v11  ;;  %v2162_v6 = vmul.f32 %v5040_v12, %v6010_v38 }
 0xab6   : > { %4643 = vmatmul.mubr.msk.f32.gmra.mxu1 %vm621_vm2, %v2179_v13  ;;  %v2171_v37 = vmul.f32 %v2168_v52, %v2162_v6 }
 0xab7   : > { %v5042_v5 = vpop.eup %5041  ;;  %4645 = vmatprep.mubr.msk.f32.mxu1 %vm5203_vm4, %v5199_v54 }
 0xab8   : > { %v2180_v14 = vadd.f32 %v2177_v1, %v2171_v37  ;;  %v2163_v10 = vmul.f32 %v5042_v5, %v6016_v9  ;;  %v2359_v9 = vld [vmem:[%s6763_s11 + $0x78] sm:$0xff] }
 0xab9   : > { %4655 = vmatpush3.msra.mxu0 %v2359_v9 }
 0xaba   : > { %4646 = vmatmul.mubr.msk.f32.gmra.mxu1 %vm621_vm2, %v2180_v14  ;;  %v2172_v15 = vmul.f32 %v2168_v52, %v2163_v10  ;;  %4656 = vmatprep.subr.mxu0 %v5199_v54 }
 0xabb   : > { %v5044_v16 = vpop.eup %5043  ;;  %4648 = vmatprep.mubr.msk.f32.mxu1 %vm5203_vm4, %v5199_v54  ;;  %4657 = vmatpush3.msra.mxu0 %v2358_v21 }
 0xabc   : > { %v2181_v18 = vadd.f32 %v2177_v1, %v2172_v15  ;;  %v2164_v38 = vmul.f32 %v5044_v16, %v6022_v22  ;;  %4658 = vmatprep.subr.mxu0 %v5199_v54  ;;  %v2357_v22 = vld [vmem:[%s6763_s11 + $0x68] sm:$0xff] }
 0xabd   : > { %4659 = vmatpush3.msra.mxu0 %v2357_v22 }
 0xabe   : > { %4649 = vmatmul.mubr.msk.f32.gmra.mxu1 %vm621_vm2, %v2181_v18  ;;  %v2173_v19 = vmul.f32 %v2168_v52, %v2164_v38  ;;  %4660 = vmatprep.subr.mxu0 %v5199_v54 }
 0xabf   : > { %4651 = vmatprep.mubr.msk.f32.mxu1 %vm5203_vm4, %v5199_v54  ;;  %4661 = vmatpush3.msra.mxu0 %v2356_v23 }
 0xac0   : > { %v2182_v20 = vadd.f32 %v2177_v1, %v2173_v19  ;;  %4662 = vmatprep.subr.mxu0 %v5199_v54 }
 0xac1   : > { %4663 = vmatpush3.msra.mxu0 %v2355_v24 }
 0xac2   : > { %4652 = vmatmul.mubr.msk.f32.gmra.mxu1 %vm621_vm2, %v2182_v20  ;;  %4664 = vmatprep.subr.mxu0 %v5199_v54 }
 0xac3   : > { %4709 = vmatprep.mubr.msk.f32.mxu1 %vm5203_vm4, %v5199_v54  ;;  %4665 = vmatpush3.msra.mxu0 %v2354_v31 }
 0xac4   : > { %4666 = vmatprep.subr.mxu0 %v5199_v54 }
 0xac5   : > { %4667 = vmatpush3.msra.mxu0 %v2353_v34 }
 0xac6   : > { %4668 = vmatprep.subr.mxu0 %v5199_v54 }
 0xac7   : > { %4669 = vmatpush3.msra.mxu0 %v2352_v26 }
 0xac8   : > { %4670 = vmatprep.subr.mxu0 %v5199_v54 }
 0xac9   : > { %4671 = vmatpush3.msra.mxu0 %v2351_v35 }
 0xaca   : > { %4672 = vmatprep.subr.mxu0 %v5199_v54 }
 0xacb   : > { %4673 = vmatpush3.msra.mxu0 %v2350_v27 }
 0xacc   : > { %4674 = vmatprep.subr.mxu0 %v5199_v54 }
 0xacd   : > { %4675 = vmatpush3.msra.mxu0 %v2349_v28 }
 0xace   : > { %4676 = vmatprep.subr.mxu0 %v5199_v54 }
 0xacf   : > { %4677 = vmatpush3.msra.mxu0 %v2348_v29 }
 0xad0   : > { %4678 = vmatprep.subr.mxu0 %v5199_v54 }
 0xad1   : > { %4679 = vmatpush3.msra.mxu0 %v2347_v33 }
 0xad2   : > { %4680 = vmatprep.subr.mxu0 %v5199_v54 }
 0xad3   : > { %4681 = vmatpush3.msra.mxu0 %v2346_v39 }
 0xad4   : > { %4682 = vmatprep.subr.mxu0 %v5199_v54 }
 0xad5   : > { %4683 = vmatpush3.msra.mxu0 %v2345_v59 }
 0xad6   : > { %4684 = vmatprep.subr.mxu0 %v5199_v54 }
 0xad7   : > { %4685 = vmatpush3.msra.mxu0 %v2344_v40 }
 0xad8   : > { %4724 = vmatprep.subr.mxu0 %v5199_v54 }
 0xb72   : > { %v2275_v42 = vpop.f32.mrf.mxu1 }
 0xb73   : > { %v2276_v44 = vadd.f32 %v4082_v41, %v2275_v42 }
 0xb74   : > { %v4641_v45 = vpop.f32.mrf.mxu1 }
 0xb75   : > { %v2299_v46 = vmul.f32 %v2276_v44, %v2276_v44 }
 0xb76   : > { %v2280_v47 = vpop.f32.mrf.mxu1 }
 0xb77   : > { %v2304_v49 = vmul.f32 %v2299_v46, %v2276_v44  ;;  %v2281_v52 = vadd.f32 %v4082_v41, %v2280_v47 }
 0xb78   : > { %v4644_v53 = vpop.f32.mrf.mxu1 }
 0xb79   : > { %v2309_v55 = vmul.f32 0.044715, %v2304_v49  ;;  %v2300_v56 = vmul.f32 %v2281_v52, %v2281_v52 }
 0xb7a   : > { %v2285_v62 = vpop.f32.mrf.mxu1 }
 0xb7b   : > { %v2314_v1 = vadd.f32 %v2309_v55, %v2276_v44  ;;  %v2305_v3 = vmul.f32 %v2300_v56, %v2281_v52  ;;  %v2286_v7 = vadd.f32 %v4082_v41, %v2285_v62 }
 0xb7c   : > { %v4647_v58 = vpop.f32.mrf.mxu1 }
 0xb7d   : > { %v2319_v8 = vmul.f32 0.7978846, %v2314_v1  ;;  %v2310_v11 = vmul.f32 0.044715, %v2305_v3  ;;  %v2301_v12 = vmul.f32 %v2286_v7, %v2286_v7 }
 0xb7e   : > { %v2290_v13 = vpop.f32.mrf.mxu1 }
 0xb7f   : > { %5045 = vtanh.f32 %v2319_v8  ;;  %v2315_v6 = vadd.f32 %v2310_v11, %v2281_v52  ;;  %v2306_v37 = vmul.f32 %v2301_v12, %v2286_v7  ;;  %v2291_v5 = vadd.f32 %v4082_v41, %v2290_v13 }
 0xb80   : > { %v4650_v14 = vpop.f32.mrf.mxu1 }
 0xb81   : > { %v2320_v10 = vmul.f32 0.7978846, %v2315_v6  ;;  %v2311_v15 = vmul.f32 0.044715, %v2306_v37  ;;  %v2302_v16 = vmul.f32 %v2291_v5, %v2291_v5 }
 0xb82   : > { %v2295_v18 = vpop.f32.mrf.mxu1 }
 0xb83   : > { %5047 = vtanh.f32 %v2320_v10  ;;  %v2316_v38 = vadd.f32 %v2311_v15, %v2286_v7  ;;  %v2307_v19 = vmul.f32 %v2302_v16, %v2291_v5  ;;  %v2296_v20 = vadd.f32 %v4082_v41, %v2295_v18 }
 0xb84   : > { %v4653_v9 = vpop.f32.mrf.mxu1 }
 0xb85   : > { %v2321_v21 = vmul.f32 0.7978846, %v2316_v38  ;;  %v2312_v22 = vmul.f32 0.044715, %v2307_v19  ;;  %v2303_v23 = vmul.f32 %v2296_v20, %v2296_v20 }
 0xb87   : > { %5049 = vtanh.f32 %v2321_v21  ;;  %v2317_v24 = vadd.f32 %v2312_v22, %v2291_v5  ;;  %v2308_v31 = vmul.f32 %v2303_v23, %v2296_v20 }
 0xb89   : > { %v2322_v34 = vmul.f32 0.7978846, %v2317_v24  ;;  %v2313_v26 = vmul.f32 0.044715, %v2308_v31 }
 0xb8b   : > { %5051 = vtanh.f32 %v2322_v34  ;;  %v2318_v35 = vadd.f32 %v2313_v26, %v2296_v20 }
 0xb8c   : > { %v5046_v27 = vpop.eup %5045 }
 0xb8d   : > { %v2329_v28 = vadd.f32 1.0, %v5046_v27  ;;  %v2323_v29 = vmul.f32 0.7978846, %v2318_v35 }
 0xb8f   : > { %v2334_v33 = vmul.f32 0.5, %v2329_v28  ;;  %5053 = vtanh.f32 %v2323_v29 }
 0xb90   : > { %v5048_v39 = vpop.eup %5047 }
 0xb91   : > { %v2339_v59 = vmul.f32 %v2334_v33, %v2276_v44  ;;  %v2330_v40 = vadd.f32 1.0, %v5048_v39 }
 0xb93   : > { %4687 = vmatmul.mubr.f32.vlgmr.msra.gmra.mxu0 %v2339_v59  ;;  %v2335_v41 = vmul.f32 0.5, %v2330_v40 }
 0xb94   : > { %v5050_v42 = vpop.eup %5049  ;;  %4689 = vmatprep.mubr.msk.f32.mxu0 %vm5203_vm4, %v5199_v54 }
 0xb95   : > { %v2340_v45 = vmul.f32 %v2335_v41, %v2281_v52  ;;  %v2331_v46 = vadd.f32 1.0, %v5050_v42 }
 0xb97   : > { %4690 = vmatmul.mubr.f32.gmra.mxu0 %v2340_v45  ;;  %v2336_v47 = vmul.f32 0.5, %v2331_v46 }
 0xb98   : > { %v5052_v49 = vpop.eup %5051  ;;  %4692 = vmatprep.mubr.msk.f32.mxu0 %vm5203_vm4, %v5199_v54 }
 0xb99   : > { %v2341_v53 = vmul.f32 %v2336_v47, %v2286_v7  ;;  %v2332_v55 = vadd.f32 1.0, %v5052_v49  ;;  %v2362_v7 = vsub.s32 5, %v5497_v63 }
 0xb9b   : > { %4693 = vmatmul.mubr.f32.gmra.mxu0 %v2341_v53  ;;  %v2337_v56 = vmul.f32 0.5, %v2332_v55  ;;  %v2363_v58 = vrot.slane %v6048_v51, %v2362_v7 }
 0xb9c   : > { %v5054_v44 = vpop.eup %5053  ;;  %4695 = vmatprep.mubr.msk.f32.mxu0 %vm5203_vm4, %v5199_v54 }
 0xb9d   : > { %v2342_v62 = vmul.f32 %v2337_v56, %v2291_v5  ;;  %v2333_v1 = vadd.f32 1.0, %v5054_v44 }
 0xb9f   : > { %4696 = vmatmul.mubr.f32.gmra.mxu0 %v2342_v62  ;;  %v2338_v3 = vmul.f32 0.5, %v2333_v1 }
 0xba0   : > { %4698 = vmatprep.mubr.msk.f32.mxu0 %vm5203_vm4, %v5199_v54 }
 0xba1   : > { %v2343_v52 = vmul.f32 %v2338_v3, %v2296_v20 }
 0xba3   : > { %4699 = vmatmul.mubr.f32.gmra.mxu0 %v2343_v52  ;;  %v4092_v52 = vld [vmem:[%s6758_s6 + $0x38] sm:$0xff] }
 0xba4   : > { %4734 = vmatprep.mubr.msk.f32.mxu0 %vm5203_vm4, %v5199_v54  ;;  %4702 = vmatpush3.msra.mxu1 %v4092_v52 }
 0xba5   : > { %4703 = vmatprep.subr.mxu1 %v5199_v54 }
 0xc53   : > { %v2430_v8 = vpop.f32.mrf.mxu0 }
 0xc54   : > { %v2431_v11 = vadd.f32 %v2430_v8, %v2363_v58  ;;  %v4090_v8 = vld [vmem:[%s6758_s6 + $0x28] sm:$0xff] }
 0xc55   : > { %v4688_v12 = vpop.f32.mrf.mxu0 }
 0xc56   : > { %v6156_v13 = vadd.f32 %v2431_v11, %v5982_v25  ;;  %v4089_v11 = vld [vmem:[%s6758_s6 + $0x20] sm:$0xff] }
 0xc57   : > { %v2435_v6 = vpop.f32.mrf.mxu0 }
 0xc58   : > { %v2436_v37 = vadd.f32 %v2435_v6, %v2363_v58  ;;  %v2461_v5 = vsel %vm621_vm2, %v6156_v13, 0.0 }
 0xc59   : > { %2462 = vadd.xlane.f32.xlu1 %v2461_v5  ;;  %v4691_v14 = vpop.f32.mrf.mxu0 }
 0xc5a   : > { %v6161_v10 = vadd.f32 %v2436_v37, %v5986_v32 }
 0xc5b   : > { %v2440_v15 = vpop.f32.mrf.mxu0 }
 0xc5c   : > { %v2441_v16 = vadd.f32 %v2440_v15, %v2363_v58  ;;  %v2464_v51 = vsel %vm621_vm2, %v6161_v10, 0.0 }
 0xc5d   : > { %2465 = vadd.xlane.f32.xlu0 %v2464_v51  ;;  %v4694_v18 = vpop.f32.mrf.mxu0 }
 0xc5e   : > { %v6166_v25 = vadd.f32 %v2441_v16, %v5990_v43 }
 0xc5f   : > { %v2445_v38 = vpop.f32.mrf.mxu0 }
 0xc60   : > { %v2446_v19 = vadd.f32 %v2445_v38, %v2363_v58  ;;  %v2467_v20 = vsel %vm621_vm2, %v6166_v25, 0.0 }
 0xc61   : > { %2468 = vadd.xlane.f32.xlu1 %v2467_v20  ;;  %v4697_v9 = vpop.f32.mrf.mxu0  ;;  %v6225_v20 = vld [vmem:[%s6757_s5 + $0x8] sm:$0x3f] }
 0xc62   : > { %v6171_v32 = vadd.f32 %v2446_v19, %v5994_v50 }
 0xc63   : > { %v2450_v21 = vpop.f32.mrf.mxu0 }
 0xc64   : > { %v2451_v22 = vadd.f32 %v2450_v21, %v2363_v58  ;;  %v2470_v23 = vsel %vm621_vm2, %v6171_v32, 0.0  ;;  %v4091_v58 = vld [vmem:[%s6758_s6 + $0x30] sm:$0xff] }
 0xc65   : > { %2471 = vadd.xlane.f32.xlu0 %v2470_v23  ;;  %v4700_v24 = vpop.f32.mrf.mxu0  ;;  %4704 = vmatpush3.msra.mxu1 %v4091_v58 }
 0xc66   : > { %v6176_v43 = vadd.f32 %v2451_v22, %v5998_v60  ;;  %4705 = vmatprep.subr.mxu1 %v5199_v54  ;;  %v2529_v22 = vrot.slane %v6225_v20, %v1109_v57 }
 0xc67   : > { %4706 = vmatpush3.msra.mxu1 %v4090_v8 }
 0xc68   : > { %v2473_v31 = vsel %vm947_vm3, %v6176_v43, 0.0  ;;  %4707 = vmatprep.subr.mxu1 %v5199_v54 }
 0xc69   : > { %2474 = vadd.xlane.f32.xlu1 %v2473_v31  ;;  %4708 = vmatpush3.msra.mxu1 %v4089_v11  ;;  %v2538_v31 = vrot.slane %v6225_v20, %v1118_v61 }
 0xc6a   : > { %4749 = vmatprep.subr.mxu1 %v5199_v54 }
 0xce2   : > { %v2463_v34 = vpop.xlane.xlu1 %2462 }
 0xce3   : > { %v2476_v26 = vmul.f32 0.03125, %v2463_v34 }
 0xce5   : > { %v2481_v35 = vsub.f32 %v6156_v13, %v2476_v26 }
 0xce6   : > { %v2466_v50 = vpop.xlane.xlu0 %2465 }
 0xce7   : > { %v2477_v27 = vmul.f32 0.03125, %v2466_v50  ;;  %v2486_v28 = vmul.f32 %v2481_v35, %v2481_v35 }
 0xce9   : > { %v6182_v29 = vsub.f32 %v6161_v10, %v2477_v27  ;;  %v2491_v33 = vsel %vm621_vm2, %v2486_v28, 0.0 }
 0xcea   : > { %v2469_v39 = vpop.xlane.xlu1 %2468  ;;  %2492 = vadd.xlane.f32.xlu0 %v2491_v33 }
 0xceb   : > { %v2478_v60 = vmul.f32 0.03125, %v2469_v39  ;;  %v2487_v59 = vmul.f32 %v6182_v29, %v6182_v29 }
 0xced   : > { %v6188_v40 = vsub.f32 %v6166_v25, %v2478_v60  ;;  %v2494_v41 = vsel %vm621_vm2, %v2487_v59, 0.0 }
 0xcee   : > { %v2472_v42 = vpop.xlane.xlu0 %2471  ;;  %2495 = vadd.xlane.f32.xlu1 %v2494_v41 }
 0xcef   : > { %v2479_v45 = vmul.f32 0.03125, %v2472_v42  ;;  %v2488_v46 = vmul.f32 %v6188_v40, %v6188_v40 }
 0xcf1   : > { %v6194_v47 = vsub.f32 %v6171_v32, %v2479_v45  ;;  %v2497_v49 = vsel %vm621_vm2, %v2488_v46, 0.0 }
 0xcf2   : > { %2498 = vadd.xlane.f32.xlu0 %v2497_v49  ;;  %v2475_v53 = vpop.xlane.xlu1 %2474 }
 0xcf3   : > { %v2480_v55 = vmul.f32 0.03125, %v2475_v53  ;;  %v2489_v56 = vmul.f32 %v6194_v47, %v6194_v47 }
 0xcf5   : > { %v6200_v44 = vsub.f32 %v6176_v43, %v2480_v55  ;;  %v2500_v62 = vsel %vm621_vm2, %v2489_v56, 0.0 }
 0xcf6   : > { %2501 = vadd.xlane.f32.xlu1 %v2500_v62 }
 0xcf7   : > { %v2490_v1 = vmul.f32 %v6200_v44, %v6200_v44 }
 0xcf9   : > { %v2503_v3 = vsel %vm947_vm3, %v2490_v1, 0.0 }
 0xcfa   : > { %2504 = vadd.xlane.f32.xlu0 %v2503_v3 }
 0xd73   : > { %v2493_v12 = vpop.xlane.xlu0 %2492 }
 0xd74   : > { %v2506_v6 = vmul.f32 0.03125, %v2493_v12 }
 0xd76   : > { %v2511_v37 = vadd.f32 1e-06, %v2506_v6 }
 0xd77   : > { %v2496_v5 = vpop.xlane.xlu1 %2495 }
 0xd78   : > { %5055 = vrsqrt.f32 %v2511_v37  ;;  %v2507_v14 = vmul.f32 0.03125, %v2496_v5 }
 0xd7a   : > { %v2512_v15 = vadd.f32 1e-06, %v2507_v14 }
 0xd7b   : > { %v2499_v16 = vpop.xlane.xlu0 %2498 }
 0xd7c   : > { %5057 = vrsqrt.f32 %v2512_v15  ;;  %v2508_v51 = vmul.f32 0.03125, %v2499_v16 }
 0xd7e   : > { %v2513_v18 = vadd.f32 1e-06, %v2508_v51 }
 0xd7f   : > { %v2502_v38 = vpop.xlane.xlu1 %2501 }
 0xd80   : > { %5059 = vrsqrt.f32 %v2513_v18  ;;  %v2509_v19 = vmul.f32 0.03125, %v2502_v38 }
 0xd82   : > { %v2514_v9 = vadd.f32 1e-06, %v2509_v19 }
 0xd83   : > { %v2505_v21 = vpop.xlane.xlu0 %2504 }
 0xd84   : > { %5061 = vrsqrt.f32 %v2514_v9  ;;  %v2510_v23 = vmul.f32 0.03125, %v2505_v21 }
 0xd85   : > { %v5056_v24 = vpop.eup %5055 }
 0xd86   : > { %v2521_v34 = vmul.f32 %v5056_v24, %v2481_v35  ;;  %v2515_v26 = vadd.f32 1e-06, %v2510_v23 }
 0xd88   : > { %v2530_v50 = vmul.f32 %v2529_v22, %v2521_v34  ;;  %5063 = vrsqrt.f32 %v2515_v26 }
 0xd89   : > { %v5058_v27 = vpop.eup %5057 }
 0xd8a   : > { %v2539_v28 = vadd.f32 %v2538_v31, %v2530_v50  ;;  %v2522_v33 = vmul.f32 %v5058_v27, %v6182_v29 }
 0xd8c   : > { %4710 = vmatmul.mubr.msk.f32.vlgmr.msra.gmra.mxu1 %vm621_vm2, %v2539_v28  ;;  %v2531_v39 = vmul.f32 %v2529_v22, %v2522_v33 }
 0xd8d   : > { %v5060_v60 = vpop.eup %5059  ;;  %4712 = vmatprep.mubr.msk.f32.mxu1 %vm5203_vm4, %v5199_v54 }
 0xd8e   : > { %v2540_v57 = vadd.f32 %v2538_v31, %v2531_v39  ;;  %v2523_v59 = vmul.f32 %v5060_v60, %v6188_v40 }
 0xd90   : > { %4713 = vmatmul.mubr.msk.f32.gmra.mxu1 %vm621_vm2, %v2540_v57  ;;  %v2532_v61 = vmul.f32 %v2529_v22, %v2523_v59 }
 0xd91   : > { %v5062_v35 = vpop.eup %5061  ;;  %4715 = vmatprep.mubr.msk.f32.mxu1 %vm5203_vm4, %v5199_v54 }
 0xd92   : > { %v2541_v41 = vadd.f32 %v2538_v31, %v2532_v61  ;;  %v2524_v29 = vmul.f32 %v5062_v35, %v6194_v47 }
 0xd94   : > { %4716 = vmatmul.mubr.msk.f32.gmra.mxu1 %vm621_vm2, %v2541_v41  ;;  %v2533_v42 = vmul.f32 %v2529_v22, %v2524_v29 }
 0xd95   : > { %v5064_v45 = vpop.eup %5063  ;;  %4718 = vmatprep.mubr.msk.f32.mxu1 %vm5203_vm4, %v5199_v54 }
 0xd96   : > { %v2542_v46 = vadd.f32 %v2538_v31, %v2533_v42  ;;  %v2525_v40 = vmul.f32 %v5064_v45, %v6200_v44  ;;  %v4094_v44 = vld [vmem:[%s6759_s7 + $0x1] ss:$0 sm:$0xff] }
 0xd98   : > { %4719 = vmatmul.mubr.msk.f32.gmra.mxu1 %vm621_vm2, %v2542_v46  ;;  %v2534_v49 = vmul.f32 %v2529_v22, %v2525_v40 }
 0xd99   : > { %4721 = vmatprep.mubr.msk.f32.mxu1 %vm5203_vm4, %v5199_v54 }
 0xd9a   : > { %v2543_v53 = vadd.f32 %v2538_v31, %v2534_v49 }
 0xd9c   : > { %4722 = vmatmul.mubr.msk.f32.gmra.mxu1 %vm621_vm2, %v2543_v53 }
 0xd9d   : > { %4759 = vmatprep.mubr.msk.f32.mxu1 %vm5203_vm4, %v5199_v54 }
 0xe4c   : > { %v2638_v47 = vpop.f32.mrf.mxu1 }
 0xe4d   : > { %v6259_v12 = vadd.f32 %v4094_v44, %v2638_v47 }
 0xe4e   : > { %v4711_v55 = vpop.f32.mrf.mxu1 }
 0xe50   : > { %v2643_v56 = vpop.f32.mrf.mxu1 }
 0xe51   : > { %v6273_v14 = vadd.f32 %v4094_v44, %v2643_v56 }
 0xe52   : > { %v4714_v62 = vpop.f32.mrf.mxu1 }
 0xe54   : > { %v2648_v1 = vpop.f32.mrf.mxu1 }
 0xe55   : > { %v6267_v5 = vadd.f32 %v4094_v44, %v2648_v1 }
 0xe56   : > { %v4717_v3 = vpop.f32.mrf.mxu1 }
 0xe58   : > { %v2653_v52 = vpop.f32.mrf.mxu1 }
 0xe59   : > { %v6255_v58 = vadd.f32 %v4094_v44, %v2653_v52 }
 0xe5a   : > { %v4720_v8 = vpop.f32.mrf.mxu1 }
 0xe5b   : > { %2678 = vrot.lane.b32.xlu0 %v6255_v58, %s6780_s30 }
 0xe5c   : > { %v2658_v11 = vpop.f32.mrf.mxu1 }
 0xe5d   : > { %v6261_v6 = vadd.f32 %v4094_v44, %v2658_v11 }
 0xe5e   : > { %v4723_v37 = vpop.f32.mrf.mxu1 }
 0xe5f   : > { %2672 = vrot.lane.b32.xlu0 %v6259_v12, %s6780_s30  ;;  %2680 = vrot.lane.b32.xlu1 %v6261_v6, %s6780_s30 }
 0xe63   : > { %2994 = vrot.lane.b32.xlu0 %v6255_v58, %s5204_s20  ;;  %2676 = vrot.lane.b32.xlu1 %v6267_v5, %s6780_s30 }
 0xe67   : > { %2990 = vrot.lane.b32.xlu0 %v6273_v14, %s5204_s20  ;;  %2674 = vrot.lane.b32.xlu1 %v6273_v14, %s6780_s30  ;;  %s6782_s30 = smov 64  }
 0xe6b   : > { %2978 = vrot.lane.b32.xlu0 %v6259_v12, %s5205_s16  ;;  %2996 = vrot.lane.b32.xlu1 %v6261_v6, %s5204_s20 }
 0xe6f   : > { %2982 = vrot.lane.b32.xlu0 %v6267_v5, %s5205_s16  ;;  %2992 = vrot.lane.b32.xlu1 %v6267_v5, %s5204_s20 }
 0xe73   : > { %2986 = vrot.lane.b32.xlu0 %v6261_v6, %s5205_s16  ;;  %2988 = vrot.lane.b32.xlu1 %v6259_v12, %s5204_s20  ;;  %s6783_s20 = smov 48  }
 0xe77   : > { %2980 = vrot.lane.b32.xlu1 %v6273_v14, %s5205_s16 }
 0xe7b   : > { %2984 = vrot.lane.b32.xlu1 %v6255_v58, %s5205_s16 }
 0xecd   : > { %v2679_v16 = vpop.permute.xlu0 %2678 }
 0xed1   : > { %v2681_v15 = vpop.permute.xlu1 %2680  ;;  %v2673_v38 = vpop.permute.xlu0 %2672 }
 0xed2   : > { %4725 = vmatpush3.xpose.msk.msra.mxu0 %vm1260_vm5, %v2681_v15 }
 0xed3   : > { %4726 = vmatprep.subr.mxu0 %v5199_v54 }
 0xed5   : > { %v2677_v51 = vpop.permute.xlu1 %2676  ;;  %v2995_v9 = vpop.permute.xlu0 %2994 }
 0xed6   : > { %4727 = vmatpush3.xpose.msk.msra.mxu0 %vm1260_vm5, %v2679_v16 }
 0xed7   : > { %4728 = vmatprep.subr.mxu0 %v5199_v54 }
 0xed9   : > { %v2675_v18 = vpop.permute.xlu1 %2674  ;;  %v2991_v22 = vpop.permute.xlu0 %2990 }
 0xeda   : > { %4729 = vmatpush3.xpose.msk.msra.mxu0 %vm1260_vm5, %v2677_v51 }
 0xedb   : > { %4730 = vmatprep.subr.mxu0 %v5199_v54 }
 0xedd   : > { %v2997_v19 = vpop.permute.xlu1 %2996  ;;  %v2979_v24 = vpop.permute.xlu0 %2978 }
 0xede   : > { %4731 = vmatpush3.xpose.msk.msra.mxu0 %vm1260_vm5, %v2675_v18 }
 0xedf   : > { %4732 = vmatprep.subr.mxu0 %v5199_v54 }
 0xee1   : > { %v2993_v21 = vpop.permute.xlu1 %2992  ;;  %v2983_v34 = vpop.permute.xlu0 %2982 }
 0xee2   : > { %4733 = vmatpush3.xpose.msk.msra.mxu0 %vm1260_vm5, %v2673_v38 }
 0xee3   : > { %4774 = vmatprep.subr.mxu0 %v5199_v54 }
 0xee5   : > { %4735 = vmatmul.mubr.msk.f32.vlgmr.msra.gmra.mxu0 %vm1260_vm5, %v6259_v12  ;;  %v2989_v23 = vpop.permute.xlu1 %2988  ;;  %v2987_v50 = vpop.permute.xlu0 %2986 }
 0xee6   : > { %4775 = vmatpush3.xpose.msk.msra.mxu0 %vm1260_vm5, %v2997_v19  ;;  %4737 = vmatprep.mubr.msk.f32.mxu0 %vm5203_vm4, %v5199_v54 }
 0xee7   : > { %4776 = vmatprep.subr.mxu0 %v5199_v54 }
 0xee9   : > { %4738 = vmatmul.mubr.msk.f32.gmra.mxu0 %vm1260_vm5, %v6273_v14  ;;  %v2981_v31 = vpop.permute.xlu1 %2980 }
 0xeea   : > { %4777 = vmatpush3.xpose.msk.msra.mxu0 %vm1260_vm5, %v2995_v9  ;;  %4740 = vmatprep.mubr.msk.f32.mxu0 %vm5203_vm4, %v5199_v54 }
 0xeeb   : > { %4778 = vmatprep.subr.mxu0 %v5199_v54 }
 0xeed   : > { %4741 = vmatmul.mubr.msk.f32.gmra.mxu0 %vm1260_vm5, %v6267_v5  ;;  %v2985_v26 = vpop.permute.xlu1 %2984 }
 0xeee   : > { %4779 = vmatpush3.xpose.msk.msra.mxu0 %vm1260_vm5, %v2993_v21  ;;  %4743 = vmatprep.mubr.msk.f32.mxu0 %vm5203_vm4, %v5199_v54 }
 0xeef   : > { %4780 = vmatprep.subr.mxu0 %v5199_v54 }
 0xef1   : > { %4744 = vmatmul.mubr.msk.f32.gmra.mxu0 %vm1260_vm5, %v6255_v58 }
 0xef2   : > { %4781 = vmatpush3.xpose.msk.msra.mxu0 %vm1260_vm5, %v2991_v22  ;;  %4746 = vmatprep.mubr.msk.f32.mxu0 %vm5203_vm4, %v5199_v54 }
 0xef3   : > { %4782 = vmatprep.subr.mxu0 %v5199_v54 }
 0xef5   : > { %4747 = vmatmul.mubr.msk.f32.gmra.mxu0 %vm1260_vm5, %v6261_v6 }
 0xef6   : > { %4783 = vmatpush3.xpose.msk.msra.mxu0 %vm1260_vm5, %v2989_v23  ;;  %4784 = vmatprep.mubr.msk.f32.mxu0 %vm5203_vm4, %v5199_v54 }
 0xef7   : > { %4824 = vmatprep.subr.mxu0 %v5199_v54 }
 0xef9   : > { %4785 = vmatmul.mubr.msk.f32.vlgmr.msra.gmra.mxu0 %vm1260_vm5, %v2979_v24 }
 0xefa   : > { %4787 = vmatprep.mubr.msk.f32.mxu0 %vm5203_vm4, %v5199_v54 }
 0xefd   : > { %4788 = vmatmul.mubr.msk.f32.gmra.mxu0 %vm1260_vm5, %v2981_v31 }
 0xefe   : > { %4790 = vmatprep.mubr.msk.f32.mxu0 %vm5203_vm4, %v5199_v54 }
 0xf01   : > { %4791 = vmatmul.mubr.msk.f32.gmra.mxu0 %vm1260_vm5, %v2983_v34 }
 0xf02   : > { %4793 = vmatprep.mubr.msk.f32.mxu0 %vm5203_vm4, %v5199_v54 }
 0xf05   : > { %4794 = vmatmul.mubr.msk.f32.gmra.mxu0 %vm1260_vm5, %v2985_v26 }
 0xf06   : > { %4796 = vmatprep.mubr.msk.f32.mxu0 %vm5203_vm4, %v5199_v54 }
 0xf09   : > { %4797 = vmatmul.mubr.msk.f32.gmra.mxu0 %vm1260_vm5, %v2987_v50 }
 0xf0a   : > { %4828 = vmatprep.mubr.msk.f32.mxu0 %vm5203_vm4, %v5199_v54 }
 0xfa5   : > { %v2768_v27 = vpop.f32.mrf.mxu0 }
 0xfa6   : > { %v2792_v28 = vmul.f32 0.25, %v2768_v27 }
 0xfa7   : > { %v4736_v33 = vpop.f32.mrf.mxu0 }
 0xfa8   : > { %v2797_v39 = vadd.f32 %v2792_v28, %v5763_v0 }
 0xfa9   : > { %v2773_v60 = vpop.f32.mrf.mxu0 }
 0xfaa   : > { %v2793_v57 = vmul.f32 0.25, %v2773_v60  ;;  %v2802_v59 = vsel %vm1381_vm10, %v2797_v39, -inf }
 0xfab   : > { %2803 = vmax.xlane.f32.xlu1 %v2802_v59  ;;  %v4739_v61 = vpop.f32.mrf.mxu0 }
 0xfac   : > { %v2798_v35 = vadd.f32 %v2793_v57, %v5763_v0 }
 0xfad   : > { %v2778_v41 = vpop.f32.mrf.mxu0 }
 0xfae   : > { %v2794_v29 = vmul.f32 0.25, %v2778_v41  ;;  %v2805_v42 = vsel %vm1381_vm10, %v2798_v35, -inf }
 0xfaf   : > { %2806 = vmax.xlane.f32.xlu0 %v2805_v42  ;;  %v4742_v45 = vpop.f32.mrf.mxu0 }
 0xfb0   : > { %v2799_v46 = vadd.f32 %v2794_v29, %v5786_v30 }
 0xfb1   : > { %v2783_v40 = vpop.f32.mrf.mxu0 }
 0xfb2   : > { %v2795_v49 = vmul.f32 0.25, %v2783_v40  ;;  %v2808_v53 = vsel %vm1381_vm10, %v2799_v46, -inf }
 0xfb3   : > { %2809 = vmax.xlane.f32.xlu0 %v2808_v53  ;;  %v4745_v47 = vpop.f32.mrf.mxu0 }
 0xfb4   : > { %v2800_v55 = vadd.f32 %v2795_v49, %v5792_v36 }
 0xfb5   : > { %v2788_v56 = vpop.f32.mrf.mxu0 }
 0xfb6   : > { %v2796_v62 = vmul.f32 0.25, %v2788_v56  ;;  %v2811_v1 = vsel %vm1381_vm10, %v2800_v55, -inf }
 0xfb7   : > { %2812 = vmax.xlane.f32.xlu1 %v2811_v1  ;;  %v4748_v3 = vpop.f32.mrf.mxu0 }
 0xfb8   : > { %v2801_v44 = vadd.f32 %v2796_v62, %v5792_v36 }
 0xfb9   : > { %v3084_v52 = vpop.f32.mrf.mxu0 }
 0xfba   : > { %v3108_v8 = vmul.f32 0.25, %v3084_v52  ;;  %v2814_v11 = vsel %vm1394_vm0, %v2801_v44, -inf }
 0xfbb   : > { %2815 = vmax.xlane.f32.xlu0 %v2814_v11  ;;  %v4786_v37 = vpop.f32.mrf.mxu0 }
 0xfbc   : > { %v3113_v15 = vadd.f32 %v3108_v8, %v5763_v0 }
 0xfbd   : > { %v3089_v16 = vpop.f32.mrf.mxu0 }
 0xfbe   : > { %v3109_v51 = vmul.f32 0.25, %v3089_v16  ;;  %v3118_v18 = vsel %vm1381_vm10, %v3113_v15, -inf }
 0xfbf   : > { %3119 = vmax.xlane.f32.xlu1 %v3118_v18  ;;  %v4789_v38 = vpop.f32.mrf.mxu0 }
 0xfc0   : > { %v3114_v19 = vadd.f32 %v3109_v51, %v5763_v0 }
 0xfc1   : > { %v3094_v9 = vpop.f32.mrf.mxu0 }
 0xfc2   : > { %v3121_v21 = vsel %vm1381_vm10, %v3114_v19, -inf  ;;  %v3110_v0 = vmul.f32 0.25, %v3094_v9 }
 0xfc3   : > { %3122 = vmax.xlane.f32.xlu0 %v3121_v21  ;;  %v4792_v22 = vpop.f32.mrf.mxu0 }
 0xfc4   : > { %v6377_v26 = vadd.f32 %v3110_v0, %v5786_v30 }
 0xfc5   : > { %v6364_v23 = vpop.f32.mrf.mxu0 }
 0xfc6   : > { %v3124_v50 = vsel %vm1381_vm10, %v6377_v26, -inf }
 0xfc7   : > { %v4795_v24 = vpop.f32.mrf.mxu0 }
 0xfc9   : > { %v6366_v31 = vpop.f32.mrf.mxu0 }
 0xfcb   : > { %v4798_v34 = vpop.f32.mrf.mxu0 }
 0xfd0   : > { %2865 = vrot.lane.b32.xlu1 %v6261_v6, %s6782_s30 }
 0xfd9   : > { %2863 = vrot.lane.b32.xlu0 %v6255_v58, %s6782_s30 }
 0xfdd   : > { %2859 = vrot.lane.b32.xlu0 %v6273_v14, %s6782_s30 }
 0xfe1   : > { %2857 = vrot.lane.b32.xlu0 %v6259_v12, %s6782_s30 }
 0xff4   : > { %3125 = vmax.xlane.f32.xlu1 %v3124_v50 }
0x1005   : > { %2861 = vrot.lane.b32.xlu1 %v6267_v5, %s6782_s30  ;;  %s5209_s30 = smov [#allocation3]  }
0x1009   : > { %3181 = vrot.lane.b32.xlu1 %v6261_v6, %s6783_s20 }
0x1034   : > { %v2804_v27 = vpop.xlane.xlu1 %2803 }
0x1035   : > { %v2817_v28 = vsub.f32 %v2797_v39, %v2804_v27 }
0x1037   : > { %v2822_v33 = vmul.f32 1.442695, %v2817_v28  ;;  %v3112_v28 = vmul.f32 0.25, %v6366_v31 }
0x1038   : > { %v2807_v60 = vpop.xlane.xlu0 %2806 }
0x1039   : > { %5065 = vpow2.f32 %v2822_v33  ;;  %v2818_v57 = vsub.f32 %v2798_v35, %v2807_v60  ;;  %v6440_v33 = vadd.f32 %v3112_v28, %v5792_v36 }
0x103b   : > { %v2824_v59 = vmul.f32 1.442695, %v2818_v57  ;;  %v3130_v60 = vsel %vm1394_vm0, %v6440_v33, -inf }
0x103c   : > { %v2810_v61 = vpop.xlane.xlu0 %2809 }
0x103d   : > { %5067 = vpow2.f32 %v2824_v59  ;;  %v2819_v30 = vsub.f32 %v2799_v46, %v2810_v61 }
0x103f   : > { %v2826_v41 = vmul.f32 1.442695, %v2819_v30 }
0x1040   : > { %v2813_v29 = vpop.xlane.xlu1 %2812 }
0x1041   : > { %5069 = vpow2.f32 %v2826_v41  ;;  %v2820_v42 = vsub.f32 %v2800_v55, %v2813_v29 }
0x1043   : > { %v2828_v45 = vmul.f32 1.442695, %v2820_v42 }
0x1044   : > { %v2816_v40 = vpop.xlane.xlu0 %2815 }
0x1045   : > { %5071 = vpow2.f32 %v2828_v45  ;;  %v2821_v49 = vsub.f32 %v2801_v44, %v2816_v40 }
0x1046   : > { %v6385_v53 = vpop.eup %5065 }
0x1047   : > { %v2830_v6 = vmul.f32 1.442695, %v2821_v49  ;;  %v2832_v39 = vsel %vm1381_vm10, %v6385_v53, 0.0 }
0x1048   : > { %v3120_v47 = vpop.xlane.xlu1 %3119  ;;  %2833 = vadd.xlane.f32.xlu0 %v2832_v39 }
0x1049   : > { %5073 = vpow2.f32 %v2830_v6  ;;  %v3133_v35 = vsub.f32 %v3113_v15, %v3120_v47 }
0x104a   : > { %v6389_v56 = vpop.eup %5067 }
0x104b   : > { %v3138_v46 = vmul.f32 1.442695, %v3133_v35  ;;  %v2835_v55 = vsel %vm1381_vm10, %v6389_v56, 0.0 }
0x104c   : > { %v2866_v62 = vpop.permute.xlu1 %2865  ;;  %v3123_v1 = vpop.xlane.xlu0 %3122  ;;  %2836 = vadd.xlane.f32.xlu1 %v2835_v55 }
0x104d   : > { %5075 = vpow2.f32 %v3138_v46  ;;  %v3134_v3 = vsub.f32 %v3114_v19, %v3123_v1  ;;  %4750 = vmatpush3.msk.msra.mxu1 %vm1467_vm6, %v2866_v62 }
0x104e   : > { %v6394_v44 = vpop.eup %5069  ;;  %4751 = vmatprep.subr.mxu1 %v5199_v54 }
0x104f   : > { %v3140_v52 = vmul.f32 1.442695, %v3134_v3  ;;  %v2838_v8 = vsel %vm1381_vm10, %v6394_v44, 0.0 }
0x1050   : > { %2839 = vadd.xlane.f32.xlu0 %v2838_v8  ;;  %v2864_v11 = vpop.permute.xlu0 %2863 }
0x1051   : > { %5077 = vpow2.f32 %v3140_v52  ;;  %4752 = vmatpush3.msra.mxu1 %v2864_v11 }
0x1052   : > { %v6399_v37 = vpop.eup %5071  ;;  %4753 = vmatprep.subr.mxu1 %v5199_v54 }
0x1053   : > { %v2841_v15 = vsel %vm1381_vm10, %v6399_v37, 0.0 }
0x1054   : > { %2842 = vadd.xlane.f32.xlu1 %v2841_v15  ;;  %v2860_v24 = vpop.permute.xlu0 %2859 }
0x1056   : > { %v6404_v16 = vpop.eup %5073 }
0x1057   : > { %v2844_v51 = vsel %vm1394_vm0, %v6404_v16, 0.0 }
0x1058   : > { %2845 = vadd.xlane.f32.xlu0 %v2844_v51  ;;  %v2858_v50 = vpop.permute.xlu0 %2857 }
0x105a   : > { %v6408_v18 = vpop.eup %5075 }
0x105b   : > { %v3148_v38 = vsel %vm1381_vm10, %v6408_v18, 0.0 }
0x105c   : > { %3149 = vadd.xlane.f32.xlu0 %v3148_v38 }
0x105e   : > { %v6412_v19 = vpop.eup %5077 }
0x105f   : > { %v3151_v9 = vsel %vm1381_vm10, %v6412_v19, 0.0 }
0x1060   : > { %3152 = vadd.xlane.f32.xlu1 %v3151_v9 }
0x1071   : > { %3177 = vrot.lane.b32.xlu1 %v6267_v5, %s6783_s20 }
0x1075   : > { %3175 = vrot.lane.b32.xlu1 %v6273_v14, %s6783_s20  ;;  %v3111_v14 = vmul.f32 0.25, %v6364_v23 }
0x1079   : > { %3173 = vrot.lane.b32.xlu1 %v6259_v12, %s6783_s20 }
0x107d   : > { %v3126_v21 = vpop.xlane.xlu1 %3125 }
0x107e   : > { %v3135_v22 = vsub.f32 %v6377_v26, %v3126_v21  ;;  %v6432_v26 = vadd.f32 %v3111_v14, %v5792_v36  ;;  %v4103_v21 = vld [vmem:[%s6760_s8 + $0x38] sm:$0xff] }
0x107f   : > { %4825 = vmatpush3.msra.mxu0 %v4103_v21 }
0x1080   : > { %v3142_v34 = vmul.f32 1.442695, %v3135_v22  ;;  %v3127_v27 = vsel %vm1381_vm10, %v6432_v26, -inf  ;;  %4826 = vmatprep.subr.mxu0 %v5199_v54 }
0x1081   : > { %v2862_v0 = vpop.permute.xlu1 %2861 }
0x1082   : > { %5079 = vpow2.f32 %v3142_v34  ;;  %4754 = vmatpush3.msra.mxu1 %v2862_v0  ;;  %v4102_v34 = vld [vmem:[%s6760_s8 + $0x30] sm:$0xff]  ;;  %v4101_v0 = vld [vmem:[%s6760_s8 + $0x28] sm:$0xff] }
0x1083   : > { %4755 = vmatprep.subr.mxu1 %v5199_v54  ;;  %4827 = vmatpush3.msra.mxu0 %v4102_v34 }
0x1084   : > { %4756 = vmatpush3.msra.mxu1 %v2860_v24  ;;  %4862 = vmatprep.subr.mxu0 %v5199_v54 }
0x1085   : > { %4757 = vmatprep.subr.mxu1 %v5199_v54  ;;  %v3182_v23 = vpop.permute.xlu1 %3181 }
0x1086   : > { %4758 = vmatpush3.msra.mxu1 %v2858_v50  ;;  %v4100_v50 = vld [vmem:[%s6760_s8 + $0x20] sm:$0xff] }
0x1087   : > { %4799 = vmatprep.subr.mxu1 %v5199_v54 }
0x108f   : > { %v6426_v5 = vpop.eup %5079 }
0x1090   : > { %v3154_v12 = vsel %vm1381_vm10, %v6426_v5, 0.0 }
0x1091   : > { %3155 = vadd.xlane.f32.xlu0 %v3154_v12 }
0x109d   : > { %3128 = vmax.xlane.f32.xlu1 %v3127_v27 }
0x10a7   : > { %3179 = vrot.lane.b32.xlu0 %v6255_v58, %s6783_s20  ;;  %s404_s20 = sand.u32 1, %s5189_s22  }
0x10a8   : > { %s4003_s16 = sshll.u32 %s404_s20, 1  ;;  %s3927_s26 = scalar_lea.sflag [#allocation4], %s404_s20 }
0x10a9   : > { %s406_s28 = scalar_lea.vmem [#allocation3], %s4003_s16  ;;  %s5141_s16 = sshll.u32 %s5209_s30, 4  ;;  %s5142_s16 = int_to_ptr.vmem [resolvable:$false] %s5141_s16 }
0x10aa   : > { %s3940_s29 = sshll.u32 %s406_s28, 4  ;;  %s5143_s25 = scalar_lea.vmem %s5142_s16, 64  ;;  %s3941_s29 = int_to_ptr.vmem [resolvable:$true] %s3940_s29 }
0x10ab   : > { %s5137_s17 = scalar_lea.vmem %s3941_s29, 32  ;;  %p5144_p0 = scmp.lt.s32.totalorder %s3941_s29, %s5142_s16 }
0x10ac   : > { %p5138_p11 = scmp.ne.s32.totalorder %s3941_s29, %s5137_s17  ;;  %p5145_p1 = scmp.lt.s32.totalorder %s5143_s25, %s5137_s17 }
0x10ae   : > { %p5139_p12 = pnand %p5138_p11, %p5313_p5  ;;  %p5146_p2 = por %p5145_p1, %p5144_p0 }
0x10b0   : > { %p5140_p13 = pneg %p5139_p12 }
0x10b2   : > { %p5147_p3 = pnand %p5146_p2, %p5140_p13 }
0x10c6   : > { %3131 = vmax.xlane.f32.xlu0 %v3130_v60 }
0x10d1   : > { %v2834_v57 = vpop.xlane.xlu0 %2833 }
0x10d2   : > { %5081 = vrcp.f32 %v2834_v57 }
0x10d5   : > { %v2837_v59 = vpop.xlane.xlu1 %2836 }
0x10d6   : > { %5083 = vrcp.f32 %v2837_v59 }
0x10d9   : > { %v2840_v61 = vpop.xlane.xlu0 %2839 }
0x10da   : > { %5085 = vrcp.f32 %v2840_v61 }
0x10dd   : > { %v2843_v30 = vpop.xlane.xlu1 %2842 }
0x10de   : > { %5087 = vrcp.f32 %v2843_v30 }
0x10df   : > { %v5082_v41 = vpop.eup %5081 }
0x10e0   : > { %v2852_v58 = vmul.f32 %v5082_v41, %v6385_v53 }
0x10e1   : > { %v2846_v31 = vpop.xlane.xlu0 %2845 }
0x10e2   : > { %5089 = vrcp.f32 %v2846_v31  ;;  %4760 = vmatmul.mubr.msk.f32.vlgmr.msra.gmra.mxu1 %vm1381_vm10, %v2852_v58 }
0x10e3   : > { %v5084_v36 = vpop.eup %5083  ;;  %4800 = vmatpush3.msk.msra.mxu1 %vm1467_vm6, %v3182_v23  ;;  %4762 = vmatprep.mubr.msk.f32.mxu1 %vm5203_vm4, %v5199_v54 }
0x10e4   : > { %v2853_v29 = vmul.f32 %v5084_v36, %v6389_v56  ;;  %4801 = vmatprep.subr.mxu1 %v5199_v54 }
0x10e5   : > { %v3150_v47 = vpop.xlane.xlu0 %3149 }
0x10e6   : > { %4763 = vmatmul.mubr.msk.f32.gmra.mxu1 %vm1381_vm10, %v2853_v29  ;;  %5091 = vrcp.f32 %v3150_v47 }
0x10e7   : > { %v5086_v42 = vpop.eup %5085  ;;  %4765 = vmatprep.mubr.msk.f32.mxu1 %vm5203_vm4, %v5199_v54 }
0x10e8   : > { %v2854_v45 = vmul.f32 %v5086_v42, %v6394_v44 }
0x10e9   : > { %v3153_v39 = vpop.xlane.xlu1 %3152 }
0x10ea   : > { %4766 = vmatmul.mubr.msk.f32.gmra.mxu1 %vm1381_vm10, %v2854_v45  ;;  %5093 = vrcp.f32 %v3153_v39 }
0x10eb   : > { %v5088_v40 = vpop.eup %5087  ;;  %4768 = vmatprep.mubr.msk.f32.mxu1 %vm5203_vm4, %v5199_v54 }
0x10ec   : > { %v2855_v49 = vmul.f32 %v5088_v40, %v6399_v37 }
0x10ed   : > { %v3178_v35 = vpop.permute.xlu1 %3177 }
0x10ee   : > { %4769 = vmatmul.mubr.msk.f32.gmra.mxu1 %vm1381_vm10, %v2855_v49 }
0x10ef   : > { %v5090_v53 = vpop.eup %5089  ;;  %4771 = vmatprep.mubr.msk.f32.mxu1 %vm5203_vm4, %v5199_v54 }
0x10f0   : > { %v2856_v6 = vmul.f32 %v5090_v53, %v6404_v16 }
0x10f1   : > { %v3176_v46 = vpop.permute.xlu1 %3175 }
0x10f2   : > { %4772 = vmatmul.mubr.msk.f32.gmra.mxu1 %vm1381_vm10, %v2856_v6 }
0x10f3   : > { %4809 = vmatprep.mubr.msk.f32.mxu1 %vm5203_vm4, %v5199_v54  ;;  %v5092_v62 = vpop.eup %5091 }
0x10f4   : > { %v3168_v3 = vmul.f32 %v5092_v62, %v6408_v18 }
0x10f5   : > { %v3174_v1 = vpop.permute.xlu1 %3173 }
0x10f7   : > { %v5094_v44 = vpop.eup %5093 }
0x10f8   : > { %v3169_v11 = vmul.f32 %v5094_v44, %v6412_v19 }
0x111a   : > { %v3156_v56 = vpop.xlane.xlu0 %3155 }
0x111b   : > { %5095 = vrcp.f32 %v3156_v56 }
0x111e   : > { %v3180_v55 = vpop.permute.xlu0 %3179 }
0x111f   : > { %4802 = vmatpush3.msra.mxu1 %v3180_v55 }
0x1120   : > { %4803 = vmatprep.subr.mxu1 %v5199_v54 }
0x1121   : > { %4804 = vmatpush3.msra.mxu1 %v3178_v35 }
0x1122   : > { %4805 = vmatprep.subr.mxu1 %v5199_v54 }
0x1123   : > { %4806 = vmatpush3.msra.mxu1 %v3176_v46 }
0x1124   : > { %4807 = vmatprep.subr.mxu1 %v5199_v54 }
0x1125   : > { %4808 = vmatpush3.msra.mxu1 %v3174_v1 }
0x1126   : > { %4810 = vmatmul.mubr.msk.f32.vlgmr.msra.gmra.mxu1 %vm1381_vm10, %v3168_v3  ;;  %v3129_v52 = vpop.xlane.xlu1 %3128  ;;  %4843 = vmatprep.subr.mxu1 %v5199_v54 }
0x1127   : > { %v3136_v8 = vsub.f32 %v6432_v26, %v3129_v52  ;;  %4812 = vmatprep.mubr.msk.f32.mxu1 %vm5203_vm4, %v5199_v54  ;;  %4844 = vmatpush3.msra.mxu1 %v4101_v0  ;;  %v6540_v52 = vrot.slane %v6225_v20, %v5978_v17 }
0x1128   : > { %v5096_v37 = vpop.eup %5095  ;;  %4845 = vmatprep.subr.mxu1 %v5199_v54 }
0x1129   : > { %v3144_v15 = vmul.f32 1.442695, %v3136_v8  ;;  %v3170_v16 = vmul.f32 %v5096_v37, %v6426_v5  ;;  %4846 = vmatpush3.msra.mxu1 %v4100_v50 }
0x112a   : > { %4813 = vmatmul.mubr.msk.f32.gmra.mxu1 %vm1381_vm10, %v3169_v11  ;;  %4885 = vmatprep.subr.mxu1 %v5199_v54 }
0x112b   : > { %5097 = vpow2.f32 %v3144_v15  ;;  %4815 = vmatprep.mubr.msk.f32.mxu1 %vm5203_vm4, %v5199_v54 }
0x112e   : > { %4816 = vmatmul.mubr.msk.f32.gmra.mxu1 %vm1381_vm10, %v3170_v16 }
0x112f   : > { %4818 = vmatprep.mubr.msk.f32.mxu1 %vm5203_vm4, %v5199_v54 }
0x1138   : > { %v5098_v51 = vpop.eup %5097 }
0x1139   : > { %v3157_v18 = vsel %vm1381_vm10, %v5098_v51, 0.0 }
0x113a   : > { %3158 = vadd.xlane.f32.xlu0 %v3157_v18 }
0x114f   : > { %v3132_v38 = vpop.xlane.xlu0 %3131 }
0x1150   : > { %v3137_v19 = vsub.f32 %v6440_v33, %v3132_v38 }
0x1152   : > { %v3146_v9 = vmul.f32 1.442695, %v3137_v19 }
0x1154   : > { %5099 = vpow2.f32 %v3146_v9 }
0x1161   : > { %v5100_v22 = vpop.eup %5099 }
0x1162   : > { %v3160_v24 = vsel %vm1394_vm0, %v5100_v22, 0.0 }
0x1163   : > { %3161 = vadd.xlane.f32.xlu1 %v3160_v24 }
0x11a2   : > { %v2954_v5 = vpop.f32.mrf.mxu1 }
0x11a4   : > { %v4761_v12 = vpop.f32.mrf.mxu1 }
0x11a6   : > { %v2959_v14 = vpop.f32.mrf.mxu1 }
0x11a8   : > { %v4764_v26 = vpop.f32.mrf.mxu1 }
0x11aa   : > { %v2964_v27 = vpop.f32.mrf.mxu1 }
0x11ac   : > { %v4767_v28 = vpop.f32.mrf.mxu1 }
0x11ae   : > { %v2969_v33 = vpop.f32.mrf.mxu1 }
0x11b0   : > { %v4770_v60 = vpop.f32.mrf.mxu1 }
0x11b2   : > { %v2974_v23 = vpop.f32.mrf.mxu1 }
0x11b4   : > { %v4773_v57 = vpop.f32.mrf.mxu1 }
0x11c3   : > { %v3159_v59 = vpop.xlane.xlu0 %3158 }
0x11c4   : > { %5101 = vrcp.f32 %v3159_v59 }
0x11d1   : > { %v5102_v61 = vpop.eup %5101 }
0x11d2   : > { %v3171_v30 = vmul.f32 %v5102_v61, %v5098_v51 }
0x11d4   : > { %4819 = vmatmul.mubr.msk.f32.gmra.mxu1 %vm1381_vm10, %v3171_v30 }
0x11d5   : > { %4821 = vmatprep.mubr.msk.f32.mxu1 %vm5203_vm4, %v5199_v54 }
0x11e6   : > { %v3270_v41 = vpop.f32.mrf.mxu1 }
0x11e7   : > { %4829 = vmatmul.mubr.msk.f32.vlgmr.msra.gmra.mxu0 %vm1260_vm5, %v3270_v41 }
0x11e8   : > { %v4811_v58 = vpop.f32.mrf.mxu1  ;;  %4831 = vmatprep.mubr.msk.f32.mxu0 %vm5203_vm4, %v5199_v54 }
0x11ea   : > { %v3275_v31 = vpop.f32.mrf.mxu1 }
0x11eb   : > { %4832 = vmatmul.mubr.msk.f32.gmra.mxu0 %vm1260_vm5, %v3275_v31 }
0x11ec   : > { %v4814_v36 = vpop.f32.mrf.mxu1  ;;  %v3162_v29 = vpop.xlane.xlu1 %3161  ;;  %4834 = vmatprep.mubr.msk.f32.mxu0 %vm5203_vm4, %v5199_v54 }
0x11ed   : > { %5103 = vrcp.f32 %v3162_v29 }
0x11ee   : > { %v3280_v42 = vpop.f32.mrf.mxu1 }
0x11ef   : > { %4835 = vmatmul.mubr.msk.f32.gmra.mxu0 %vm1260_vm5, %v3280_v42 }
0x11f0   : > { %v4817_v45 = vpop.f32.mrf.mxu1  ;;  %4837 = vmatprep.mubr.msk.f32.mxu0 %vm5203_vm4, %v5199_v54 }
0x11fa   : > { %v5104_v40 = vpop.eup %5103 }
0x11fb   : > { %v3172_v49 = vmul.f32 %v5104_v40, %v5100_v22 }
0x11fd   : > { %4822 = vmatmul.mubr.msk.f32.gmra.mxu1 %vm1381_vm10, %v3172_v49 }
0x11fe   : > { %4847 = vmatprep.mubr.msk.f32.mxu1 %vm5203_vm4, %v5199_v54 }
0x1201   : > { %4848 = vmatmul.mubr.msk.f32.vlgmr.msra.gmra.mxu1 %vm1260_vm5, %v2954_v5 }
0x1202   : > { %4850 = vmatprep.mubr.msk.f32.mxu1 %vm5203_vm4, %v5199_v54 }
0x1205   : > { %4851 = vmatmul.mubr.msk.f32.gmra.mxu1 %vm1260_vm5, %v2959_v14 }
0x1206   : > { %4853 = vmatprep.mubr.msk.f32.mxu1 %vm5203_vm4, %v5199_v54 }
0x1209   : > { %4854 = vmatmul.mubr.msk.f32.gmra.mxu1 %vm1260_vm5, %v2964_v27 }
0x120a   : > { %4856 = vmatprep.mubr.msk.f32.mxu1 %vm5203_vm4, %v5199_v54 }
0x120d   : > { %4857 = vmatmul.mubr.msk.f32.gmra.mxu1 %vm1260_vm5, %v2969_v33 }
0x120e   : > { %4859 = vmatprep.mubr.msk.f32.mxu1 %vm5203_vm4, %v5199_v54 }
0x1211   : > { %4860 = vmatmul.mubr.msk.f32.gmra.mxu1 %vm1260_vm5, %v2974_v23 }
0x1212   : > { %4917 = vmatprep.mubr.msk.f32.mxu1 %vm5203_vm4, %v5199_v54 }
0x1294   : > { %v3285_v53 = vpop.f32.mrf.mxu1 }
0x1295   : > { %4838 = vmatmul.mubr.msk.f32.gmra.mxu0 %vm1260_vm5, %v3285_v53  ;;  %v4148_v53 = vld [vmem:[%s6761_s9 + $0x30] sm:$0xff] }
0x1296   : > { %v4820_v6 = vpop.f32.mrf.mxu1  ;;  %4840 = vmatprep.mubr.msk.f32.mxu0 %vm5203_vm4, %v5199_v54 }
0x1297   : > { %v4147_v6 = vld [vmem:[%s6761_s9 + $0x28] sm:$0xff] }
0x12a7   : > { %v3375_v39 = vpop.f32.mrf.mxu0 }
0x12a9   : > { %v4830_v47 = vpop.f32.mrf.mxu0 }
0x12ab   : > { %v3380_v35 = vpop.f32.mrf.mxu0 }
0x12ad   : > { %v4833_v56 = vpop.f32.mrf.mxu0 }
0x12af   : > { %v3385_v46 = vpop.f32.mrf.mxu0 }
0x12b1   : > { %v4836_v55 = vpop.f32.mrf.mxu0 }
0x12bd   : > { %v3290_v62 = vpop.f32.mrf.mxu1 }
0x12be   : > { %4841 = vmatmul.mubr.msk.f32.gmra.mxu0 %vm1260_vm5, %v3290_v62 }
0x12bf   : > { %v4823_v1 = vpop.f32.mrf.mxu1  ;;  %4870 = vmatprep.mubr.msk.f32.mxu0 %vm5203_vm4, %v5199_v54 }
0x12c1   : > { %v3480_v3 = vpop.f32.mrf.mxu1 }
0x12c2   : > { %v3481_v44 = vadd.f32 %v3480_v3, %v3375_v39  ;;  %v4146_v39 = vld [vmem:[%s6761_s9 + $0x20] sm:$0xff] }
0x12c3   : > { %v4849_v8 = vpop.f32.mrf.mxu1 }
0x12c4   : > { %v3504_v11 = vadd.f32 %v3481_v44, %v6156_v13 }
0x12c5   : > { %v3485_v37 = vpop.f32.mrf.mxu1 }
0x12c6   : > { %v6544_v15 = vadd.f32 %v6540_v52, %v3504_v11  ;;  %v3486_v16 = vadd.f32 %v3485_v37, %v3380_v35 }
0x12c7   : > { %v4852_v51 = vpop.f32.mrf.mxu1 }
0x12c8   : > { %v3505_v18 = vadd.f32 %v3486_v16, %v6161_v10  ;;  %v3518_v38 = vsel %vm621_vm2, %v6544_v15, 0.0 }
0x12c9   : > { %v3490_v19 = vpop.f32.mrf.mxu1  ;;  %3519 = vadd.xlane.f32.xlu0 %v3518_v38 }
0x12ca   : > { %v3491_v9 = vadd.f32 %v3490_v19, %v3385_v46  ;;  %v3514_v21 = vadd.f32 %v6540_v52, %v3505_v18 }
0x12cb   : > { %v4855_v22 = vpop.f32.mrf.mxu1 }
0x12cc   : > { %v3506_v24 = vadd.f32 %v3491_v9, %v6166_v25  ;;  %v3521_v13 = vsel %vm621_vm2, %v3514_v21, 0.0 }
0x12cd   : > { %v3495_v34 = vpop.f32.mrf.mxu1  ;;  %3522 = vadd.xlane.f32.xlu1 %v3521_v13  ;;  %v6595_v13 = vrot.slane %v6225_v20, %v2176_v48 }
0x12ce   : > { %v6553_v0 = vadd.f32 %v6540_v52, %v3506_v24 }
0x12cf   : > { %v4858_v50 = vpop.f32.mrf.mxu1 }
0x12d0   : > { %v3524_v10 = vsel %vm621_vm2, %v6553_v0, 0.0 }
0x12d1   : > { %v3500_v5 = vpop.f32.mrf.mxu1  ;;  %3525 = vadd.xlane.f32.xlu0 %v3524_v10 }
0x12d3   : > { %v4861_v12 = vpop.f32.mrf.mxu1 }
0x1352   : > { %v3520_v14 = vpop.xlane.xlu0 %3519 }
0x1353   : > { %v3533_v26 = vmul.f32 0.03125, %v3520_v14 }
0x1355   : > { %v3538_v27 = vsub.f32 %v6544_v15, %v3533_v26  ;;  %v3390_v28 = vpop.f32.mrf.mxu0 }
0x1356   : > { %v3496_v25 = vadd.f32 %v3495_v34, %v3390_v28  ;;  %v3523_v33 = vpop.xlane.xlu1 %3522 }
0x1357   : > { %v3534_v60 = vmul.f32 0.03125, %v3523_v33  ;;  %v4839_v23 = vpop.f32.mrf.mxu0  ;;  %v3543_v57 = vmul.f32 %v3538_v27, %v3538_v27 }
0x1358   : > { %v3507_v59 = vadd.f32 %v3496_v25, %v6171_v32  ;;  %v4149_v32 = vld [vmem:[%s6761_s9 + $0x38] sm:$0xff] }
0x1359   : > { %v3539_v61 = vsub.f32 %v3514_v21, %v3534_v60  ;;  %v3548_v30 = vsel %vm621_vm2, %v3543_v57, 0.0  ;;  %4863 = vmatpush3.msra.mxu0 %v4149_v32  ;;  %v6590_v21 = vrot.slane %v6225_v20, %v5501_v2  ;;  %v4172_v23 = vld [vmem:[%s6763_s11 + $0xf8] sm:$0xff]  ;;  %v4171_v57 = vld [vmem:[%s6763_s11 + $0xf0] sm:$0xff]  ;;  %v4158_v32 = vld [vmem:[%s6763_s11 + $0x88] sm:$0xff] }
0x135a   : > { %3549 = vadd.xlane.f32.xlu1 %v3548_v30  ;;  %v3526_v41 = vpop.xlane.xlu0 %3525  ;;  %v3516_v42 = vadd.f32 %v6540_v52, %v3507_v59  ;;  %4864 = vmatprep.subr.mxu0 %v5199_v54  ;;  %v4170_v59 = vld [vmem:[%s6763_s11 + $0xe8] sm:$0xff]  ;;  %v4168_v30 = vld [vmem:[%s6763_s11 + $0xd8] sm:$0xff] }
0x135b   : > { %v3535_v58 = vmul.f32 0.03125, %v3526_v41  ;;  %v3544_v31 = vmul.f32 %v3539_v61, %v3539_v61  ;;  %4865 = vmatpush3.msra.mxu0 %v4148_v53  ;;  %4886 = vmatpush3.msra.mxu1 %v4172_v23  ;;  %v4167_v41 = vld [vmem:[%s6763_s11 + $0xd0] sm:$0xff]  ;;  %v4157_v53 = vld [vmem:[%s6763_s11 + $0x80] sm:$0xff] }
0x135c   : > { %v3527_v49 = vsel %vm621_vm2, %v3516_v42, 0.0  ;;  %4866 = vmatprep.subr.mxu0 %v5199_v54  ;;  %4887 = vmatprep.subr.mxu1 %v5199_v54 }
0x135d   : > { %v3540_v36 = vsub.f32 %v6553_v0, %v3535_v58  ;;  %v3551_v29 = vsel %vm621_vm2, %v3544_v31, 0.0  ;;  %4867 = vmatpush3.msra.mxu0 %v4147_v6  ;;  %4888 = vmatpush3.msra.mxu1 %v4171_v57  ;;  %v4166_v58 = vld [vmem:[%s6763_s11 + $0xc8] sm:$0xff]  ;;  %v4165_v31 = vld [vmem:[%s6763_s11 + $0xc0] sm:$0xff] }
0x135e   : > { %3552 = vadd.xlane.f32.xlu0 %v3551_v29  ;;  %4868 = vmatprep.subr.mxu0 %v5199_v54  ;;  %v4163_v29 = vld [vmem:[%s6763_s11 + $0xb0] sm:$0xff] }
0x135f   : > { %v3545_v45 = vmul.f32 %v3540_v36, %v3540_v36  ;;  %4869 = vmatpush3.msra.mxu0 %v4146_v39  ;;  %4889 = vmatprep.subr.mxu1 %v5199_v54 }
0x1360   : > { %4890 = vmatpush3.msra.mxu1 %v4170_v59 }
0x1361   : > { %v3554_v40 = vsel %vm621_vm2, %v3545_v45, 0.0  ;;  %4891 = vmatprep.subr.mxu1 %v5199_v54  ;;  %v4161_v45 = vld [vmem:[%s6763_s11 + $0xa0] sm:$0xff] }
0x1362   : > { %3555 = vadd.xlane.f32.xlu1 %v3554_v40  ;;  %3528 = vadd.xlane.f32.xlu0 %v3527_v49  ;;  %v4160_v40 = vld [vmem:[%s6763_s11 + $0x98] sm:$0xff]  ;;  %v4159_v49 = vld [vmem:[%s6763_s11 + $0x90] sm:$0xff] }
0x137e   : > { %v3395_v47 = vpop.f32.mrf.mxu0 }
0x137f   : > { %v3501_v35 = vadd.f32 %v3500_v5, %v3395_v47 }
0x1380   : > { %v4842_v56 = vpop.f32.mrf.mxu0 }
0x1381   : > { %v3508_v46 = vadd.f32 %v3501_v35, %v6176_v43 }
0x1383   : > { %v3517_v55 = vadd.f32 %v6540_v52, %v3508_v46 }
0x1385   : > { %v3530_v62 = vsel %vm947_vm3, %v3517_v55, 0.0 }
0x1386   : > { %3531 = vadd.xlane.f32.xlu1 %v3530_v62 }
0x13e3   : > { %v3550_v1 = vpop.xlane.xlu1 %3549 }
0x13e4   : > { %v3563_v3 = vmul.f32 0.03125, %v3550_v1 }
0x13e6   : > { %v3568_v44 = vadd.f32 1e-06, %v3563_v3 }
0x13e7   : > { %v3553_v8 = vpop.xlane.xlu0 %3552 }
0x13e8   : > { %5105 = vrsqrt.f32 %v3568_v44  ;;  %v3564_v11 = vmul.f32 0.03125, %v3553_v8 }
0x13ea   : > { %v3569_v37 = vadd.f32 1e-06, %v3564_v11 }
0x13eb   : > { %v3556_v16 = vpop.xlane.xlu1 %3555  ;;  %v3529_v51 = vpop.xlane.xlu0 %3528 }
0x13ec   : > { %5107 = vrsqrt.f32 %v3569_v37  ;;  %v3565_v18 = vmul.f32 0.03125, %v3556_v16  ;;  %v3536_v38 = vmul.f32 0.03125, %v3529_v51  ;;  %v4151_v16 = vld [vmem:[%s6762_s10 + $0x1] ss:$0 sm:$0xff] }
0x13ee   : > { %v3570_v19 = vadd.f32 1e-06, %v3565_v18  ;;  %v6583_v9 = vsub.f32 %v3516_v42, %v3536_v38  ;;  %v4162_v42 = vld [vmem:[%s6763_s11 + $0xa8] sm:$0xff] }
0x13f0   : > { %5109 = vrsqrt.f32 %v3570_v19  ;;  %v3546_v43 = vmul.f32 %v6583_v9, %v6583_v9 }
0x13f2   : > { %v3557_v52 = vsel %vm621_vm2, %v3546_v43, 0.0 }
0x13f3   : > { %3558 = vadd.xlane.f32.xlu0 %v3557_v52 }
0x13f5   : > { %v5106_v22 = vpop.eup %5105 }
0x13f6   : > { %v3578_v24 = vmul.f32 %v5106_v22, %v3538_v27 }
0x13f8   : > { %v3587_v34 = vmul.f32 %v6590_v21, %v3578_v24 }
0x13f9   : > { %v5108_v50 = vpop.eup %5107 }
0x13fa   : > { %v3596_v10 = vadd.f32 %v6595_v13, %v3587_v34  ;;  %v3579_v5 = vmul.f32 %v5108_v50, %v3539_v61  ;;  %v4169_v61 = vld [vmem:[%s6763_s11 + $0xe0] sm:$0xff] }
0x13fb   : > { %4892 = vmatpush3.msra.mxu1 %v4169_v61 }
0x13fc   : > { %4871 = vmatmul.mubr.msk.f32.vlgmr.msra.gmra.mxu0 %vm621_vm2, %v3596_v10  ;;  %v3588_v12 = vmul.f32 %v6590_v21, %v3579_v5  ;;  %4893 = vmatprep.subr.mxu1 %v5199_v54 }
0x13fd   : > { %v5110_v14 = vpop.eup %5109  ;;  %4873 = vmatprep.mubr.msk.f32.mxu0 %vm5203_vm4, %v5199_v54  ;;  %4894 = vmatpush3.msra.mxu1 %v4168_v30 }
0x13fe   : > { %v3597_v2 = vadd.f32 %v6595_v13, %v3588_v12  ;;  %v3580_v26 = vmul.f32 %v5110_v14, %v3540_v36  ;;  %4895 = vmatprep.subr.mxu1 %v5199_v54  ;;  %v4164_v36 = vld [vmem:[%s6763_s11 + $0xb8] sm:$0xff] }
0x13ff   : > { %4896 = vmatpush3.msra.mxu1 %v4167_v41 }
0x1400   : > { %4874 = vmatmul.mubr.msk.f32.gmra.mxu0 %vm621_vm2, %v3597_v2  ;;  %v3589_v48 = vmul.f32 %v6590_v21, %v3580_v26  ;;  %4897 = vmatprep.subr.mxu1 %v5199_v54 }
0x1401   : > { %4876 = vmatprep.mubr.msk.f32.mxu0 %vm5203_vm4, %v5199_v54  ;;  %4898 = vmatpush3.msra.mxu1 %v4166_v58 }
0x1402   : > { %v3598_v20 = vadd.f32 %v6595_v13, %v3589_v48  ;;  %4899 = vmatprep.subr.mxu1 %v5199_v54 }
0x1403   : > { %4900 = vmatpush3.msra.mxu1 %v4165_v31 }
0x1404   : > { %4877 = vmatmul.mubr.msk.f32.gmra.mxu0 %vm621_vm2, %v3598_v20  ;;  %4901 = vmatprep.subr.mxu1 %v5199_v54 }
0x1405   : > { %4879 = vmatprep.mubr.msk.f32.mxu0 %vm5203_vm4, %v5199_v54  ;;  %4902 = vmatpush3.msra.mxu1 %v4164_v36 }
0x1406   : > { %4903 = vmatprep.subr.mxu1 %v5199_v54 }
0x1407   : > { %4904 = vmatpush3.msra.mxu1 %v4163_v29 }
0x1408   : > { %4905 = vmatprep.subr.mxu1 %v5199_v54 }
0x1409   : > { %4906 = vmatpush3.msra.mxu1 %v4162_v42 }
0x140a   : > { %4907 = vmatprep.subr.mxu1 %v5199_v54 }
0x140b   : > { %4908 = vmatpush3.msra.mxu1 %v4161_v45 }
0x140c   : > { %4909 = vmatprep.subr.mxu1 %v5199_v54 }
0x140d   : > { %4910 = vmatpush3.msra.mxu1 %v4160_v40 }
0x140e   : > { %4911 = vmatprep.subr.mxu1 %v5199_v54 }
0x140f   : > { %v3532_v27 = vpop.xlane.xlu1 %3531  ;;  %4912 = vmatpush3.msra.mxu1 %v4159_v49 }
0x1410   : > { %v3537_v28 = vmul.f32 0.03125, %v3532_v27  ;;  %4913 = vmatprep.subr.mxu1 %v5199_v54 }
0x1411   : > { %4914 = vmatpush3.msra.mxu1 %v4158_v32 }
0x1412   : > { %v6612_v25 = vsub.f32 %v3517_v55, %v3537_v28  ;;  %4915 = vmatprep.subr.mxu1 %v5199_v54 }
0x1413   : > { %4916 = vmatpush3.msra.mxu1 %v4157_v53 }
0x1414   : > { %v3547_v33 = vmul.f32 %v6612_v25, %v6612_v25 }
0x1416   : > { %v3560_v60 = vsel %vm947_vm3, %v3547_v33, 0.0 }
0x1417   : > { %3561 = vadd.xlane.f32.xlu1 %v3560_v60 }
0x147c   : > { %v3559_v6 = vpop.xlane.xlu0 %3558 }
0x147d   : > { %v3566_v39 = vmul.f32 0.03125, %v3559_v6 }
0x147f   : > { %v3571_v47 = vadd.f32 1e-06, %v3566_v39 }
0x1481   : > { %5111 = vrsqrt.f32 %v3571_v47 }
0x148e   : > { %v5112_v35 = vpop.eup %5111 }
0x148f   : > { %v3581_v56 = vmul.f32 %v5112_v35, %v6583_v9 }
0x1491   : > { %v3590_v46 = vmul.f32 %v6590_v21, %v3581_v56 }
0x1493   : > { %v3599_v55 = vadd.f32 %v6595_v13, %v3590_v46 }
0x1495   : > { %4880 = vmatmul.mubr.msk.f32.gmra.mxu0 %vm621_vm2, %v3599_v55 }
0x1496   : > { %4882 = vmatprep.mubr.msk.f32.mxu0 %vm5203_vm4, %v5199_v54 }
0x14a0   : > { %v3562_v62 = vpop.xlane.xlu1 %3561 }
0x14a1   : > { %v3567_v1 = vmul.f32 0.03125, %v3562_v62 }
0x14a3   : > { %v3572_v3 = vadd.f32 1e-06, %v3567_v1 }
0x14a5   : > { %5113 = vrsqrt.f32 %v3572_v3 }
0x14b2   : > { %v5114_v44 = vpop.eup %5113 }
0x14b3   : > { %v3582_v8 = vmul.f32 %v5114_v44, %v6612_v25 }
0x14b5   : > { %v3591_v11 = vmul.f32 %v6590_v21, %v3582_v8 }
0x14b7   : > { %v3600_v37 = vadd.f32 %v6595_v13, %v3591_v11 }
0x14b9   : > { %4883 = vmatmul.mubr.msk.f32.gmra.mxu0 %vm621_vm2, %v3600_v37 }
0x14bc   : > { %v3695_v51 = vpop.f32.mrf.mxu0 }
0x14bd   : > { %v3696_v18 = vadd.f32 %v4151_v16, %v3695_v51 }
0x14be   : > { %v4872_v38 = vpop.f32.mrf.mxu0 }
0x14bf   : > { %v3719_v19 = vmul.f32 %v3696_v18, %v3696_v18 }
0x14c0   : > { %v3700_v9 = vpop.f32.mrf.mxu0 }
0x14c1   : > { %v3724_v43 = vmul.f32 %v3719_v19, %v3696_v18  ;;  %v3701_v52 = vadd.f32 %v4151_v16, %v3700_v9  ;;  %v5135_v9 = vld [vmem:[%s6757_s5 + $0x8] sm:$0x3f] }
0x14c2   : > { %v4875_v22 = vpop.f32.mrf.mxu0 }
0x14c3   : > { %v3729_v24 = vmul.f32 0.044715, %v3724_v43  ;;  %v3720_v34 = vmul.f32 %v3701_v52, %v3701_v52 }
0x14c4   : > { %v3705_v50 = vpop.f32.mrf.mxu0 }
0x14c5   : > { %v3734_v21 = vadd.f32 %v3729_v24, %v3696_v18  ;;  %v3725_v10 = vmul.f32 %v3720_v34, %v3701_v52  ;;  %v3706_v13 = vadd.f32 %v4151_v16, %v3705_v50 }
0x14c6   : > { %v4878_v5 = vpop.f32.mrf.mxu0 }
0x14c7   : > { %v3739_v12 = vmul.f32 0.7978846, %v3734_v21  ;;  %v3730_v14 = vmul.f32 0.044715, %v3725_v10  ;;  %v3721_v2 = vmul.f32 %v3706_v13, %v3706_v13 }
0x14c9   : > { %5115 = vtanh.f32 %v3739_v12  ;;  %v3735_v26 = vadd.f32 %v3730_v14, %v3701_v52  ;;  %v3726_v48 = vmul.f32 %v3721_v2, %v3706_v13 }
0x14cb   : > { %v3740_v20 = vmul.f32 0.7978846, %v3735_v26  ;;  %v3731_v27 = vmul.f32 0.044715, %v3726_v48 }
0x14cd   : > { %5117 = vtanh.f32 %v3740_v20  ;;  %v3736_v28 = vadd.f32 %v3731_v27, %v3706_v13 }
0x14cf   : > { %v3741_v25 = vmul.f32 0.7978846, %v3736_v28 }
0x14d1   : > { %5119 = vtanh.f32 %v3741_v25 }
0x14d6   : > { %v5116_v33 = vpop.eup %5115 }
0x14d7   : > { %v3749_v60 = vadd.f32 1.0, %v5116_v33 }
0x14d9   : > { %v3754_v23 = vmul.f32 0.5, %v3749_v60 }
0x14da   : > { %v5118_v57 = vpop.eup %5117 }
0x14db   : > { %v3759_v59 = vmul.f32 %v3754_v23, %v3696_v18  ;;  %v3750_v61 = vadd.f32 1.0, %v5118_v57 }
0x14dd   : > { %4918 = vmatmul.mubr.f32.vlgmr.msra.gmra.mxu1 %v3759_v59  ;;  %v3755_v30 = vmul.f32 0.5, %v3750_v61 }
0x14de   : > { %v5120_v41 = vpop.eup %5119  ;;  %4920 = vmatprep.mubr.msk.f32.mxu1 %vm5203_vm4, %v5199_v54 }
0x14df   : > { %v3760_v58 = vmul.f32 %v3755_v30, %v3701_v52  ;;  %v3751_v31 = vadd.f32 1.0, %v5120_v41 }
0x14e1   : > { %4921 = vmatmul.mubr.f32.gmra.mxu1 %v3760_v58  ;;  %v3756_v36 = vmul.f32 0.5, %v3751_v31  ;;  %v5136_v58 = vld [vmem:[%s6756_s4 + $0x10] sm:$0xf] }
0x14e2   : > { %4923 = vmatprep.mubr.msk.f32.mxu1 %vm5203_vm4, %v5199_v54  ;;  %v3903_v31 = vrot.slane %v5136_v58, %v5978_v17 }
0x14e3   : > { %v3761_v29 = vmul.f32 %v3756_v36, %v3706_v13 }
0x14e5   : > { %4924 = vmatmul.mubr.f32.gmra.mxu1 %v3761_v29 }
0x14e6   : > { %4926 = vmatprep.mubr.msk.f32.mxu1 %vm5203_vm4, %v5199_v54 }
0x1555   : > { %v3710_v42 = vpop.f32.mrf.mxu0 }
0x1556   : > { %v3711_v45 = vadd.f32 %v4151_v16, %v3710_v42 }
0x1557   : > { %v4881_v40 = vpop.f32.mrf.mxu0 }
0x1558   : > { %v3722_v49 = vmul.f32 %v3711_v45, %v3711_v45 }
0x155a   : > { %v3727_v32 = vmul.f32 %v3722_v49, %v3711_v45 }
0x155c   : > { %v3732_v53 = vmul.f32 0.044715, %v3727_v32 }
0x155e   : > { %v3737_v6 = vadd.f32 %v3732_v53, %v3711_v45 }
0x1560   : > { %v3742_v39 = vmul.f32 0.7978846, %v3737_v6 }
0x1562   : > { %5121 = vtanh.f32 %v3742_v39 }
0x156f   : > { %v5122_v47 = vpop.eup %5121 }
0x1570   : > { %v3752_v35 = vadd.f32 1.0, %v5122_v47 }
0x1572   : > { %v3757_v56 = vmul.f32 0.5, %v3752_v35 }
0x1574   : > { %v3762_v46 = vmul.f32 %v3757_v56, %v3711_v45 }
0x1576   : > { %4927 = vmatmul.mubr.f32.gmra.mxu1 %v3762_v46 }
0x1577   : > { %4929 = vmatprep.mubr.msk.f32.mxu1 %vm5203_vm4, %v5199_v54  ;;  %v3784_v54 = vrot.slane %v5135_v9, %v2362_v7 }
0x1579   : > { %v3715_v55 = vpop.f32.mrf.mxu0 }
0x157a   : > { %v3716_v62 = vadd.f32 %v4151_v16, %v3715_v55 }
0x157b   : > { %v4884_v1 = vpop.f32.mrf.mxu0 }
0x157c   : > { %v3723_v3 = vmul.f32 %v3716_v62, %v3716_v62 }
0x157e   : > { %v3728_v44 = vmul.f32 %v3723_v3, %v3716_v62 }
0x1580   : > { %v3733_v8 = vmul.f32 0.044715, %v3728_v44 }
0x1582   : > { %v3738_v11 = vadd.f32 %v3733_v8, %v3716_v62 }
0x1584   : > { %v3743_v37 = vmul.f32 0.7978846, %v3738_v11 }
0x1586   : > { %5123 = vtanh.f32 %v3743_v37 }
0x1593   : > { %v5124_v51 = vpop.eup %5123 }
0x1594   : > { %v3753_v18 = vadd.f32 1.0, %v5124_v51 }
0x1596   : > { %v3758_v38 = vmul.f32 0.5, %v3753_v18 }
0x1598   : > { %v3763_v19 = vmul.f32 %v3758_v38, %v3716_v62 }
0x159a   : > { %4930 = vmatmul.mubr.f32.gmra.mxu1 %v3763_v19 }
0x159d   : > { %v3851_v16 = vpop.f32.mrf.mxu1 }
0x159e   : > { %v3852_v43 = vadd.f32 %v3851_v16, %v3784_v54 }
0x159f   : > { %v4919_v52 = vpop.f32.mrf.mxu1 }
0x15a0   : > { %v3872_v22 = vadd.f32 %v3852_v43, %v6544_v15 }
0x15a1   : > { %v3856_v24 = vpop.f32.mrf.mxu1 }
0x15a2   : > { %v3874_v34 = vsel %vm621_vm2, %v3872_v22, 0.0 }
0x15a3   : > { %3875 = vadd.xlane.f32.xlu0 %v3874_v34  ;;  %v4922_v50 = vpop.f32.mrf.mxu1 }
0x15a5   : > { %v3860_v21 = vpop.f32.mrf.mxu1 }
0x15a6   : > { %v3861_v10 = vadd.f32 %v3860_v21, %v3784_v54 }
0x15a7   : > { %v4925_v13 = vpop.f32.mrf.mxu1 }
0x15a8   : > { %v3873_v5 = vadd.f32 %v3861_v10, %v6553_v0 }
0x15aa   : > { %v3877_v12 = vsel %vm621_vm2, %v3873_v5, 0.0 }
0x15ab   : > { %3878 = vadd.xlane.f32.xlu1 %v3877_v12 }
0x162c   : > { %v3876_v63 = vpop.xlane.xlu0 %3875 }
0x162d   : > { %v3880_v7 = vmul.f32 0.03125, %v3876_v63 }
0x162f   : > { %v3882_v14 = vsub.f32 %v3872_v22, %v3880_v7 }
0x1631   : > { %v3884_v2 = vmul.f32 %v3882_v14, %v3882_v14 }
0x1633   : > { %v3886_v26 = vsel %vm621_vm2, %v3884_v2, 0.0 }
0x1634   : > { %3887 = vadd.xlane.f32.xlu0 %v3886_v26  ;;  %v3879_v15 = vpop.xlane.xlu1 %3878 }
0x1635   : > { %v3881_v48 = vmul.f32 0.03125, %v3879_v15 }
0x1636   : > { %v3865_v20 = vpop.f32.mrf.mxu1 }
0x1637   : > { %v3883_v27 = vsub.f32 %v3873_v5, %v3881_v48 }
0x1638   : > { %v4928_v28 = vpop.f32.mrf.mxu1 }
0x1639   : > { %v3885_v25 = vmul.f32 %v3883_v27, %v3883_v27 }
0x163b   : > { %v3889_v33 = vsel %vm621_vm2, %v3885_v25, 0.0  ;;  %vm3924_vm2 = vcmask 256002  }
0x163c   : > { %3890 = vadd.xlane.f32.xlu1 %v3889_v33 }
0x165a   : > { %v3869_v0 = vpop.f32.mrf.mxu1 }
0x165c   : > { %v4931_v60 = vpop.f32.mrf.mxu1 }
0x16bd   : > { %v3888_v23 = vpop.xlane.xlu0 %3887 }
0x16be   : > { %v3892_v57 = vmul.f32 0.03125, %v3888_v23 }
0x16c0   : > { %v3894_v59 = vadd.f32 1e-06, %v3892_v57 }
0x16c2   : > { %5125 = vrsqrt.f32 %v3894_v59 }
0x16c5   : > { %v3891_v61 = vpop.xlane.xlu1 %3890 }
0x16c6   : > { %v3893_v30 = vmul.f32 0.03125, %v3891_v61 }
0x16c8   : > { %v3895_v41 = vadd.f32 1e-06, %v3893_v30 }
0x16ca   : > { %5127 = vrsqrt.f32 %v3895_v41 }
0x16cf   : > { %v5126_v36 = vpop.eup %5125 }
0x16d0   : > { %v3898_v29 = vmul.f32 %v5126_v36, %v3882_v14 }
0x16d2   : > { %v3904_v42 = vmul.f32 %v3903_v31, %v3898_v29 }
0x16d4   : > { %v3910_v45 = vadd.f32 %v5505_v4, %v3904_v42 }
0x16d6   : > { %v3913_v40 = vrot.slane %v3910_v45, 1 }
0x16d7   : > { %v5128_v49 = vpop.eup %5127 }
0x16d8   : > { %v3899_v32 = vmul.f32 %v5128_v49, %v3883_v27  ;;  %v3915_v53 = vadd.f32 %v3913_v40, %v3910_v45 }
0x16da   : > { %v3905_v6 = vmul.f32 %v3903_v31, %v3899_v32  ;;  %v3916_v39 = vmul.f32 0.5, %v3915_v53 }
0x16dc   : > { %v3911_v47 = vadd.f32 %v5505_v4, %v3905_v6  ;;  %3918 = vst.msk [vmem:[%s406_s28] sm:$0x1] %vm3917_vm1, %v3916_v39 }
0x16de   : > { %v3920_v17 = vrot.slane %v3911_v47, 1 }
0x16e0   : > { %v3922_v35 = vadd.f32 %v3920_v17, %v3911_v47 }
0x16e2   : > { %v3923_v56 = vmul.f32 0.5, %v3922_v35 }
0x16e4   : > { %3925 = vst.msk [vmem:[%s406_s28 - $0x1] sm:$0x4] %vm3924_vm2, %v3923_v56 }
0x16e5   : > { %5150 = shalt.err (!%p5147_p3)
}
0x16e6   : > { %s5151_s0 = scalar_lea.hbm %s3938_s19, 32  ;;  %s5155_s18 = scalar_lea.hbm %s6764_s12, 64 }
0x16e7   : > { %p5152_p4 = scmp.ne.s32.totalorder %s3938_s19, %s5151_s0  ;;  %p5156_p9 = scmp.lt.s32.totalorder %s3938_s19, %s6764_s12 }
0x16e8   : > { %p5157_p10 = scmp.lt.s32.totalorder %s5155_s18, %s5151_s0 }
0x16e9   : > { %p5153_p7 = pnand %p5152_p4, %p5313_p5 }
0x16ea   : > { %p5158_p11 = por %p5157_p10, %p5156_p9 }
0x16eb   : > { %p5154_p8 = pneg %p5153_p7 }
0x16ed   : > { %p5159_p12 = pnand %p5158_p11, %p5154_p8 }
0x16ef   : > { %5162 = shalt.err (!%p5159_p12)
}
0x16f0   : > { %4932 = dma.vmem_to_hbm [thread:$0]  (%p5313_p5), %s3941_s29, 32, %s3938_s19, %s3927_s26  }
0x16f1 PF: > { %p4938_p13 = scmp.ge.s32.totalorder %s5197_s24, 2  ;;  %s3952_s17 = sand.u32 1, %s5185_s21  }
0x16f2   : > { %s3953_s30 = scalar_lea.sflag [#allocation4], %s3952_s17 }
0x16f3   : > { %p4935_p0 = pnand %p4938_p13, %p5317_p6 }
0x16f5   : > { %p4936_p1 = pneg %p4935_p0 }
0x16f7   : > { %5180 = dma.done.wait (%p4936_p1), %s3953_s30, 32  }
0x16f8   : > { %5182 = vsyncadd (%p4936_p1), %s3953_s30, 4294967264  ;;  %s6784_s0 = sld [smem:[#allocation6_spill]]  ;;  %p22_p2 = scmp.ge.s32.totalorder %s5300_s27, 4  }
0x16f9   : > { %s6785_s23 = sld [smem:[#allocation7_spill]]  ;;  %s6786_s21 = smov %s5189_s22 }
0x16fa   : > { %s6788_s24 = smov %s5300_s27  ;;  %24 = sbr.rel (!%p22_p2) target bundleno = 5 (0x5), region = 113 }
0x16fe   : > { %s6787_s22 = smov %s6784_s0 }
0x16ff   :  { %3958 = vsyncpa [#allocation4], 1 }
0x1700   :  { %3960 = vsyncpa [#allocation4 + $0x1], 1 }

</bundles_post_ra>
